<compile_context>
chip_gen: v6e
topology: v6e:2x2x1
jax: 0.10.0
libtpu: 0.0.40
codegen_flags: <defaults>
</compile_context>

<pallas_src>
import math
import functools

import jax
import jax.numpy as jnp
from jax.experimental import pallas as pl
from jax.experimental.pallas import tpu as pltpu  # noqa: F401  (TPU backend)

_BF = jnp.bfloat16


# --------------------------------------------------------------------------
# In-kernel helpers (traced inside Pallas kernels) — all batched over B
# --------------------------------------------------------------------------

def _bdot(x3, w):
    """(B, L, Din) @ (Din, Dout) on the MXU: bf16 operands, f32 accumulation.

    Folds (B, L) into one sublane axis when L is a multiple of 8 (free
    relayout), otherwise falls back to a batched einsum.
    """
    B, L, Din = x3.shape
    if L % 8 == 0:
        y = jnp.dot(x3.reshape(B * L, Din).astype(_BF), w,
                    preferred_element_type=jnp.float32)
        return y.reshape(B, L, w.shape[1])
    return jnp.einsum('bld,df->blf', x3.astype(_BF), w,
                      preferred_element_type=jnp.float32)


def _mavg(x, K):
    """Edge-replicating moving average over axis 1 (matches torch moving_avg).

    x: (B, L, D), K odd.
    """
    B, L, D = x.shape
    half = (K - 1) // 2
    acc = x
    for off in range(1, half + 1):
        left = jnp.concatenate(
            [jnp.broadcast_to(x[:, 0:1], (B, off, D)), x[:, :L - off]], axis=1)
        right = jnp.concatenate(
            [x[:, off:], jnp.broadcast_to(x[:, L - 1:L], (B, off, D))], axis=1)
        acc = acc + left + right
    return acc / float(K)


def _my_layernorm(x, w, b):
    """nn.LayerNorm over features, then subtract mean over the seq dim.

    x: (B, L, D); w, b: (1, D).
    """
    mu = jnp.mean(x, axis=-1, keepdims=True)
    xc = x - mu
    var = jnp.mean(xc * xc, axis=-1, keepdims=True)
    norm = xc * jax.lax.rsqrt(var + 1e-5) * w + b
    return norm - jnp.mean(norm, axis=1, keepdims=True)


def _tok_embed(x, embw):
    """Conv1d(k=1, no bias) token embedding: x (B, L, C) @ embw (C, Dm).

    C is tiny (typically 1) -> unrolled multiply-add avoids a degenerate MXU
    contraction.
    """
    C = x.shape[-1]
    emb = x[..., 0:1] * embw[0:1, :]
    for c in range(1, C):
        emb = emb + x[..., c:c + 1] * embw[c:c + 1, :]
    return emb


def _enc_block(x, V, wo, w1, w2, K):
    """o_proj + residual + decomp1 + conv1/relu/conv2 + decomp2 (EncoderLayer)."""
    xr = x + _bdot(V, wo)                 # attention output projection + res
    xs = xr - _mavg(xr, K)                # decomp1 (seasonal part)
    h = jnp.maximum(_bdot(xs, w1), 0.0)   # conv1 (k=1) + relu
    y = _bdot(h, w2)                      # conv2 (k=1)
    z = y + xr
    return z - _mavg(z, K)                # decomp2 (seasonal out)


# --------------------------------------------------------------------------
# Pallas kernels (grid-less: whole arrays mapped into VMEM)
# --------------------------------------------------------------------------

def _matmul_kernel(x_ref, w_ref, o_ref):
    o_ref[...] = jnp.dot(x_ref[...].astype(_BF), w_ref[...],
                         preferred_element_type=jnp.float32)


def _prep_kernel(x_ref, embw_ref, pex_ref, ped_ref,
                 ex_ref, ed_ref, td_ref, *, K, Lg):
    """Token+pos embedding of x, series_decomp(x), decoder-input assembly."""
    x = x_ref[...]                                   # (B, Lx, C)
    B, Lx, C = x.shape
    embw = embw_ref[...]                             # (C, Dm)
    ex_ref[...] = _tok_embed(x, embw) + pex_ref[...]
    trend = _mavg(x, K)
    seasonal = x - trend
    xmean = jnp.mean(x, axis=1, keepdims=True)       # (B, 1, C)
    td_ref[...] = jnp.concatenate(
        [trend, jnp.broadcast_to(xmean, (B, Lg, C))], axis=1)
    sdec = jnp.concatenate(
        [seasonal, jnp.zeros((B, Lg, C), jnp.float32)], axis=1)
    ed_ref[...] = _tok_embed(sdec, embw) + ped_ref[...]


def _enc_post_kernel(x_ref, v_ref, wo_ref, w1_ref, w2_ref, o_ref, *, K):
    o_ref[...] = _enc_block(x_ref[...], v_ref[...], wo_ref[...],
                            w1_ref[...], w2_ref[...], K)


def _enc_post_norm_kernel(x_ref, v_ref, wo_ref, w1_ref, w2_ref,
                          nw_ref, nb_ref, o_ref, *, K):
    """Last encoder layer: encoder block + fused final layerNorm."""
    s = _enc_block(x_ref[...], v_ref[...], wo_ref[...],
                   w1_ref[...], w2_ref[...], K)
    o_ref[...] = _my_layernorm(s, nw_ref[...], nb_ref[...])


def _norm_kernel(x_ref, w_ref, b_ref, o_ref):
    o_ref[...] = _my_layernorm(x_ref[...], w_ref[...], b_ref[...])


def _dec_mid_kernel(x_ref, vs_ref, cross_ref, wos_ref, wq_ref, wkv_ref,
                    xs_ref, t1_ref, q_ref, kv_ref, *, K):
    """Self-attn o_proj + residual + decomp1 + cross Q and fused K/V proj."""
    x1 = x_ref[...] + _bdot(vs_ref[...], wos_ref[...])
    m1 = _mavg(x1, K)
    x1s = x1 - m1
    xs_ref[...] = x1s
    t1_ref[...] = m1
    q_ref[...] = _bdot(x1s, wq_ref[...])
    kv_ref[...] = _bdot(cross_ref[...], wkv_ref[...])


def _dec_post_kernel(xs_ref, t1_ref, vc_ref, woc_ref, w1_ref, w2_ref, wt_ref,
                     o_ref, rt_ref, *, K):
    """Cross o_proj + decomp2 + FFN + decomp3 + circular Conv1d(k=3) trend proj."""
    xs = xs_ref[...]                                 # (B, L, Dm)
    B, L, Dm = xs.shape
    C = rt_ref.shape[2]
    x2 = xs + _bdot(vc_ref[...], woc_ref[...])
    m2 = _mavg(x2, K)
    x2s = x2 - m2
    h = jnp.maximum(_bdot(x2s, w1_ref[...]), 0.0)
    y = _bdot(h, w2_ref[...])
    z = x2s + y
    m3 = _mavg(z, K)
    o_ref[...] = z - m3
    rt = t1_ref[...] + m2 + m3                       # residual trend (B, L, Dm)
    # Conv1d(k=3, circular padding) over the length dim: three shifted taps +
    # per-output-channel multiply-reduce (C is tiny).
    wt = wt_ref[...]                                 # (C, 3*Dm)
    left = jnp.concatenate([rt[:, L - 1:L], rt[:, :L - 1]], axis=1)    # t-1
    right = jnp.concatenate([rt[:, 1:], rt[:, 0:1]], axis=1)           # t+1
    taps = (left, rt, right)
    cols = []
    for c in range(C):
        col = jnp.zeros((B, L, 1), jnp.float32)
        for t in range(3):
            wk = wt[c:c + 1, t * Dm:(t + 1) * Dm]                      # (1, Dm)
            col = col + jnp.sum(taps[t] * wk, axis=-1, keepdims=True)
        cols.append(col)
    rt_ref[...] = cols[0] if C == 1 else jnp.concatenate(cols, axis=-1)


def _dec_final_kernel(x_ref, w_ref, b_ref, pw_ref, pb_ref, tr_ref, o_ref):
    """layerNorm + final Linear projection + trend add (fused)."""
    x = x_ref[...]                                   # (B, L, Dm)
    C = o_ref.shape[2]
    n = _my_layernorm(x, w_ref[...], b_ref[...])
    pw = pw_ref[...]                                 # (C, Dm)
    cols = [jnp.sum(n * pw[c:c + 1, :], axis=-1, keepdims=True)
            for c in range(C)]
    proj = cols[0] if C == 1 else jnp.concatenate(cols, axis=-1)
    o_ref[...] = proj + pb_ref[...] + tr_ref[...]


# --------------------------------------------------------------------------
# Kernel wrappers (grid-less: whole arrays mapped into VMEM)
# --------------------------------------------------------------------------

def matmul2d(x, w):
    """x: (M, K) f32, w: (K, N) bf16 -> (M, N) f32. Whole arrays in VMEM."""
    M = x.shape[0]
    N = w.shape[1]
    return pl.pallas_call(
        _matmul_kernel,
        out_shape=jax.ShapeDtypeStruct((M, N), jnp.float32),
    )(x, w)


def prep_call(x, embw, pe, Lg, K):
    B, Lx, C = x.shape
    Dm = embw.shape[1]
    Ldec = Lx + Lg
    return pl.pallas_call(
        functools.partial(_prep_kernel, K=K, Lg=Lg),
        out_shape=(jax.ShapeDtypeStruct((B, Lx, Dm), jnp.float32),
                   jax.ShapeDtypeStruct((B, Ldec, Dm), jnp.float32),
                   jax.ShapeDtypeStruct((B, Ldec, C), jnp.float32)),
    )(x, embw, pe[:Lx], pe[:Ldec])


def enc_post_call(x, V, wo, w1, w2, K, norm=None):
    if norm is None:
        return pl.pallas_call(
            functools.partial(_enc_post_kernel, K=K),
            out_shape=jax.ShapeDtypeStruct(x.shape, jnp.float32),
        )(x, V, wo, w1, w2)
    return pl.pallas_call(
        functools.partial(_enc_post_norm_kernel, K=K),
        out_shape=jax.ShapeDtypeStruct(x.shape, jnp.float32),
    )(x, V, wo, w1, w2, norm['w'], norm['b'])


def norm_call(x, p):
    return pl.pallas_call(
        _norm_kernel,
        out_shape=jax.ShapeDtypeStruct(x.shape, jnp.float32),
    )(x, p['w'], p['b'])


def dec_mid_call(x, Vs, cross, wos, wq, wkv, K):
    B, L, Dm = x.shape
    S = cross.shape[1]
    return pl.pallas_call(
        functools.partial(_dec_mid_kernel, K=K),
        out_shape=(jax.ShapeDtypeStruct((B, L, Dm), jnp.float32),
                   jax.ShapeDtypeStruct((B, L, Dm), jnp.float32),
                   jax.ShapeDtypeStruct((B, L, wq.shape[1]), jnp.float32),
                   jax.ShapeDtypeStruct((B, S, wkv.shape[1]), jnp.float32)),
    )(x, Vs, cross, wos, wq, wkv)


def dec_post_call(xs, t1, Vc, woc, w1, w2, wt, K):
    B, L, Dm = xs.shape
    C = wt.shape[0]
    return pl.pallas_call(
        functools.partial(_dec_post_kernel, K=K),
        out_shape=(jax.ShapeDtypeStruct((B, L, Dm), jnp.float32),
                   jax.ShapeDtypeStruct((B, L, C), jnp.float32)),
    )(xs, t1, Vc, woc, w1, w2, wt)


def dec_final_call(x, p, pw, pb, trend):
    B, L, _ = x.shape
    C = pw.shape[0]
    return pl.pallas_call(
        _dec_final_kernel,
        out_shape=jax.ShapeDtypeStruct((B, L, C), jnp.float32),
    )(x, p['w'], p['b'], pw, pb, trend)


# --------------------------------------------------------------------------
# Glue (plain JAX): FFT autocorrelation, top-k, data-dependent aggregation
# --------------------------------------------------------------------------

def positional_embedding(d_model, max_len=5000):
    position = jnp.arange(max_len, dtype=jnp.float32)[:, None]
    div_term = jnp.exp(jnp.arange(0, d_model, 2, dtype=jnp.float32)
                       * (-math.log(10000.0) / d_model))
    pe = jnp.zeros((max_len, d_model), jnp.float32)
    pe = pe.at[:, 0::2].set(jnp.sin(position * div_term))
    pe = pe.at[:, 1::2].set(jnp.cos(position * div_term))
    return pe  # (max_len, d_model)


def autocorrelation(queries, keys, values, factor):
    """Autocorrelation.forward (training branch), vectorized aggregation."""
    B, L, H, E = queries.shape
    S = values.shape[1]
    D = values.shape[3]
    if L > S:
        zeros = jnp.zeros((B, L - S, H, D), jnp.float32)
        values = jnp.concatenate([values, zeros], axis=1)
        keys = jnp.concatenate([keys, zeros], axis=1)
    else:
        values = values[:, :L]
        keys = keys[:, :L]

    q = jnp.transpose(queries, (0, 2, 3, 1))       # (B, H, E, L)
    k = jnp.transpose(keys, (0, 2, 3, 1))
    v = jnp.transpose(values, (0, 2, 3, 1))        # (B, H, D, L)

    # TODO(synk): FFT-based correlation (rfft/irfft) and top-k have no clean
    # Pallas TPU equivalent; kept in XLA.
    q_fft = jnp.fft.rfft(q, axis=-1)
    k_fft = jnp.fft.rfft(k, axis=-1)
    corr = jnp.fft.irfft(q_fft * jnp.conj(k_fft), n=L, axis=-1)  # (B, H, E, L)

    top_k = int(factor * math.log(L))
    mean_value = jnp.mean(jnp.mean(corr, axis=1), axis=1)        # (B, L)
    _, index = jax.lax.top_k(jnp.mean(mean_value, axis=0), top_k)  # (top_k,)
    weights = jnp.take(mean_value, index, axis=1)                # (B, top_k)
    tmp_corr = jax.nn.softmax(weights, axis=-1)

    # One gather + weighted contraction instead of a loop of rolls.
    roll_idx = (jnp.arange(L)[None, :] + index[:, None]) % L     # (top_k, L)
    patterns = jnp.take(v, roll_idx, axis=-1)                    # (B,H,D,k,L)
    delays_agg = jnp.einsum('bhdkl,bk->bhdl', patterns, tmp_corr)
    return jnp.transpose(delays_agg, (0, 3, 1, 2))               # (B, L, H, D)


def qkv_proj(x, wqkv, H, dk, dv):
    """Fused Q/K/V projection via one Pallas matmul, split outside."""
    B, L, Dm = x.shape
    qkv = matmul2d(x.reshape(B * L, Dm), wqkv).reshape(B, L, H * (2 * dk + dv))
    q = qkv[..., :H * dk].reshape(B, L, H, dk)
    k = qkv[..., H * dk:2 * H * dk].reshape(B, L, H, dk)
    v = qkv[..., 2 * H * dk:].reshape(B, L, H, dv)
    return q, k, v


def model_forward(params, x, ground_truth, cfg, pe):
    B, Lx, C = x.shape
    Lg = ground_truth.shape[1]
    K = cfg['moving_avg']
    H, dk, dv = cfg['num_heads'], cfg['d_keys'], cfg['d_values']
    factor = cfg['factor']

    # Embedding of x, series_decomp(x) and decoder-input assembly (1 kernel).
    embed_x, embed_dec, trend_dec = prep_call(x, params['emb_conv'], pe, Lg, K)

    # ---- Encoder ----
    enc = embed_x
    n_enc = len(params['enc_layers'])
    for li, lp in enumerate(params['enc_layers']):
        q, k, v = qkv_proj(enc, lp['wqkv'], H, dk, dv)
        V = autocorrelation(q, k, v, factor).reshape(B, Lx, H * dv)
        norm = params['enc_norm'] if li == n_enc - 1 else None
        enc = enc_post_call(enc, V, lp['wo'], lp['w1'], lp['w2'], K, norm=norm)
    if n_enc == 0:
        enc = norm_call(enc, params['enc_norm'])

    # ---- Decoder ----
    dec = embed_dec
    Ld = dec.shape[1]
    trend_acc = trend_dec
    for lp in params['dec_layers']:
        q, k, v = qkv_proj(dec, lp['wqkv_self'], H, dk, dv)
        Vs = autocorrelation(q, k, v, factor).reshape(B, Ld, H * dv)
        x1s, t1, qc, kv = dec_mid_call(dec, Vs, enc, lp['wo_self'],
                                       lp['wq_cross'], lp['wkv_cross'], K)
        qc = qc.reshape(B, Ld, H, dk)
        kc = kv[..., :H * dk].reshape(B, Lx, H, dk)
        vc = kv[..., H * dk:].reshape(B, Lx, H, dv)
        Vc = autocorrelation(qc, kc, vc, factor).reshape(B, Ld, H * dv)
        dec, rtrend = dec_post_call(x1s, t1, Vc, lp['wo_cross'],
                                    lp['w1'], lp['w2'], lp['trend_proj_t'], K)
        trend_acc = trend_acc + rtrend

    out = dec_final_call(dec, params['dec_norm'], params['proj_w_t'],
                         params['proj_b'], trend_acc)
    return out[:, -Lg:, :]


# --------------------------------------------------------------------------
# Deterministic parameter init (matmul weights stored (in, out) in bf16)
# --------------------------------------------------------------------------

def init_model_params(key, cfg):
    Dm = cfg['hidden_size']
    C = cfg['num_channels']
    H = cfg['num_heads']
    dk, dv, F = cfg['d_keys'], cfg['d_values'], cfg['d_ff']

    keys = jax.random.split(key, 64)
    kit = iter(keys)

    def w(shape, dtype=_BF, scale=0.05):
        return (scale * jax.random.normal(next(kit), shape,
                                          jnp.float32)).astype(dtype)

    params = dict(emb_conv=w((C, Dm), jnp.float32))

    params['enc_layers'] = [dict(
        wqkv=w((Dm, H * (2 * dk + dv))),        # [q | k | v] fused
        wo=w((H * dv, Dm)),
        w1=w((Dm, F)),
        w2=w((F, Dm))) for _ in range(cfg['e_layers'])]
    params['enc_norm'] = dict(w=jnp.ones((1, Dm), jnp.float32),
                              b=jnp.zeros((1, Dm), jnp.float32))

    params['dec_layers'] = [dict(
        wqkv_self=w((Dm, H * (2 * dk + dv))),
        wo_self=w((H * dv, Dm)),
        wq_cross=w((Dm, H * dk)),
        wkv_cross=w((Dm, H * (dk + dv))),       # [k | v] fused
        wo_cross=w((H * dv, Dm)),
        w1=w((Dm, F)),
        w2=w((F, Dm)),
        trend_proj_t=w((C, 3 * Dm), jnp.float32))   # (c_out, 3*d_model), taps 0..2
        for _ in range(cfg['d_layers'])]
    params['dec_norm'] = dict(w=jnp.ones((1, Dm), jnp.float32),
                              b=jnp.zeros((1, Dm), jnp.float32))
    params['proj_w_t'] = w((C, Dm), jnp.float32)    # transposed final Linear
    params['proj_b'] = jnp.zeros((1, C), jnp.float32)
    return params


# --------------------------------------------------------------------------

if __name__ == "__main__":
    cfg = dict(hidden_size=32, num_heads=2, d_keys=16, d_values=16, d_ff=64,
               e_layers=2, d_layers=1, num_channels=1, moving_avg=3, factor=1)

    key = jax.random.PRNGKey(0)
    kp, kx, kg = jax.random.split(key, 3)
    params = init_model_params(kp, cfg)

    B, Lx, Lg = 2, 16, 8
    x = jax.random.normal(kx, (B, Lx, cfg['num_channels']), jnp.float32)
    ground_truth = jax.random.normal(kg, (B, Lg, cfg['num_channels']),
                                     jnp.float32)

    # Positional-embedding table sliced to the needed length (Lx + Lg rows).
    pe = positional_embedding(cfg['hidden_size'], max_len=Lx + Lg)

    fwd = jax.jit(functools.partial(model_forward, cfg=cfg, pe=pe))
    out = fwd(params, x, ground_truth)
    jax.block_until_ready(out)

    assert out.shape == (B, Lg, cfg['num_channels'])
    assert bool(jnp.all(jnp.isfinite(out)))
    print("KERNEL_OK")
</pallas_src>

<mosaic_0001>
module attributes {stable_mosaic.version = 11 : i64} {
  func.func @_matmul_kernel(%arg0: memref<32x32xf32, #tpu.memory_space<vmem>>, %arg1: memref<32x96xbf16, #tpu.memory_space<vmem>>, %arg2: memref<32x96xf32, #tpu.memory_space<vmem>>) attributes {dimension_semantics = [], scalar_prefetch = 0 : i64, scratch_operands = 0 : i64, tpu.core_type = #tpu.core_type<tc>} {
    %c0 = arith.constant 0 : index
    %c0_0 = arith.constant 0 : index
    %0 = vector.load %arg0[%c0, %c0_0] : memref<32x32xf32, #tpu.memory_space<vmem>>, vector<32x32xf32>
    %1 = arith.truncf %0 : vector<32x32xf32> to vector<32x32xbf16>
    %c0_1 = arith.constant 0 : index
    %c0_2 = arith.constant 0 : index
    %2 = vector.load %arg1[%c0_1, %c0_2] : memref<32x96xbf16, #tpu.memory_space<vmem>>, vector<32x96xbf16>
    %cst = arith.constant dense<0.000000e+00> : vector<32x96xf32>
    %3 = tpu.matmul %1, %2, %cst {dimension_numbers = #tpu.dot_dimension_numbers<[1], [0], [0], [1], [0, 0, 1, 1], [], []>} : vector<32x32xbf16>, vector<32x96xbf16>, vector<32x96xf32> -> vector<32x96xf32>
    %c0_3 = arith.constant 0 : index
    %c0_4 = arith.constant 0 : index
    %4 = vector.load %arg2[%c0_3, %c0_4] : memref<32x96xf32, #tpu.memory_space<vmem>>, vector<32x96xf32>
    tpu.vector_store %arg2[%c0_3, %c0_4], %3 {strides = array<i32>} : memref<32x96xf32, #tpu.memory_space<vmem>>, vector<32x96xf32>,
    return
  }
}

module attributes {stable_mosaic.version = 11 : i64} {
  func.func @_prep_kernel(%arg0: memref<2x16x1xf32, #tpu.memory_space<vmem>>, %arg1: memref<1x32xf32, #tpu.memory_space<vmem>>, %arg2: memref<16x32xf32, #tpu.memory_space<vmem>>, %arg3: memref<24x32xf32, #tpu.memory_space<vmem>>, %arg4: memref<2x16x32xf32, #tpu.memory_space<vmem>>, %arg5: memref<2x24x32xf32, #tpu.memory_space<vmem>>, %arg6: memref<2x24x1xf32, #tpu.memory_space<vmem>>) attributes {dimension_semantics = [], scalar_prefetch = 0 : i64, scratch_operands = 0 : i64, tpu.core_type = #tpu.core_type<tc>} {
    %c0 = arith.constant 0 : index
    %c0_0 = arith.constant 0 : index
    %c0_1 = arith.constant 0 : index
    %0 = vector.load %arg0[%c0, %c0_0, %c0_1] : memref<2x16x1xf32, #tpu.memory_space<vmem>>, vector<2x16x1xf32>
    %c0_2 = arith.constant 0 : index
    %c0_3 = arith.constant 0 : index
    %1 = vector.load %arg1[%c0_2, %c0_3] : memref<1x32xf32, #tpu.memory_space<vmem>>, vector<1x32xf32>
    %2 = vector.shape_cast %1 : vector<1x32xf32> to vector<1x1x32xf32>
    %3 = vector.broadcast %0 : vector<2x16x1xf32> to vector<2x16x32xf32>
    %4 = vector.broadcast %2 : vector<1x1x32xf32> to vector<2x16x32xf32>
    %5 = arith.mulf %3, %4 : vector<2x16x32xf32>
    %c0_4 = arith.constant 0 : index
    %c0_5 = arith.constant 0 : index
    %6 = vector.load %arg2[%c0_4, %c0_5] : memref<16x32xf32, #tpu.memory_space<vmem>>, vector<16x32xf32>
    %7 = vector.shape_cast %6 : vector<16x32xf32> to vector<1x16x32xf32>
    %8 = vector.broadcast %7 : vector<1x16x32xf32> to vector<2x16x32xf32>
    %9 = arith.addf %5, %8 : vector<2x16x32xf32>
    %c0_6 = arith.constant 0 : index
    %c0_7 = arith.constant 0 : index
    %c0_8 = arith.constant 0 : index
    %10 = vector.load %arg4[%c0_6, %c0_7, %c0_8] : memref<2x16x32xf32, #tpu.memory_space<vmem>>, vector<2x16x32xf32>
    tpu.vector_store %arg4[%c0_6, %c0_7, %c0_8], %9 {strides = array<i32>} : memref<2x16x32xf32, #tpu.memory_space<vmem>>, vector<2x16x32xf32>,
    %11 = vector.extract_strided_slice %0 {offsets = [0, 0, 0], sizes = [2, 1, 1], strides = [1, 1, 1]} : vector<2x16x1xf32> to vector<2x1x1xf32>
    %12 = vector.extract_strided_slice %0 {offsets = [0, 0, 0], sizes = [2, 15, 1], strides = [1, 1, 1]} : vector<2x16x1xf32> to vector<2x15x1xf32>
    %13 = tpu.concatenate %11, %12 in 1 : vector<2x1x1xf32>, vector<2x15x1xf32> -> vector<2x16x1xf32>
    %14 = vector.extract_strided_slice %0 {offsets = [0, 1, 0], sizes = [2, 15, 1], strides = [1, 1, 1]} : vector<2x16x1xf32> to vector<2x15x1xf32>
    %15 = vector.extract_strided_slice %0 {offsets = [0, 15, 0], sizes = [2, 1, 1], strides = [1, 1, 1]} : vector<2x16x1xf32> to vector<2x1x1xf32>
    %16 = tpu.concatenate %14, %15 in 1 : vector<2x15x1xf32>, vector<2x1x1xf32> -> vector<2x16x1xf32>
    %17 = arith.addf %0, %13 : vector<2x16x1xf32>
    %18 = arith.addf %17, %16 : vector<2x16x1xf32>
    %cst = arith.constant 3.000000e+00 : f32
    %19 = vector.broadcast %cst : f32 to vector<2x16x1xf32>
    %20 = arith.divf %18, %19 : vector<2x16x1xf32>
    %21 = arith.subf %0, %20 : vector<2x16x1xf32>
    %cst_9 = arith.constant dense<0.000000e+00> : vector<2x1xf32>
    %22 = vector.multi_reduction <add>, %0, %cst_9 [1] : vector<2x16x1xf32> to vector<2x1xf32>
    %23 = vector.shape_cast %22 : vector<2x1xf32> to vector<2x1x1xf32>
    %cst_10 = arith.constant 1.600000e+01 : f32
    %24 = vector.broadcast %cst_10 : f32 to vector<2x1x1xf32>
    %25 = arith.divf %23, %24 : vector<2x1x1xf32>
    %26 = vector.shape_cast %25 : vector<2x1x1xf32> to vector<2x1x1xf32>
    %27 = vector.broadcast %26 : vector<2x1x1xf32> to vector<2x8x1xf32>
    %28 = tpu.concatenate %20, %27 in 1 : vector<2x16x1xf32>, vector<2x8x1xf32> -> vector<2x24x1xf32>
    %c0_11 = arith.constant 0 : index
    %c0_12 = arith.constant 0 : index
    %c0_13 = arith.constant 0 : index
    %29 = vector.load %arg6[%c0_11, %c0_12, %c0_13] : memref<2x24x1xf32, #tpu.memory_space<vmem>>, vector<2x24x1xf32>
    tpu.vector_store %arg6[%c0_11, %c0_12, %c0_13], %28 {strides = array<i32>} : memref<2x24x1xf32, #tpu.memory_space<vmem>>, vector<2x24x1xf32>,
    %cst_14 = arith.constant 0.000000e+00 : f32
    %30 = vector.broadcast %cst_14 : f32 to vector<2x8x1xf32>
    %31 = tpu.concatenate %21, %30 in 1 : vector<2x16x1xf32>, vector<2x8x1xf32> -> vector<2x24x1xf32>
    %32 = vector.shape_cast %1 : vector<1x32xf32> to vector<1x1x32xf32>
    %33 = vector.broadcast %31 : vector<2x24x1xf32> to vector<2x24x32xf32>
    %34 = vector.broadcast %32 : vector<1x1x32xf32> to vector<2x24x32xf32>
    %35 = arith.mulf %33, %34 : vector<2x24x32xf32>
    %c0_15 = arith.constant 0 : index
    %c0_16 = arith.constant 0 : index
    %36 = vector.load %arg3[%c0_15, %c0_16] : memref<24x32xf32, #tpu.memory_space<vmem>>, vector<24x32xf32>
    %37 = vector.shape_cast %36 : vector<24x32xf32> to vector<1x24x32xf32>
    %38 = vector.broadcast %37 : vector<1x24x32xf32> to vector<2x24x32xf32>
    %39 = arith.addf %35, %38 : vector<2x24x32xf32>
    %c0_17 = arith.constant 0 : index
    %c0_18 = arith.constant 0 : index
    %c0_19 = arith.constant 0 : index
    %40 = vector.load %arg5[%c0_17, %c0_18, %c0_19] : memref<2x24x32xf32, #tpu.memory_space<vmem>>, vector<2x24x32xf32>
    tpu.vector_store %arg5[%c0_17, %c0_18, %c0_19], %39 {strides = array<i32>} : memref<2x24x32xf32, #tpu.memory_space<vmem>>, vector<2x24x32xf32>,
    return
  }
}

module attributes {stable_mosaic.version = 11 : i64} {
  func.func @_enc_post_kernel(%arg0: memref<2x16x32xf32, #tpu.memory_space<vmem>>, %arg1: memref<2x16x32xf32, #tpu.memory_space<vmem>>, %arg2: memref<32x32xbf16, #tpu.memory_space<vmem>>, %arg3: memref<32x64xbf16, #tpu.memory_space<vmem>>, %arg4: memref<64x32xbf16, #tpu.memory_space<vmem>>, %arg5: memref<2x16x32xf32, #tpu.memory_space<vmem>>) attributes {dimension_semantics = [], scalar_prefetch = 0 : i64, scratch_operands = 0 : i64, tpu.core_type = #tpu.core_type<tc>} {
    %c0 = arith.constant 0 : index
    %c0_0 = arith.constant 0 : index
    %c0_1 = arith.constant 0 : index
    %0 = vector.load %arg0[%c0, %c0_0, %c0_1] : memref<2x16x32xf32, #tpu.memory_space<vmem>>, vector<2x16x32xf32>
    %c0_2 = arith.constant 0 : index
    %c0_3 = arith.constant 0 : index
    %c0_4 = arith.constant 0 : index
    %1 = vector.load %arg1[%c0_2, %c0_3, %c0_4] : memref<2x16x32xf32, #tpu.memory_space<vmem>>, vector<2x16x32xf32>
    %c0_5 = arith.constant 0 : index
    %c0_6 = arith.constant 0 : index
    %2 = vector.load %arg2[%c0_5, %c0_6] : memref<32x32xbf16, #tpu.memory_space<vmem>>, vector<32x32xbf16>
    %c0_7 = arith.constant 0 : index
    %c0_8 = arith.constant 0 : index
    %3 = vector.load %arg3[%c0_7, %c0_8] : memref<32x64xbf16, #tpu.memory_space<vmem>>, vector<32x64xbf16>
    %c0_9 = arith.constant 0 : index
    %c0_10 = arith.constant 0 : index
    %4 = vector.load %arg4[%c0_9, %c0_10] : memref<64x32xbf16, #tpu.memory_space<vmem>>, vector<64x32xbf16>
    %5 = vector.shape_cast %1 : vector<2x16x32xf32> to vector<32x32xf32>
    %6 = arith.truncf %5 : vector<32x32xf32> to vector<32x32xbf16>
    %cst = arith.constant dense<0.000000e+00> : vector<32x32xf32>
    %7 = tpu.matmul %6, %2, %cst {dimension_numbers = #tpu.dot_dimension_numbers<[1], [0], [0], [1], [0, 0, 1, 1], [], []>} : vector<32x32xbf16>, vector<32x32xbf16>, vector<32x32xf32> -> vector<32x32xf32>
    %8 = vector.shape_cast %7 : vector<32x32xf32> to vector<2x16x32xf32>
    %9 = arith.addf %0, %8 : vector<2x16x32xf32>
    %10 = vector.extract_strided_slice %9 {offsets = [0, 0, 0], sizes = [2, 1, 32], strides = [1, 1, 1]} : vector<2x16x32xf32> to vector<2x1x32xf32>
    %11 = vector.extract_strided_slice %9 {offsets = [0, 0, 0], sizes = [2, 15, 32], strides = [1, 1, 1]} : vector<2x16x32xf32> to vector<2x15x32xf32>
    %12 = tpu.concatenate %10, %11 in 1 : vector<2x1x32xf32>, vector<2x15x32xf32> -> vector<2x16x32xf32>
    %13 = vector.extract_strided_slice %9 {offsets = [0, 1, 0], sizes = [2, 15, 32], strides = [1, 1, 1]} : vector<2x16x32xf32> to vector<2x15x32xf32>
    %14 = vector.extract_strided_slice %9 {offsets = [0, 15, 0], sizes = [2, 1, 32], strides = [1, 1, 1]} : vector<2x16x32xf32> to vector<2x1x32xf32>
    %15 = tpu.concatenate %13, %14 in 1 : vector<2x15x32xf32>, vector<2x1x32xf32> -> vector<2x16x32xf32>
    %16 = arith.addf %9, %12 : vector<2x16x32xf32>
    %17 = arith.addf %16, %15 : vector<2x16x32xf32>
    %cst_11 = arith.constant 3.000000e+00 : f32
    %18 = vector.broadcast %cst_11 : f32 to vector<2x16x32xf32>
    %19 = arith.divf %17, %18 : vector<2x16x32xf32>
    %20 = arith.subf %9, %19 : vector<2x16x32xf32>
    %21 = vector.shape_cast %20 : vector<2x16x32xf32> to vector<32x32xf32>
    %22 = arith.truncf %21 : vector<32x32xf32> to vector<32x32xbf16>
    %cst_12 = arith.constant dense<0.000000e+00> : vector<32x64xf32>
    %23 = tpu.matmul %22, %3, %cst_12 {dimension_numbers = #tpu.dot_dimension_numbers<[1], [0], [0], [1], [0, 0, 1, 1], [], []>} : vector<32x32xbf16>, vector<32x64xbf16>, vector<32x64xf32> -> vector<32x64xf32>
    %24 = vector.shape_cast %23 : vector<32x64xf32> to vector<2x16x64xf32>
    %cst_13 = arith.constant 0.000000e+00 : f32
    %25 = vector.broadcast %cst_13 : f32 to vector<2x16x64xf32>
    %26 = arith.maximumf %24, %25 : vector<2x16x64xf32>
    %27 = vector.shape_cast %26 : vector<2x16x64xf32> to vector<32x64xf32>
    %28 = arith.truncf %27 : vector<32x64xf32> to vector<32x64xbf16>
    %cst_14 = arith.constant dense<0.000000e+00> : vector<32x32xf32>
    %29 = tpu.matmul %28, %4, %cst_14 {dimension_numbers = #tpu.dot_dimension_numbers<[1], [0], [0], [1], [0, 0, 1, 1], [], []>} : vector<32x64xbf16>, vector<64x32xbf16>, vector<32x32xf32> -> vector<32x32xf32>
    %30 = vector.shape_cast %29 : vector<32x32xf32> to vector<2x16x32xf32>
    %31 = arith.addf %30, %9 : vector<2x16x32xf32>
    %32 = vector.extract_strided_slice %31 {offsets = [0, 0, 0], sizes = [2, 1, 32], strides = [1, 1, 1]} : vector<2x16x32xf32> to vector<2x1x32xf32>
    %33 = vector.extract_strided_slice %31 {offsets = [0, 0, 0], sizes = [2, 15, 32], strides = [1, 1, 1]} : vector<2x16x32xf32> to vector<2x15x32xf32>
    %34 = tpu.concatenate %32, %33 in 1 : vector<2x1x32xf32>, vector<2x15x32xf32> -> vector<2x16x32xf32>
    %35 = vector.extract_strided_slice %31 {offsets = [0, 1, 0], sizes = [2, 15, 32], strides = [1, 1, 1]} : vector<2x16x32xf32> to vector<2x15x32xf32>
    %36 = vector.extract_strided_slice %31 {offsets = [0, 15, 0], sizes = [2, 1, 32], strides = [1, 1, 1]} : vector<2x16x32xf32> to vector<2x1x32xf32>
    %37 = tpu.concatenate %35, %36 in 1 : vector<2x15x32xf32>, vector<2x1x32xf32> -> vector<2x16x32xf32>
    %38 = arith.addf %31, %34 : vector<2x16x32xf32>
    %39 = arith.addf %38, %37 : vector<2x16x32xf32>
    %cst_15 = arith.constant 3.000000e+00 : f32
    %40 = vector.broadcast %cst_15 : f32 to vector<2x16x32xf32>
    %41 = arith.divf %39, %40 : vector<2x16x32xf32>
    %42 = arith.subf %31, %41 : vector<2x16x32xf32>
    %c0_16 = arith.constant 0 : index
    %c0_17 = arith.constant 0 : index
    %c0_18 = arith.constant 0 : index
    %43 = vector.load %arg5[%c0_16, %c0_17, %c0_18] : memref<2x16x32xf32, #tpu.memory_space<vmem>>, vector<2x16x32xf32>
    tpu.vector_store %arg5[%c0_16, %c0_17, %c0_18], %42 {strides = array<i32>} : memref<2x16x32xf32, #tpu.memory_space<vmem>>, vector<2x16x32xf32>,
    return
  }
}

module attributes {stable_mosaic.version = 11 : i64} {
  func.func @_enc_post_norm_kernel(%arg0: memref<2x16x32xf32, #tpu.memory_space<vmem>>, %arg1: memref<2x16x32xf32, #tpu.memory_space<vmem>>, %arg2: memref<32x32xbf16, #tpu.memory_space<vmem>>, %arg3: memref<32x64xbf16, #tpu.memory_space<vmem>>, %arg4: memref<64x32xbf16, #tpu.memory_space<vmem>>, %arg5: memref<1x32xf32, #tpu.memory_space<vmem>>, %arg6: memref<1x32xf32, #tpu.memory_space<vmem>>, %arg7: memref<2x16x32xf32, #tpu.memory_space<vmem>>) attributes {dimension_semantics = [], scalar_prefetch = 0 : i64, scratch_operands = 0 : i64, tpu.core_type = #tpu.core_type<tc>} {
    %c0 = arith.constant 0 : index
    %c0_0 = arith.constant 0 : index
    %c0_1 = arith.constant 0 : index
    %0 = vector.load %arg0[%c0, %c0_0, %c0_1] : memref<2x16x32xf32, #tpu.memory_space<vmem>>, vector<2x16x32xf32>
    %c0_2 = arith.constant 0 : index
    %c0_3 = arith.constant 0 : index
    %c0_4 = arith.constant 0 : index
    %1 = vector.load %arg1[%c0_2, %c0_3, %c0_4] : memref<2x16x32xf32, #tpu.memory_space<vmem>>, vector<2x16x32xf32>
    %c0_5 = arith.constant 0 : index
    %c0_6 = arith.constant 0 : index
    %2 = vector.load %arg2[%c0_5, %c0_6] : memref<32x32xbf16, #tpu.memory_space<vmem>>, vector<32x32xbf16>
    %c0_7 = arith.constant 0 : index
    %c0_8 = arith.constant 0 : index
    %3 = vector.load %arg3[%c0_7, %c0_8] : memref<32x64xbf16, #tpu.memory_space<vmem>>, vector<32x64xbf16>
    %c0_9 = arith.constant 0 : index
    %c0_10 = arith.constant 0 : index
    %4 = vector.load %arg4[%c0_9, %c0_10] : memref<64x32xbf16, #tpu.memory_space<vmem>>, vector<64x32xbf16>
    %5 = vector.shape_cast %1 : vector<2x16x32xf32> to vector<32x32xf32>
    %6 = arith.truncf %5 : vector<32x32xf32> to vector<32x32xbf16>
    %cst = arith.constant dense<0.000000e+00> : vector<32x32xf32>
    %7 = tpu.matmul %6, %2, %cst {dimension_numbers = #tpu.dot_dimension_numbers<[1], [0], [0], [1], [0, 0, 1, 1], [], []>} : vector<32x32xbf16>, vector<32x32xbf16>, vector<32x32xf32> -> vector<32x32xf32>
    %8 = vector.shape_cast %7 : vector<32x32xf32> to vector<2x16x32xf32>
    %9 = arith.addf %0, %8 : vector<2x16x32xf32>
    %10 = vector.extract_strided_slice %9 {offsets = [0, 0, 0], sizes = [2, 1, 32], strides = [1, 1, 1]} : vector<2x16x32xf32> to vector<2x1x32xf32>
    %11 = vector.extract_strided_slice %9 {offsets = [0, 0, 0], sizes = [2, 15, 32], strides = [1, 1, 1]} : vector<2x16x32xf32> to vector<2x15x32xf32>
    %12 = tpu.concatenate %10, %11 in 1 : vector<2x1x32xf32>, vector<2x15x32xf32> -> vector<2x16x32xf32>
    %13 = vector.extract_strided_slice %9 {offsets = [0, 1, 0], sizes = [2, 15, 32], strides = [1, 1, 1]} : vector<2x16x32xf32> to vector<2x15x32xf32>
    %14 = vector.extract_strided_slice %9 {offsets = [0, 15, 0], sizes = [2, 1, 32], strides = [1, 1, 1]} : vector<2x16x32xf32> to vector<2x1x32xf32>
    %15 = tpu.concatenate %13, %14 in 1 : vector<2x15x32xf32>, vector<2x1x32xf32> -> vector<2x16x32xf32>
    %16 = arith.addf %9, %12 : vector<2x16x32xf32>
    %17 = arith.addf %16, %15 : vector<2x16x32xf32>
    %cst_11 = arith.constant 3.000000e+00 : f32
    %18 = vector.broadcast %cst_11 : f32 to vector<2x16x32xf32>
    %19 = arith.divf %17, %18 : vector<2x16x32xf32>
    %20 = arith.subf %9, %19 : vector<2x16x32xf32>
    %21 = vector.shape_cast %20 : vector<2x16x32xf32> to vector<32x32xf32>
    %22 = arith.truncf %21 : vector<32x32xf32> to vector<32x32xbf16>
    %cst_12 = arith.constant dense<0.000000e+00> : vector<32x64xf32>
    %23 = tpu.matmul %22, %3, %cst_12 {dimension_numbers = #tpu.dot_dimension_numbers<[1], [0], [0], [1], [0, 0, 1, 1], [], []>} : vector<32x32xbf16>, vector<32x64xbf16>, vector<32x64xf32> -> vector<32x64xf32>
    %24 = vector.shape_cast %23 : vector<32x64xf32> to vector<2x16x64xf32>
    %cst_13 = arith.constant 0.000000e+00 : f32
    %25 = vector.broadcast %cst_13 : f32 to vector<2x16x64xf32>
    %26 = arith.maximumf %24, %25 : vector<2x16x64xf32>
    %27 = vector.shape_cast %26 : vector<2x16x64xf32> to vector<32x64xf32>
    %28 = arith.truncf %27 : vector<32x64xf32> to vector<32x64xbf16>
    %cst_14 = arith.constant dense<0.000000e+00> : vector<32x32xf32>
    %29 = tpu.matmul %28, %4, %cst_14 {dimension_numbers = #tpu.dot_dimension_numbers<[1], [0], [0], [1], [0, 0, 1, 1], [], []>} : vector<32x64xbf16>, vector<64x32xbf16>, vector<32x32xf32> -> vector<32x32xf32>
    %30 = vector.shape_cast %29 : vector<32x32xf32> to vector<2x16x32xf32>
    %31 = arith.addf %30, %9 : vector<2x16x32xf32>
    %32 = vector.extract_strided_slice %31 {offsets = [0, 0, 0], sizes = [2, 1, 32], strides = [1, 1, 1]} : vector<2x16x32xf32> to vector<2x1x32xf32>
    %33 = vector.extract_strided_slice %31 {offsets = [0, 0, 0], sizes = [2, 15, 32], strides = [1, 1, 1]} : vector<2x16x32xf32> to vector<2x15x32xf32>
    %34 = tpu.concatenate %32, %33 in 1 : vector<2x1x32xf32>, vector<2x15x32xf32> -> vector<2x16x32xf32>
    %35 = vector.extract_strided_slice %31 {offsets = [0, 1, 0], sizes = [2, 15, 32], strides = [1, 1, 1]} : vector<2x16x32xf32> to vector<2x15x32xf32>
    %36 = vector.extract_strided_slice %31 {offsets = [0, 15, 0], sizes = [2, 1, 32], strides = [1, 1, 1]} : vector<2x16x32xf32> to vector<2x1x32xf32>
    %37 = tpu.concatenate %35, %36 in 1 : vector<2x15x32xf32>, vector<2x1x32xf32> -> vector<2x16x32xf32>
    %38 = arith.addf %31, %34 : vector<2x16x32xf32>
    %39 = arith.addf %38, %37 : vector<2x16x32xf32>
    %cst_15 = arith.constant 3.000000e+00 : f32
    %40 = vector.broadcast %cst_15 : f32 to vector<2x16x32xf32>
    %41 = arith.divf %39, %40 : vector<2x16x32xf32>
    %42 = arith.subf %31, %41 : vector<2x16x32xf32>
    %c0_16 = arith.constant 0 : index
    %c0_17 = arith.constant 0 : index
    %43 = vector.load %arg5[%c0_16, %c0_17] : memref<1x32xf32, #tpu.memory_space<vmem>>, vector<1x32xf32>
    %c0_18 = arith.constant 0 : index
    %c0_19 = arith.constant 0 : index
    %44 = vector.load %arg6[%c0_18, %c0_19] : memref<1x32xf32, #tpu.memory_space<vmem>>, vector<1x32xf32>
    %cst_20 = arith.constant dense<0.000000e+00> : vector<2x16xf32>
    %45 = vector.multi_reduction <add>, %42, %cst_20 [2] : vector<2x16x32xf32> to vector<2x16xf32>
    %46 = vector.shape_cast %45 : vector<2x16xf32> to vector<2x16x1xf32>
    %cst_21 = arith.constant 3.200000e+01 : f32
    %47 = vector.broadcast %cst_21 : f32 to vector<2x16x1xf32>
    %48 = arith.divf %46, %47 : vector<2x16x1xf32>
    %49 = vector.broadcast %48 : vector<2x16x1xf32> to vector<2x16x32xf32>
    %50 = arith.subf %42, %49 : vector<2x16x32xf32>
    %51 = arith.mulf %50, %50 : vector<2x16x32xf32>
    %cst_22 = arith.constant dense<0.000000e+00> : vector<2x16xf32>
    %52 = vector.multi_reduction <add>, %51, %cst_22 [2] : vector<2x16x32xf32> to vector<2x16xf32>
    %53 = vector.shape_cast %52 : vector<2x16xf32> to vector<2x16x1xf32>
    %cst_23 = arith.constant 3.200000e+01 : f32
    %54 = vector.broadcast %cst_23 : f32 to vector<2x16x1xf32>
    %55 = arith.divf %53, %54 : vector<2x16x1xf32>
    %cst_24 = arith.constant 9.99999974E-6 : f32
    %56 = vector.broadcast %cst_24 : f32 to vector<2x16x1xf32>
    %57 = arith.addf %55, %56 : vector<2x16x1xf32>
    %58 = math.rsqrt %57 : vector<2x16x1xf32>
    %59 = vector.broadcast %58 : vector<2x16x1xf32> to vector<2x16x32xf32>
    %60 = arith.mulf %50, %59 : vector<2x16x32xf32>
    %61 = vector.shape_cast %43 : vector<1x32xf32> to vector<1x1x32xf32>
    %62 = vector.broadcast %61 : vector<1x1x32xf32> to vector<2x16x32xf32>
    %63 = arith.mulf %60, %62 : vector<2x16x32xf32>
    %64 = vector.shape_cast %44 : vector<1x32xf32> to vector<1x1x32xf32>
    %65 = vector.broadcast %64 : vector<1x1x32xf32> to vector<2x16x32xf32>
    %66 = arith.addf %63, %65 : vector<2x16x32xf32>
    %cst_25 = arith.constant dense<0.000000e+00> : vector<2x32xf32>
    %67 = vector.multi_reduction <add>, %66, %cst_25 [1] : vector<2x16x32xf32> to vector<2x32xf32>
    %68 = vector.shape_cast %67 : vector<2x32xf32> to vector<2x1x32xf32>
    %cst_26 = arith.constant 1.600000e+01 : f32
    %69 = vector.broadcast %cst_26 : f32 to vector<2x1x32xf32>
    %70 = arith.divf %68, %69 : vector<2x1x32xf32>
    %71 = vector.broadcast %70 : vector<2x1x32xf32> to vector<2x16x32xf32>
    %72 = arith.subf %66, %71 : vector<2x16x32xf32>
    %c0_27 = arith.constant 0 : index
    %c0_28 = arith.constant 0 : index
    %c0_29 = arith.constant 0 : index
    %73 = vector.load %arg7[%c0_27, %c0_28, %c0_29] : memref<2x16x32xf32, #tpu.memory_space<vmem>>, vector<2x16x32xf32>
    tpu.vector_store %arg7[%c0_27, %c0_28, %c0_29], %72 {strides = array<i32>} : memref<2x16x32xf32, #tpu.memory_space<vmem>>, vector<2x16x32xf32>,
    return
  }
}

module attributes {stable_mosaic.version = 11 : i64} {
  func.func @_matmul_kernel(%arg0: memref<48x32xf32, #tpu.memory_space<vmem>>, %arg1: memref<32x96xbf16, #tpu.memory_space<vmem>>, %arg2: memref<48x96xf32, #tpu.memory_space<vmem>>) attributes {dimension_semantics = [], scalar_prefetch = 0 : i64, scratch_operands = 0 : i64, tpu.core_type = #tpu.core_type<tc>} {
    %c0 = arith.constant 0 : index
    %c0_0 = arith.constant 0 : index
    %0 = vector.load %arg0[%c0, %c0_0] : memref<48x32xf32, #tpu.memory_space<vmem>>, vector<48x32xf32>
    %1 = arith.truncf %0 : vector<48x32xf32> to vector<48x32xbf16>
    %c0_1 = arith.constant 0 : index
    %c0_2 = arith.constant 0 : index
    %2 = vector.load %arg1[%c0_1, %c0_2] : memref<32x96xbf16, #tpu.memory_space<vmem>>, vector<32x96xbf16>
    %cst = arith.constant dense<0.000000e+00> : vector<48x96xf32>
    %3 = tpu.matmul %1, %2, %cst {dimension_numbers = #tpu.dot_dimension_numbers<[1], [0], [0], [1], [0, 0, 1, 1], [], []>} : vector<48x32xbf16>, vector<32x96xbf16>, vector<48x96xf32> -> vector<48x96xf32>
    %c0_3 = arith.constant 0 : index
    %c0_4 = arith.constant 0 : index
    %4 = vector.load %arg2[%c0_3, %c0_4] : memref<48x96xf32, #tpu.memory_space<vmem>>, vector<48x96xf32>
    tpu.vector_store %arg2[%c0_3, %c0_4], %3 {strides = array<i32>} : memref<48x96xf32, #tpu.memory_space<vmem>>, vector<48x96xf32>,
    return
  }
}

module attributes {stable_mosaic.version = 11 : i64} {
  func.func @_dec_mid_kernel(%arg0: memref<2x24x32xf32, #tpu.memory_space<vmem>>, %arg1: memref<2x24x32xf32, #tpu.memory_space<vmem>>, %arg2: memref<2x16x32xf32, #tpu.memory_space<vmem>>, %arg3: memref<32x32xbf16, #tpu.memory_space<vmem>>, %arg4: memref<32x32xbf16, #tpu.memory_space<vmem>>, %arg5: memref<32x64xbf16, #tpu.memory_space<vmem>>, %arg6: memref<2x24x32xf32, #tpu.memory_space<vmem>>, %arg7: memref<2x24x32xf32, #tpu.memory_space<vmem>>, %arg8: memref<2x24x32xf32, #tpu.memory_space<vmem>>, %arg9: memref<2x16x64xf32, #tpu.memory_space<vmem>>) attributes {dimension_semantics = [], scalar_prefetch = 0 : i64, scratch_operands = 0 : i64, tpu.core_type = #tpu.core_type<tc>} {
    %c0 = arith.constant 0 : index
    %c0_0 = arith.constant 0 : index
    %c0_1 = arith.constant 0 : index
    %0 = vector.load %arg0[%c0, %c0_0, %c0_1] : memref<2x24x32xf32, #tpu.memory_space<vmem>>, vector<2x24x32xf32>
    %c0_2 = arith.constant 0 : index
    %c0_3 = arith.constant 0 : index
    %c0_4 = arith.constant 0 : index
    %1 = vector.load %arg1[%c0_2, %c0_3, %c0_4] : memref<2x24x32xf32, #tpu.memory_space<vmem>>, vector<2x24x32xf32>
    %c0_5 = arith.constant 0 : index
    %c0_6 = arith.constant 0 : index
    %2 = vector.load %arg3[%c0_5, %c0_6] : memref<32x32xbf16, #tpu.memory_space<vmem>>, vector<32x32xbf16>
    %3 = vector.shape_cast %1 : vector<2x24x32xf32> to vector<48x32xf32>
    %4 = arith.truncf %3 : vector<48x32xf32> to vector<48x32xbf16>
    %cst = arith.constant dense<0.000000e+00> : vector<48x32xf32>
    %5 = tpu.matmul %4, %2, %cst {dimension_numbers = #tpu.dot_dimension_numbers<[1], [0], [0], [1], [0, 0, 1, 1], [], []>} : vector<48x32xbf16>, vector<32x32xbf16>, vector<48x32xf32> -> vector<48x32xf32>
    %6 = vector.shape_cast %5 : vector<48x32xf32> to vector<2x24x32xf32>
    %7 = arith.addf %0, %6 : vector<2x24x32xf32>
    %8 = vector.extract_strided_slice %7 {offsets = [0, 0, 0], sizes = [2, 1, 32], strides = [1, 1, 1]} : vector<2x24x32xf32> to vector<2x1x32xf32>
    %9 = vector.extract_strided_slice %7 {offsets = [0, 0, 0], sizes = [2, 23, 32], strides = [1, 1, 1]} : vector<2x24x32xf32> to vector<2x23x32xf32>
    %10 = tpu.concatenate %8, %9 in 1 : vector<2x1x32xf32>, vector<2x23x32xf32> -> vector<2x24x32xf32>
    %11 = vector.extract_strided_slice %7 {offsets = [0, 1, 0], sizes = [2, 23, 32], strides = [1, 1, 1]} : vector<2x24x32xf32> to vector<2x23x32xf32>
    %12 = vector.extract_strided_slice %7 {offsets = [0, 23, 0], sizes = [2, 1, 32], strides = [1, 1, 1]} : vector<2x24x32xf32> to vector<2x1x32xf32>
    %13 = tpu.concatenate %11, %12 in 1 : vector<2x23x32xf32>, vector<2x1x32xf32> -> vector<2x24x32xf32>
    %14 = arith.addf %7, %10 : vector<2x24x32xf32>
    %15 = arith.addf %14, %13 : vector<2x24x32xf32>
    %cst_7 = arith.constant 3.000000e+00 : f32
    %16 = vector.broadcast %cst_7 : f32 to vector<2x24x32xf32>
    %17 = arith.divf %15, %16 : vector<2x24x32xf32>
    %18 = arith.subf %7, %17 : vector<2x24x32xf32>
    %c0_8 = arith.constant 0 : index
    %c0_9 = arith.constant 0 : index
    %c0_10 = arith.constant 0 : index
    %19 = vector.load %arg6[%c0_8, %c0_9, %c0_10] : memref<2x24x32xf32, #tpu.memory_space<vmem>>, vector<2x24x32xf32>
    tpu.vector_store %arg6[%c0_8, %c0_9, %c0_10], %18 {strides = array<i32>} : memref<2x24x32xf32, #tpu.memory_space<vmem>>, vector<2x24x32xf32>,
    %c0_11 = arith.constant 0 : index
    %c0_12 = arith.constant 0 : index
    %c0_13 = arith.constant 0 : index
    %20 = vector.load %arg7[%c0_11, %c0_12, %c0_13] : memref<2x24x32xf32, #tpu.memory_space<vmem>>, vector<2x24x32xf32>
    tpu.vector_store %arg7[%c0_11, %c0_12, %c0_13], %17 {strides = array<i32>} : memref<2x24x32xf32, #tpu.memory_space<vmem>>, vector<2x24x32xf32>,
    %c0_14 = arith.constant 0 : index
    %c0_15 = arith.constant 0 : index
    %21 = vector.load %arg4[%c0_14, %c0_15] : memref<32x32xbf16, #tpu.memory_space<vmem>>, vector<32x32xbf16>
    %22 = vector.shape_cast %18 : vector<2x24x32xf32> to vector<48x32xf32>
    %23 = arith.truncf %22 : vector<48x32xf32> to vector<48x32xbf16>
    %cst_16 = arith.constant dense<0.000000e+00> : vector<48x32xf32>
    %24 = tpu.matmul %23, %21, %cst_16 {dimension_numbers = #tpu.dot_dimension_numbers<[1], [0], [0], [1], [0, 0, 1, 1], [], []>} : vector<48x32xbf16>, vector<32x32xbf16>, vector<48x32xf32> -> vector<48x32xf32>
    %25 = vector.shape_cast %24 : vector<48x32xf32> to vector<2x24x32xf32>
    %c0_17 = arith.constant 0 : index
    %c0_18 = arith.constant 0 : index
    %c0_19 = arith.constant 0 : index
    %26 = vector.load %arg8[%c0_17, %c0_18, %c0_19] : memref<2x24x32xf32, #tpu.memory_space<vmem>>, vector<2x24x32xf32>
    tpu.vector_store %arg8[%c0_17, %c0_18, %c0_19], %25 {strides = array<i32>} : memref<2x24x32xf32, #tpu.memory_space<vmem>>, vector<2x24x32xf32>,
    %c0_20 = arith.constant 0 : index
    %c0_21 = arith.constant 0 : index
    %c0_22 = arith.constant 0 : index
    %27 = vector.load %arg2[%c0_20, %c0_21, %c0_22] : memref<2x16x32xf32, #tpu.memory_space<vmem>>, vector<2x16x32xf32>
    %c0_23 = arith.constant 0 : index
    %c0_24 = arith.constant 0 : index
    %28 = vector.load %arg5[%c0_23, %c0_24] : memref<32x64xbf16, #tpu.memory_space<vmem>>, vector<32x64xbf16>
    %29 = vector.shape_cast %27 : vector<2x16x32xf32> to vector<32x32xf32>
    %30 = arith.truncf %29 : vector<32x32xf32> to vector<32x32xbf16>
    %cst_25 = arith.constant dense<0.000000e+00> : vector<32x64xf32>
    %31 = tpu.matmul %30, %28, %cst_25 {dimension_numbers = #tpu.dot_dimension_numbers<[1], [0], [0], [1], [0, 0, 1, 1], [], []>} : vector<32x32xbf16>, vector<32x64xbf16>, vector<32x64xf32> -> vector<32x64xf32>
    %32 = vector.shape_cast %31 : vector<32x64xf32> to vector<2x16x64xf32>
    %c0_26 = arith.constant 0 : index
    %c0_27 = arith.constant 0 : index
    %c0_28 = arith.constant 0 : index
    %33 = vector.load %arg9[%c0_26, %c0_27, %c0_28] : memref<2x16x64xf32, #tpu.memory_space<vmem>>, vector<2x16x64xf32>
    tpu.vector_store %arg9[%c0_26, %c0_27, %c0_28], %32 {strides = array<i32>} : memref<2x16x64xf32, #tpu.memory_space<vmem>>, vector<2x16x64xf32>,
    return
  }
}

module attributes {stable_mosaic.version = 11 : i64} {
  func.func @_dec_post_kernel(%arg0: memref<2x24x32xf32, #tpu.memory_space<vmem>>, %arg1: memref<2x24x32xf32, #tpu.memory_space<vmem>>, %arg2: memref<2x24x32xf32, #tpu.memory_space<vmem>>, %arg3: memref<32x32xbf16, #tpu.memory_space<vmem>>, %arg4: memref<32x64xbf16, #tpu.memory_space<vmem>>, %arg5: memref<64x32xbf16, #tpu.memory_space<vmem>>, %arg6: memref<1x96xf32, #tpu.memory_space<vmem>>, %arg7: memref<2x24x32xf32, #tpu.memory_space<vmem>>, %arg8: memref<2x24x1xf32, #tpu.memory_space<vmem>>) attributes {dimension_semantics = [], scalar_prefetch = 0 : i64, scratch_operands = 0 : i64, tpu.core_type = #tpu.core_type<tc>} {
    %c0 = arith.constant 0 : index
    %c0_0 = arith.constant 0 : index
    %c0_1 = arith.constant 0 : index
    %0 = vector.load %arg0[%c0, %c0_0, %c0_1] : memref<2x24x32xf32, #tpu.memory_space<vmem>>, vector<2x24x32xf32>
    %c0_2 = arith.constant 0 : index
    %c0_3 = arith.constant 0 : index
    %c0_4 = arith.constant 0 : index
    %1 = vector.load %arg2[%c0_2, %c0_3, %c0_4] : memref<2x24x32xf32, #tpu.memory_space<vmem>>, vector<2x24x32xf32>
    %c0_5 = arith.constant 0 : index
    %c0_6 = arith.constant 0 : index
    %2 = vector.load %arg3[%c0_5, %c0_6] : memref<32x32xbf16, #tpu.memory_space<vmem>>, vector<32x32xbf16>
    %3 = vector.shape_cast %1 : vector<2x24x32xf32> to vector<48x32xf32>
    %4 = arith.truncf %3 : vector<48x32xf32> to vector<48x32xbf16>
    %cst = arith.constant dense<0.000000e+00> : vector<48x32xf32>
    %5 = tpu.matmul %4, %2, %cst {dimension_numbers = #tpu.dot_dimension_numbers<[1], [0], [0], [1], [0, 0, 1, 1], [], []>} : vector<48x32xbf16>, vector<32x32xbf16>, vector<48x32xf32> -> vector<48x32xf32>
    %6 = vector.shape_cast %5 : vector<48x32xf32> to vector<2x24x32xf32>
    %7 = arith.addf %0, %6 : vector<2x24x32xf32>
    %8 = vector.extract_strided_slice %7 {offsets = [0, 0, 0], sizes = [2, 1, 32], strides = [1, 1, 1]} : vector<2x24x32xf32> to vector<2x1x32xf32>
    %9 = vector.extract_strided_slice %7 {offsets = [0, 0, 0], sizes = [2, 23, 32], strides = [1, 1, 1]} : vector<2x24x32xf32> to vector<2x23x32xf32>
    %10 = tpu.concatenate %8, %9 in 1 : vector<2x1x32xf32>, vector<2x23x32xf32> -> vector<2x24x32xf32>
    %11 = vector.extract_strided_slice %7 {offsets = [0, 1, 0], sizes = [2, 23, 32], strides = [1, 1, 1]} : vector<2x24x32xf32> to vector<2x23x32xf32>
    %12 = vector.extract_strided_slice %7 {offsets = [0, 23, 0], sizes = [2, 1, 32], strides = [1, 1, 1]} : vector<2x24x32xf32> to vector<2x1x32xf32>
    %13 = tpu.concatenate %11, %12 in 1 : vector<2x23x32xf32>, vector<2x1x32xf32> -> vector<2x24x32xf32>
    %14 = arith.addf %7, %10 : vector<2x24x32xf32>
    %15 = arith.addf %14, %13 : vector<2x24x32xf32>
    %cst_7 = arith.constant 3.000000e+00 : f32
    %16 = vector.broadcast %cst_7 : f32 to vector<2x24x32xf32>
    %17 = arith.divf %15, %16 : vector<2x24x32xf32>
    %18 = arith.subf %7, %17 : vector<2x24x32xf32>
    %c0_8 = arith.constant 0 : index
    %c0_9 = arith.constant 0 : index
    %19 = vector.load %arg4[%c0_8, %c0_9] : memref<32x64xbf16, #tpu.memory_space<vmem>>, vector<32x64xbf16>
    %20 = vector.shape_cast %18 : vector<2x24x32xf32> to vector<48x32xf32>
    %21 = arith.truncf %20 : vector<48x32xf32> to vector<48x32xbf16>
    %cst_10 = arith.constant dense<0.000000e+00> : vector<48x64xf32>
    %22 = tpu.matmul %21, %19, %cst_10 {dimension_numbers = #tpu.dot_dimension_numbers<[1], [0], [0], [1], [0, 0, 1, 1], [], []>} : vector<48x32xbf16>, vector<32x64xbf16>, vector<48x64xf32> -> vector<48x64xf32>
    %23 = vector.shape_cast %22 : vector<48x64xf32> to vector<2x24x64xf32>
    %cst_11 = arith.constant 0.000000e+00 : f32
    %24 = vector.broadcast %cst_11 : f32 to vector<2x24x64xf32>
    %25 = arith.maximumf %23, %24 : vector<2x24x64xf32>
    %c0_12 = arith.constant 0 : index
    %c0_13 = arith.constant 0 : index
    %26 = vector.load %arg5[%c0_12, %c0_13] : memref<64x32xbf16, #tpu.memory_space<vmem>>, vector<64x32xbf16>
    %27 = vector.shape_cast %25 : vector<2x24x64xf32> to vector<48x64xf32>
    %28 = arith.truncf %27 : vector<48x64xf32> to vector<48x64xbf16>
    %cst_14 = arith.constant dense<0.000000e+00> : vector<48x32xf32>
    %29 = tpu.matmul %28, %26, %cst_14 {dimension_numbers = #tpu.dot_dimension_numbers<[1], [0], [0], [1], [0, 0, 1, 1], [], []>} : vector<48x64xbf16>, vector<64x32xbf16>, vector<48x32xf32> -> vector<48x32xf32>
    %30 = vector.shape_cast %29 : vector<48x32xf32> to vector<2x24x32xf32>
    %31 = arith.addf %18, %30 : vector<2x24x32xf32>
    %32 = vector.extract_strided_slice %31 {offsets = [0, 0, 0], sizes = [2, 1, 32], strides = [1, 1, 1]} : vector<2x24x32xf32> to vector<2x1x32xf32>
    %33 = vector.extract_strided_slice %31 {offsets = [0, 0, 0], sizes = [2, 23, 32], strides = [1, 1, 1]} : vector<2x24x32xf32> to vector<2x23x32xf32>
    %34 = tpu.concatenate %32, %33 in 1 : vector<2x1x32xf32>, vector<2x23x32xf32> -> vector<2x24x32xf32>
    %35 = vector.extract_strided_slice %31 {offsets = [0, 1, 0], sizes = [2, 23, 32], strides = [1, 1, 1]} : vector<2x24x32xf32> to vector<2x23x32xf32>
    %36 = vector.extract_strided_slice %31 {offsets = [0, 23, 0], sizes = [2, 1, 32], strides = [1, 1, 1]} : vector<2x24x32xf32> to vector<2x1x32xf32>
    %37 = tpu.concatenate %35, %36 in 1 : vector<2x23x32xf32>, vector<2x1x32xf32> -> vector<2x24x32xf32>
    %38 = arith.addf %31, %34 : vector<2x24x32xf32>
    %39 = arith.addf %38, %37 : vector<2x24x32xf32>
    %cst_15 = arith.constant 3.000000e+00 : f32
    %40 = vector.broadcast %cst_15 : f32 to vector<2x24x32xf32>
    %41 = arith.divf %39, %40 : vector<2x24x32xf32>
    %42 = arith.subf %31, %41 : vector<2x24x32xf32>
    %c0_16 = arith.constant 0 : index
    %c0_17 = arith.constant 0 : index
    %c0_18 = arith.constant 0 : index
    %43 = vector.load %arg7[%c0_16, %c0_17, %c0_18] : memref<2x24x32xf32, #tpu.memory_space<vmem>>, vector<2x24x32xf32>
    tpu.vector_store %arg7[%c0_16, %c0_17, %c0_18], %42 {strides = array<i32>} : memref<2x24x32xf32, #tpu.memory_space<vmem>>, vector<2x24x32xf32>,
    %c0_19 = arith.constant 0 : index
    %c0_20 = arith.constant 0 : index
    %c0_21 = arith.constant 0 : index
    %44 = vector.load %arg1[%c0_19, %c0_20, %c0_21] : memref<2x24x32xf32, #tpu.memory_space<vmem>>, vector<2x24x32xf32>
    %45 = arith.addf %44, %17 : vector<2x24x32xf32>
    %46 = arith.addf %45, %41 : vector<2x24x32xf32>
    %c0_22 = arith.constant 0 : index
    %c0_23 = arith.constant 0 : index
    %47 = vector.load %arg6[%c0_22, %c0_23] : memref<1x96xf32, #tpu.memory_space<vmem>>, vector<1x96xf32>
    %48 = vector.extract_strided_slice %46 {offsets = [0, 23, 0], sizes = [2, 1, 32], strides = [1, 1, 1]} : vector<2x24x32xf32> to vector<2x1x32xf32>
    %49 = vector.extract_strided_slice %46 {offsets = [0, 0, 0], sizes = [2, 23, 32], strides = [1, 1, 1]} : vector<2x24x32xf32> to vector<2x23x32xf32>
    %50 = tpu.concatenate %48, %49 in 1 : vector<2x1x32xf32>, vector<2x23x32xf32> -> vector<2x24x32xf32>
    %51 = vector.extract_strided_slice %46 {offsets = [0, 1, 0], sizes = [2, 23, 32], strides = [1, 1, 1]} : vector<2x24x32xf32> to vector<2x23x32xf32>
    %52 = vector.extract_strided_slice %46 {offsets = [0, 0, 0], sizes = [2, 1, 32], strides = [1, 1, 1]} : vector<2x24x32xf32> to vector<2x1x32xf32>
    %53 = tpu.concatenate %51, %52 in 1 : vector<2x23x32xf32>, vector<2x1x32xf32> -> vector<2x24x32xf32>
    %cst_24 = arith.constant 0.000000e+00 : f32
    %54 = vector.broadcast %cst_24 : f32 to vector<2x24x1xf32>
    %55 = vector.extract_strided_slice %47 {offsets = [0, 0], sizes = [1, 32], strides = [1, 1]} : vector<1x96xf32> to vector<1x32xf32>
    %56 = vector.shape_cast %55 : vector<1x32xf32> to vector<1x1x32xf32>
    %57 = vector.broadcast %56 : vector<1x1x32xf32> to vector<2x24x32xf32>
    %58 = arith.mulf %50, %57 : vector<2x24x32xf32>
    %cst_25 = arith.constant dense<0.000000e+00> : vector<2x24xf32>
    %59 = vector.multi_reduction <add>, %58, %cst_25 [2] : vector<2x24x32xf32> to vector<2x24xf32>
    %60 = vector.shape_cast %59 : vector<2x24xf32> to vector<2x24x1xf32>
    %61 = arith.addf %54, %60 : vector<2x24x1xf32>
    %62 = vector.extract_strided_slice %47 {offsets = [0, 32], sizes = [1, 32], strides = [1, 1]} : vector<1x96xf32> to vector<1x32xf32>
    %63 = vector.shape_cast %62 : vector<1x32xf32> to vector<1x1x32xf32>
    %64 = vector.broadcast %63 : vector<1x1x32xf32> to vector<2x24x32xf32>
    %65 = arith.mulf %46, %64 : vector<2x24x32xf32>
    %cst_26 = arith.constant dense<0.000000e+00> : vector<2x24xf32>
    %66 = vector.multi_reduction <add>, %65, %cst_26 [2] : vector<2x24x32xf32> to vector<2x24xf32>
    %67 = vector.shape_cast %66 : vector<2x24xf32> to vector<2x24x1xf32>
    %68 = arith.addf %61, %67 : vector<2x24x1xf32>
    %69 = vector.extract_strided_slice %47 {offsets = [0, 64], sizes = [1, 32], strides = [1, 1]} : vector<1x96xf32> to vector<1x32xf32>
    %70 = vector.shape_cast %69 : vector<1x32xf32> to vector<1x1x32xf32>
    %71 = vector.broadcast %70 : vector<1x1x32xf32> to vector<2x24x32xf32>
    %72 = arith.mulf %53, %71 : vector<2x24x32xf32>
    %cst_27 = arith.constant dense<0.000000e+00> : vector<2x24xf32>
    %73 = vector.multi_reduction <add>, %72, %cst_27 [2] : vector<2x24x32xf32> to vector<2x24xf32>
    %74 = vector.shape_cast %73 : vector<2x24xf32> to vector<2x24x1xf32>
    %75 = arith.addf %68, %74 : vector<2x24x1xf32>
    %c0_28 = arith.constant 0 : index
    %c0_29 = arith.constant 0 : index
    %c0_30 = arith.constant 0 : index
    %76 = vector.load %arg8[%c0_28, %c0_29, %c0_30] : memref<2x24x1xf32, #tpu.memory_space<vmem>>, vector<2x24x1xf32>
    tpu.vector_store %arg8[%c0_28, %c0_29, %c0_30], %75 {strides = array<i32>} : memref<2x24x1xf32, #tpu.memory_space<vmem>>, vector<2x24x1xf32>,
    return
  }
}

module attributes {stable_mosaic.version = 11 : i64} {
  func.func @_dec_final_kernel(%arg0: memref<2x24x32xf32, #tpu.memory_space<vmem>>, %arg1: memref<1x32xf32, #tpu.memory_space<vmem>>, %arg2: memref<1x32xf32, #tpu.memory_space<vmem>>, %arg3: memref<1x32xf32, #tpu.memory_space<vmem>>, %arg4: memref<1x1xf32, #tpu.memory_space<vmem>>, %arg5: memref<2x24x1xf32, #tpu.memory_space<vmem>>, %arg6: memref<2x24x1xf32, #tpu.memory_space<vmem>>) attributes {dimension_semantics = [], scalar_prefetch = 0 : i64, scratch_operands = 0 : i64, tpu.core_type = #tpu.core_type<tc>} {
    %c0 = arith.constant 0 : index
    %c0_0 = arith.constant 0 : index
    %c0_1 = arith.constant 0 : index
    %0 = vector.load %arg0[%c0, %c0_0, %c0_1] : memref<2x24x32xf32, #tpu.memory_space<vmem>>, vector<2x24x32xf32>
    %c0_2 = arith.constant 0 : index
    %c0_3 = arith.constant 0 : index
    %1 = vector.load %arg1[%c0_2, %c0_3] : memref<1x32xf32, #tpu.memory_space<vmem>>, vector<1x32xf32>
    %c0_4 = arith.constant 0 : index
    %c0_5 = arith.constant 0 : index
    %2 = vector.load %arg2[%c0_4, %c0_5] : memref<1x32xf32, #tpu.memory_space<vmem>>, vector<1x32xf32>
    %cst = arith.constant dense<0.000000e+00> : vector<2x24xf32>
    %3 = vector.multi_reduction <add>, %0, %cst [2] : vector<2x24x32xf32> to vector<2x24xf32>
    %4 = vector.shape_cast %3 : vector<2x24xf32> to vector<2x24x1xf32>
    %cst_6 = arith.constant 3.200000e+01 : f32
    %5 = vector.broadcast %cst_6 : f32 to vector<2x24x1xf32>
    %6 = arith.divf %4, %5 : vector<2x24x1xf32>
    %7 = vector.broadcast %6 : vector<2x24x1xf32> to vector<2x24x32xf32>
    %8 = arith.subf %0, %7 : vector<2x24x32xf32>
    %9 = arith.mulf %8, %8 : vector<2x24x32xf32>
    %cst_7 = arith.constant dense<0.000000e+00> : vector<2x24xf32>
    %10 = vector.multi_reduction <add>, %9, %cst_7 [2] : vector<2x24x32xf32> to vector<2x24xf32>
    %11 = vector.shape_cast %10 : vector<2x24xf32> to vector<2x24x1xf32>
    %cst_8 = arith.constant 3.200000e+01 : f32
    %12 = vector.broadcast %cst_8 : f32 to vector<2x24x1xf32>
    %13 = arith.divf %11, %12 : vector<2x24x1xf32>
    %cst_9 = arith.constant 9.99999974E-6 : f32
    %14 = vector.broadcast %cst_9 : f32 to vector<2x24x1xf32>
    %15 = arith.addf %13, %14 : vector<2x24x1xf32>
    %16 = math.rsqrt %15 : vector<2x24x1xf32>
    %17 = vector.broadcast %16 : vector<2x24x1xf32> to vector<2x24x32xf32>
    %18 = arith.mulf %8, %17 : vector<2x24x32xf32>
    %19 = vector.shape_cast %1 : vector<1x32xf32> to vector<1x1x32xf32>
    %20 = vector.broadcast %19 : vector<1x1x32xf32> to vector<2x24x32xf32>
    %21 = arith.mulf %18, %20 : vector<2x24x32xf32>
    %22 = vector.shape_cast %2 : vector<1x32xf32> to vector<1x1x32xf32>
    %23 = vector.broadcast %22 : vector<1x1x32xf32> to vector<2x24x32xf32>
    %24 = arith.addf %21, %23 : vector<2x24x32xf32>
    %cst_10 = arith.constant dense<0.000000e+00> : vector<2x32xf32>
    %25 = vector.multi_reduction <add>, %24, %cst_10 [1] : vector<2x24x32xf32> to vector<2x32xf32>
    %26 = vector.shape_cast %25 : vector<2x32xf32> to vector<2x1x32xf32>
    %cst_11 = arith.constant 2.400000e+01 : f32
    %27 = vector.broadcast %cst_11 : f32 to vector<2x1x32xf32>
    %28 = arith.divf %26, %27 : vector<2x1x32xf32>
    %29 = vector.broadcast %28 : vector<2x1x32xf32> to vector<2x24x32xf32>
    %30 = arith.subf %24, %29 : vector<2x24x32xf32>
    %c0_12 = arith.constant 0 : index
    %c0_13 = arith.constant 0 : index
    %31 = vector.load %arg3[%c0_12, %c0_13] : memref<1x32xf32, #tpu.memory_space<vmem>>, vector<1x32xf32>
    %32 = vector.shape_cast %31 : vector<1x32xf32> to vector<1x1x32xf32>
    %33 = vector.broadcast %32 : vector<1x1x32xf32> to vector<2x24x32xf32>
    %34 = arith.mulf %30, %33 : vector<2x24x32xf32>
    %cst_14 = arith.constant dense<0.000000e+00> : vector<2x24xf32>
    %35 = vector.multi_reduction <add>, %34, %cst_14 [2] : vector<2x24x32xf32> to vector<2x24xf32>
    %36 = vector.shape_cast %35 : vector<2x24xf32> to vector<2x24x1xf32>
    %c0_15 = arith.constant 0 : index
    %c0_16 = arith.constant 0 : index
    %37 = vector.load %arg4[%c0_15, %c0_16] : memref<1x1xf32, #tpu.memory_space<vmem>>, vector<1x1xf32>
    %38 = vector.shape_cast %37 : vector<1x1xf32> to vector<1x1x1xf32>
    %39 = vector.broadcast %38 : vector<1x1x1xf32> to vector<2x24x1xf32>
    %40 = arith.addf %36, %39 : vector<2x24x1xf32>
    %c0_17 = arith.constant 0 : index
    %c0_18 = arith.constant 0 : index
    %c0_19 = arith.constant 0 : index
    %41 = vector.load %arg5[%c0_17, %c0_18, %c0_19] : memref<2x24x1xf32, #tpu.memory_space<vmem>>, vector<2x24x1xf32>
    %42 = arith.addf %40, %41 : vector<2x24x1xf32>
    %c0_20 = arith.constant 0 : index
    %c0_21 = arith.constant 0 : index
    %c0_22 = arith.constant 0 : index
    %43 = vector.load %arg6[%c0_20, %c0_21, %c0_22] : memref<2x24x1xf32, #tpu.memory_space<vmem>>, vector<2x24x1xf32>
    tpu.vector_store %arg6[%c0_20, %c0_21, %c0_22], %42 {strides = array<i32>} : memref<2x24x1xf32, #tpu.memory_space<vmem>>, vector<2x24x1xf32>,
    return
  }
}

</mosaic_0001>

<bundles_post_ra>
// kernel: model_forward.9
= control target key start
LH: loop header
LB: loop body
LE: loop exit
PB: predicated region body
PF: predicated region fallthrough
CT: control target
= control target key end

     0   :  { %vm109_vm0 = vcmask 7168   ;;  %v197_v0 = vmov 0   ;;  %vm66_vm1 = vcmask 1040384   ;;  %vm79_vm2 = vcmask 1046528   ;;  %s368_s0 = inlined_call_operand.vmem [shape: f32[2,16,1], index: 0, kind: input, shape index: {}]   ;;  %s369_s1 = inlined_call_operand.vmem [shape: f32[1,32], index: 1, kind: input, shape index: {}]   ;;  %s370_s6 = inlined_call_operand.vmem [shape: f32[2,24,1], index: 6, kind: output, shape index: {2}]   ;;  %s371_s3 = inlined_call_operand.vmem [shape: f32[24,32], index: 3, kind: input, shape index: {}]   ;;  %s372_s5 = inlined_call_operand.vmem [shape: f32[2,24,32], index: 5, kind: output, shape index: {1}]   ;;  %s373_s2 = inlined_call_operand.vmem [shape: f32[16,32], index: 2, kind: input, shape index: {}]   ;;  %s374_s4 = inlined_call_operand.vmem [shape: f32[2,16,32], index: 4, kind: output, shape index: {0}]  }
   0x1   :  { %196 = vset.pattern.permute.xlu1 %v197_v0  ;;  %195 = vset.pattern.permute.xlu0 %v197_v0  ;;  %v236_v1 = vld [vmem:[%s368_s0 + $0x10] sm:$0xff]  ;;  %v20_v2 = vld [vmem:[%s368_s0] sm:$0xff]  ;;  %v244_v3 = vld [vmem:[%s368_s0 + $0x18] sm:$0xff]  ;;  %vm61_vm3 = vcmask 261120  }
   0x2   :  { %37 = vperm.xlu1 %196, %v236_v1   ;;  %v119_v4 = vsel %vm109_vm0, %v236_v1, 0.0  ;;  %27 = vperm.xlu0 %195, %v20_v2   ;;  %v110_v5 = vsel %vm109_vm0, %v20_v2, 0.0  ;;  %v120_v6 = vsel %vm109_vm0, %v244_v3, 0.0  ;;  %v21_v7 = vld [vmem:[%s368_s0 + $0x8] sm:$0xff]  ;;  %v67_v8 = vrot.slane %v20_v2, 7  ;;  %v169_v38 = vld [vmem:[%s371_s3 + $0x10] sm:$0xff] }
   0x3   :  { %v121_v9 = vadd.f32 %v120_v6, %v119_v4  ;;  %v111_v10 = vsel %vm109_vm0, %v21_v7, 0.0  ;;  %v80_v11 = vrot.slane %v20_v2, 1  ;;  %v81_v12 = vrot.slane %v21_v7, 1  ;;  %v269_v29 = vld [vmem:[%s369_s1] ss:$0 sm:$0xff]  ;;  %v56_v4 = vld [vmem:[%s373_s2 + $0x8] sm:$0xff] }
   0x4   :  { %v112_v13 = vadd.f32 %v111_v10, %v110_v5  ;;  %v77_v14 = vsel %vm66_vm1, %v20_v2, %v67_v8  ;;  %v68_v15 = vrot.slane %v21_v7, 7  ;;  %v70_v16 = vrot.slane %v236_v1, 7  ;;  %v55_v61 = vld [vmem:[%s373_s2] sm:$0xff] }
   0x5   :  { %v122_v17 = vrot.slane %v121_v9, 4  ;;  %v82_v18 = vsel %vm79_vm2, %v80_v11, %v81_v12  ;;  %v92_v19 = vadd.f32 %v77_v14, %v20_v2  ;;  %v90_v20 = vsel %vm79_vm2, %v81_v12, %v21_v7  ;;  %v167_v11 = vld [vmem:[%s371_s3] sm:$0xff]  ;;  %v168_v14 = vld [vmem:[%s371_s3 + $0x8] sm:$0xff] }
   0x6   :  { %42 = vperm.xlu1 %196, %v244_v3   ;;  %32 = vperm.xlu0 %195, %v21_v7   ;;  %v113_v21 = vrot.slane %v112_v13, 4  ;;  %v69_v22 = vsel %vm66_vm1, %v67_v8, %v68_v15  ;;  %v78_v23 = vsel %vm66_vm1, %v236_v1, %v70_v16  ;;  %v83_v24 = vrot.slane %v236_v1, 1 }
   0x7   :  { %v123_v25 = vadd.f32 %v122_v17, %v121_v9  ;;  %v96_v26 = vadd.f32 %v92_v19, %v82_v18  ;;  %v93_v27 = vadd.f32 %v69_v22, %v21_v7  ;;  %v84_v28 = vrot.slane %v244_v3, 1 }
   0x8   :  { %v114_v30 = vadd.f32 %v113_v21, %v112_v13  ;;  %v94_v31 = vadd.f32 %v78_v23, %v236_v1  ;;  %v71_v32 = vrot.slane %v244_v3, 7  ;;  %v164_v33 = vmul.f32 0.0, %v269_v29 }
   0x9   :  { %v124_v34 = vrot.slane %v123_v25, 2  ;;  %v101_v35 = vmul.f32 0.33333334, %v96_v26  ;;  %v97_v36 = vadd.f32 %v93_v27, %v90_v20  ;;  %v85_v37 = vsel %vm79_vm2, %v83_v24, %v84_v28 }
   0xa   :  { %v115_v39 = vrot.slane %v114_v30, 2  ;;  %v98_v40 = vadd.f32 %v94_v31, %v85_v37  ;;  %v72_v41 = vsel %vm66_vm1, %v70_v16, %v71_v32  ;;  %v91_v42 = vsel %vm79_vm2, %v84_v28, %v244_v3 }
   0xb   :  { %v125_v43 = vadd.f32 %v124_v34, %v123_v25  ;;  %v105_v44 = vsub.f32 %v20_v2, %v101_v35  ;;  %131 = vst.msk [vmem:[%s370_s6] sm:$0xff] %vm109_vm0, %v101_v35  ;;  %v102_v45 = vmul.f32 0.33333334, %v97_v36  ;;  %v95_v46 = vadd.f32 %v72_v41, %v244_v3 }
   0xc   :  { %v116_v47 = vadd.f32 %v115_v39, %v114_v30  ;;  %v103_v48 = vmul.f32 0.33333334, %v98_v40  ;;  %v172_v49 = vadd.f32 %v169_v38, %v164_v33 }
   0xd   :  { %v126_v50 = vrot.slane %v125_v43, 1  ;;  %139 = vperm.xlu0 %195, %v105_v44   ;;  %v106_v51 = vsub.f32 %v21_v7, %v102_v45  ;;  %132 = vst.msk [vmem:[%s370_s6 + $0x8] sm:$0xff] %vm109_vm0, %v102_v45  ;;  %v99_v52 = vadd.f32 %v95_v46, %v91_v42 }
   0xe   :  { %v117_v53 = vrot.slane %v116_v47, 1  ;;  %v107_v54 = vsub.f32 %v236_v1, %v103_v48  ;;  %134 = vst.msk [vmem:[%s370_s6 + $0x18] sm:$0xff] %vm109_vm0, %v103_v48 }
   0xf   :  { %177 = vst.msk [vmem:[%s372_s5 + $0x10] sm:$0xff] %vm61_vm3, %v172_v49  ;;  %180 = vst.msk [vmem:[%s372_s5 + $0x28] sm:$0xff] %vm61_vm3, %v172_v49  ;;  %v127_v55 = vadd.f32 %v126_v50, %v125_v43  ;;  %144 = vperm.xlu1 %196, %v106_v51   ;;  %v104_v56 = vmul.f32 0.33333334, %v99_v52 }
  0x10   :  { %v118_v57 = vadd.f32 %v117_v53, %v116_v47 }
  0x11   :  { %v130_v58 = vmul.f32 0.0625, %v127_v55  ;;  %154 = vperm.xlu0 %195, %v107_v54   ;;  %v108_v59 = vsub.f32 %v244_v3, %v104_v56  ;;  %135 = vst.msk [vmem:[%s370_s6 + $0x20] sm:$0xff] %vm109_vm0, %v104_v56 }
  0x12   :  { %v129_v60 = vmul.f32 0.0625, %v118_v57 }
  0x13   :  { %136 = vst.msk [vmem:[%s370_s6 + $0x28] sm:$0xff] %vm109_vm0, %v130_v58  ;;  %159 = vperm.xlu1 %196, %v108_v59  }
  0x14   :  { %133 = vst.msk [vmem:[%s370_s6 + $0x10] sm:$0xff] %vm109_vm0, %v129_v60 }
  0x7d   :  { %v38_v62 = vpop.permute.xlu1 %37  ;;  %v28_v63 = vpop.permute.xlu0 %27 }
  0x7e   :  { %v53_v0 = vmul.f32 %v269_v29, %v38_v62  ;;  %v51_v1 = vmul.f32 %v269_v29, %v28_v63 }
  0x80   :  { %v59_v2 = vadd.f32 %v55_v61, %v53_v0  ;;  %v57_v3 = vadd.f32 %v55_v61, %v51_v1 }
  0x81   :  { %v43_v5 = vpop.permute.xlu1 %42  ;;  %v33_v6 = vpop.permute.xlu0 %32 }
  0x82   :  { %64 = vst.msk [vmem:[%s374_s4 + $0x10] sm:$0xff] %vm61_vm3, %v59_v2  ;;  %62 = vst.msk [vmem:[%s374_s4] sm:$0xff] %vm61_vm3, %v57_v3  ;;  %v54_v7 = vmul.f32 %v269_v29, %v43_v5  ;;  %v52_v8 = vmul.f32 %v269_v29, %v33_v6 }
  0x84   :  { %v60_v9 = vadd.f32 %v56_v4, %v54_v7  ;;  %v58_v10 = vadd.f32 %v56_v4, %v52_v8 }
  0x86   :  { %65 = vst.msk [vmem:[%s374_s4 + $0x18] sm:$0xff] %vm61_vm3, %v60_v9  ;;  %63 = vst.msk [vmem:[%s374_s4 + $0x8] sm:$0xff] %vm61_vm3, %v58_v10 }
  0x88   :  { %v140_v12 = vpop.permute.xlu0 %139 }
  0x89   :  { %v162_v13 = vmul.f32 %v269_v29, %v140_v12 }
  0x8a   :  { %v145_v15 = vpop.permute.xlu1 %144 }
  0x8b   :  { %v170_v16 = vadd.f32 %v167_v11, %v162_v13  ;;  %v163_v17 = vmul.f32 %v269_v29, %v145_v15 }
  0x8c   :  { %v155_v18 = vpop.permute.xlu0 %154 }
  0x8d   :  { %175 = vst.msk [vmem:[%s372_s5] sm:$0xff] %vm61_vm3, %v170_v16  ;;  %v171_v19 = vadd.f32 %v168_v14, %v163_v17  ;;  %v165_v20 = vmul.f32 %v269_v29, %v155_v18 }
  0x8e   :  { %v160_v21 = vpop.permute.xlu1 %159 }
  0x8f   :  { %176 = vst.msk [vmem:[%s372_s5 + $0x8] sm:$0xff] %vm61_vm3, %v171_v19  ;;  %v173_v22 = vadd.f32 %v167_v11, %v165_v20  ;;  %v166_v23 = vmul.f32 %v269_v29, %v160_v21 }
  0x91   :  { %178 = vst.msk [vmem:[%s372_s5 + $0x18] sm:$0xff] %vm61_vm3, %v173_v22  ;;  %v174_v24 = vadd.f32 %v168_v14, %v166_v23 }
  0x93   :  { %179 = vst.msk [vmem:[%s372_s5 + $0x20] sm:$0xff] %vm61_vm3, %v174_v24 }

// kernel: model_forward.11
= control target key start
LH: loop header
LB: loop body
LE: loop exit
PB: predicated region body
PF: predicated region fallthrough
CT: control target
= control target key end

     0   :  { %vm34_vm0 = vcmask 261120   ;;  %vm90_vm1 = vcmask 785408   ;;  %s162_s1 = inlined_call_operand.vmem [shape: bf16[32,96], index: 1, kind: input, shape index: {}]   ;;  %s163_s0 = inlined_call_operand.vmem [shape: f32[32,32], index: 0, kind: input, shape index: {}]   ;;  %s164_s2 = inlined_call_operand.vmem [shape: f32[32,96], index: 2, kind: output, shape index: {}]  }
   0x1   :  { %v115_v0 = vld [vmem:[%s162_s1 + $0x8] sm:$0xff]   ;;  %v116_v1 = vld [vmem:[%s162_s1] sm:$0xff]   ;;  %v14_v5 = vld [vmem:[%s163_s0 + $0x10] sm:$0xff] }
   0x2   :  { %107 = vmatprep.subr.bf16.mxu0 %v115_v0  ;;  %v12_v2 = vld [vmem:[%s163_s0] sm:$0xff]  ;;  %v13_v3 = vld [vmem:[%s163_s0 + $0x8] sm:$0xff]  ;;  %v15_v6 = vld [vmem:[%s163_s0 + $0x18] sm:$0xff] }
   0x3   :  { %108 = vmatpush3.bf16.msra.mxu0 %v115_v0  ;;  %v16_v4 = vpack.c.bf16 %v13_v3, %v12_v2  ;;  %v17_v7 = vpack.c.bf16 %v15_v6, %v14_v5 }
   0x4   :  { %109 = vmatprep.subr.bf16.mxu0 %v116_v1 }
   0x5   :  { %111 = vmatprep.mubr.msk.bf16.mxu0 %vm34_vm0, %v16_v4 }
   0x7   :  { %110 = vmatpush3.bf16.msra.mxu0 %v116_v1 }
   0xa   :  { %112 = vmatmul.mubr.msk.bf16.vlgmr.msra.gmra.mxu0 %vm34_vm0, %v17_v7 }
  0xca   :  { %v113_v8 = vpop.f32.mrf.mxu0 }
  0xcb   :  { %93 = vst.msk [vmem:[%s164_s2 + $0x10] sm:$0xff] %vm90_vm1, %v113_v8 }
  0xcc   :  { %v75_v9 = vpop.f32.mrf.mxu0 }
  0xcd   :  { %91 = vst.msk [vmem:[%s164_s2] sm:$0xff] %vm90_vm1, %v75_v9 }
  0xce   :  { %v114_v10 = vpop.f32.mrf.mxu0 }
  0xcf   :  { %94 = vst.msk [vmem:[%s164_s2 + $0x18] sm:$0xff] %vm90_vm1, %v114_v10 }
  0xd0   :  { %v78_v11 = vpop.f32.mrf.mxu0 }
  0xd1   :  { %92 = vst.msk [vmem:[%s164_s2 + $0x8] sm:$0xff] %vm90_vm1, %v78_v11 }

// kernel: reverse.11
= control target key start
LH: loop header
LB: loop body
LE: loop exit
PB: predicated region body
PF: predicated region fallthrough
CT: control target
= control target key end

     0   :  { %v56_v3 = vlaneseq  ;;  %v49_v5 = vld [vmem:[#allocation0 + $0x7] ss:$-1 sm:$0xff]  ;;  %v63_v6 = vld [vmem:[#allocation0 + $0x17] ss:$-1 sm:$0xff]  ;;  %s199_s0 = inlined_call_operand.vmem [shape: f32[2,2,16,7], index: 0, kind: input, shape index: {}]   ;;  %s200_s1 = inlined_call_operand.vmem [shape: f32[2,2,16,7], index: 1, kind: output, shape index: {}]  }
   0x1   :  { %v37_v0 = vld [vmem:[%s199_s0] sm:$0xff]  ;;  %v39_v1 = vld [vmem:[%s199_s0 + $0x8] sm:$0xff]  ;;  %v41_v2 = vld [vmem:[%s199_s0 + $0x10] sm:$0xff]  ;;  %v50_v7 = vrot.slane %v49_v5, 1  ;;  %v64_v8 = vrot.slane %v63_v6, 1 }
   0x2   :  { %38 = vst [vmem:[#allocation0 + $0x8] sm:$0xff] %v37_v0  ;;  %40 = vst [vmem:[#allocation0 + $0x18] sm:$0xff] %v39_v1  ;;  %v43_v4 = vld [vmem:[%s199_s0 + $0x18] sm:$0xff]  ;;  %v77_v9 = vld [vmem:[#allocation0 + $0x27] ss:$-1 sm:$0xff]  ;;  %v57_v10 = vshrl.u32 %v56_v3, 7 }
   0x3   :  { %42 = vst [vmem:[#allocation0 + $0x28] sm:$0xff] %v41_v2  ;;  %44 = vst [vmem:[#allocation0 + $0x38] sm:$0xff] %v43_v4  ;;  %v78_v11 = vrot.slane %v77_v9, 1  ;;  %v91_v12 = vld [vmem:[#allocation0 + $0x37] ss:$-1 sm:$0xff] }
   0x4   :  { %51 = vst [vmem:[#allocation1] sm:$0xff] %v50_v7  ;;  %65 = vst [vmem:[#allocation1 + $0x8] sm:$0xff] %v64_v8  ;;  %v92_v13 = vrot.slane %v91_v12, 1  ;;  %vm58_vm0 = vcmp.lt.s32.totalorder %v57_v10, 7 }
   0x5   :  { %79 = vst [vmem:[#allocation1 + $0x10] sm:$0xff] %v78_v11 }
   0x6   :  { %93 = vst [vmem:[#allocation1 + $0x18] sm:$0xff] %v92_v13 }
   0x9   :  { %v54_v14 = vld [vmem:[#allocation0 + $0xf] ss:$-1 sm:$0xff]  ;;  %v68_v15 = vld [vmem:[#allocation0 + $0x1f] ss:$-1 sm:$0xff] }
   0xa   :  { %v82_v16 = vld [vmem:[#allocation0 + $0x2f] ss:$-1 sm:$0xff]  ;;  %v55_v17 = vrot.slane %v54_v14, 1  ;;  %v69_v18 = vrot.slane %v68_v15, 1  ;;  %v96_v20 = vld [vmem:[#allocation0 + $0x3f] ss:$-1 sm:$0xff] }
   0xb   :  { %v83_v19 = vrot.slane %v82_v16, 1  ;;  %v97_v21 = vrot.slane %v96_v20, 1 }
   0xc   :  { %59 = vst.msk [vmem:[#allocation1] sm:$0xff] %vm58_vm0, %v55_v17  ;;  %73 = vst.msk [vmem:[#allocation1 + $0x8] sm:$0xff] %vm58_vm0, %v69_v18 }
   0xd   :  { %87 = vst.msk [vmem:[#allocation1 + $0x10] sm:$0xff] %vm58_vm0, %v83_v19  ;;  %101 = vst.msk [vmem:[#allocation1 + $0x18] sm:$0xff] %vm58_vm0, %v97_v21 }
  0x13   :  { %v136_v22 = vld [vmem:[#allocation1] sm:$0xff]  ;;  %v138_v23 = vld [vmem:[#allocation1 + $0x8] sm:$0xff] }
  0x14   :  { %v140_v24 = vld [vmem:[#allocation1 + $0x10] sm:$0xff]  ;;  %137 = vst [vmem:[%s200_s1] sm:$0xff] %v136_v22  ;;  %139 = vst [vmem:[%s200_s1 + $0x8] sm:$0xff] %v138_v23  ;;  %v142_v25 = vld [vmem:[#allocation1 + $0x18] sm:$0xff] }
  0x15   :  { %141 = vst [vmem:[%s200_s1 + $0x10] sm:$0xff] %v140_v24  ;;  %143 = vst [vmem:[%s200_s1 + $0x18] sm:$0xff] %v142_v25 }

// kernel: model_forward.12
= control target key start
LH: loop header
LB: loop body
LE: loop exit
PB: predicated region body
PF: predicated region fallthrough
CT: control target
= control target key end

     0   :  { %vm59_vm0 = vcmask 261120   ;;  %vm123_vm1 = vcmask 1040384   ;;  %vm136_vm2 = vcmask 1046528   ;;  %vm265_vm3 = vcmask 523264   ;;  %s587_s2 = inlined_call_operand.vmem [shape: bf16[32,32], index: 2, kind: input, shape index: {}]   ;;  %s588_s1 = inlined_call_operand.vmem [shape: f32[2,16,32], index: 1, kind: input, shape index: {}]   ;;  %s589_s3 = inlined_call_operand.vmem [shape: bf16[32,64], index: 3, kind: input, shape index: {}]   ;;  %s590_s4 = inlined_call_operand.vmem [shape: bf16[64,32], index: 4, kind: input, shape index: {}]   ;;  %s591_s0 = inlined_call_operand.vmem [shape: f32[2,16,32], index: 0, kind: input, shape index: {}]   ;;  %s592_s5 = inlined_call_operand.vmem [shape: f32[2,16,32], index: 5, kind: output, shape index: {}]  }
   0x1   :  { %v433_v0 = vld [vmem:[%s587_s2 + $0x8] sm:$0xff]   ;;  %v434_v1 = vld [vmem:[%s587_s2] sm:$0xff]   ;;  %v27_v5 = vld [vmem:[%s588_s1 + $0x10] sm:$0xff] }
   0x2   :  { %405 = vmatprep.subr.bf16.mxu1 %v433_v0  ;;  %v25_v2 = vld [vmem:[%s588_s1] sm:$0xff]  ;;  %v26_v3 = vld [vmem:[%s588_s1 + $0x8] sm:$0xff]  ;;  %v28_v6 = vld [vmem:[%s588_s1 + $0x18] sm:$0xff] }
   0x3   :  { %406 = vmatpush3.bf16.msra.mxu1 %v433_v0  ;;  %v45_v4 = vpack.c.bf16 %v26_v3, %v25_v2  ;;  %v46_v7 = vpack.c.bf16 %v28_v6, %v27_v5  ;;  %v435_v8 = vld [vmem:[%s589_s3 + $0x8] sm:$0xff]   ;;  %v436_v9 = vld [vmem:[%s589_s3] sm:$0xff]   ;;  %v437_v10 = vld [vmem:[%s590_s4 + $0x18] sm:$0xff]  }
   0x4   :  { %407 = vmatprep.subr.bf16.mxu1 %v434_v1  ;;  %421 = vmatprep.subr.bf16.mxu0 %v437_v10  ;;  %v23_v11 = vld [vmem:[%s591_s0 + $0x10] sm:$0xff]  ;;  %v21_v13 = vld [vmem:[%s591_s0] sm:$0xff]  ;;  %v24_v16 = vld [vmem:[%s591_s0 + $0x18] sm:$0xff] }
   0x5   :  { %409 = vmatprep.mubr.msk.bf16.mxu1 %vm59_vm0, %v45_v4  ;;  %422 = vmatpush3.bf16.msra.mxu0 %v437_v10  ;;  %v22_v20 = vld [vmem:[%s591_s0 + $0x8] sm:$0xff]  ;;  %v438_v57 = vld [vmem:[%s590_s4 + $0x10] sm:$0xff]   ;;  %v440_v59 = vld [vmem:[%s590_s4] sm:$0xff]  }
   0x6   :  { %423 = vmatprep.subr.bf16.mxu0 %v438_v57  ;;  %v439_v58 = vld [vmem:[%s590_s4 + $0x8] sm:$0xff]  }
   0x7   :  { %408 = vmatpush3.bf16.msra.mxu1 %v434_v1 }
   0x8   :  { %413 = vmatprep.subr.bf16.mxu1 %v435_v8 }
   0x9   :  { %424 = vmatpush3.bf16.msra.mxu0 %v438_v57 }
   0xa   :  { %410 = vmatmul.mubr.msk.bf16.vlgmr.msra.gmra.mxu1 %vm59_vm0, %v46_v7  ;;  %425 = vmatprep.subr.bf16.mxu0 %v439_v58 }
   0xb   :  { %414 = vmatpush3.bf16.msra.mxu1 %v435_v8 }
   0xc   :  { %415 = vmatprep.subr.bf16.mxu1 %v436_v9 }
   0xd   :  { %426 = vmatpush3.bf16.msra.mxu0 %v439_v58 }
   0xe   :  { %427 = vmatprep.subr.bf16.mxu0 %v440_v59 }
   0xf   :  { %416 = vmatpush3.bf16.msra.mxu1 %v436_v9 }
  0x11   :  { %428 = vmatpush3.bf16.msra.mxu0 %v440_v59 }
  0xca   :  { %v411_v12 = vpop.f32.mrf.mxu1 }
  0xcb   :  { %v506_v14 = vadd.f32 %v411_v12, %v23_v11 }
  0xcc   :  { %v100_v15 = vpop.f32.mrf.mxu1 }
  0xcd   :  { %v127_v17 = vrot.slane %v506_v14, 7  ;;  %v512_v18 = vadd.f32 %v100_v15, %v21_v13  ;;  %v140_v24 = vrot.slane %v506_v14, 1 }
  0xce   :  { %v412_v19 = vpop.f32.mrf.mxu1 }
  0xcf   :  { %v135_v21 = vsel %vm123_vm1, %v506_v14, %v127_v17  ;;  %v124_v22 = vrot.slane %v512_v18, 7  ;;  %v520_v23 = vadd.f32 %v412_v19, %v24_v16  ;;  %v137_v30 = vrot.slane %v512_v18, 1 }
  0xd0   :  { %v103_v25 = vpop.f32.mrf.mxu1  ;;  %v151_v31 = vadd.f32 %v135_v21, %v506_v14 }
  0xd1   :  { %v128_v26 = vrot.slane %v520_v23, 7  ;;  %v141_v27 = vrot.slane %v520_v23, 1  ;;  %v525_v28 = vadd.f32 %v103_v25, %v22_v20  ;;  %v134_v29 = vsel %vm123_vm1, %v512_v18, %v124_v22 }
  0xd2   :  { %v149_v36 = vadd.f32 %v134_v29, %v512_v18 }
  0xd3   :  { %v125_v32 = vrot.slane %v525_v28, 7  ;;  %v138_v33 = vrot.slane %v525_v28, 1  ;;  %v129_v34 = vsel %vm123_vm1, %v127_v17, %v128_v26  ;;  %v142_v35 = vsel %vm136_vm2, %v140_v24, %v141_v27 }
  0xd4   :  { %v152_v37 = vadd.f32 %v129_v34, %v520_v23  ;;  %v148_v40 = vsel %vm136_vm2, %v141_v27, %v520_v23  ;;  %v155_v41 = vadd.f32 %v151_v31, %v142_v35 }
  0xd5   :  { %v126_v38 = vsel %vm123_vm1, %v124_v22, %v125_v32  ;;  %v139_v39 = vsel %vm136_vm2, %v137_v30, %v138_v33  ;;  %v147_v45 = vsel %vm136_vm2, %v138_v33, %v525_v28 }
  0xd6   :  { %v150_v42 = vadd.f32 %v126_v38, %v525_v28  ;;  %v153_v43 = vadd.f32 %v149_v36, %v139_v39  ;;  %v156_v44 = vadd.f32 %v152_v37, %v148_v40  ;;  %v160_v49 = vmul.f32 0.33333334, %v155_v41 }
  0xd8   :  { %v154_v46 = vadd.f32 %v150_v42, %v147_v45  ;;  %v158_v47 = vmul.f32 0.33333334, %v153_v43  ;;  %v161_v48 = vmul.f32 0.33333334, %v156_v44  ;;  %v164_v54 = vsub.f32 %v506_v14, %v160_v49 }
  0xda   :  { %v159_v50 = vmul.f32 0.33333334, %v154_v46  ;;  %v165_v51 = vsub.f32 %v520_v23, %v161_v48  ;;  %v162_v52 = vsub.f32 %v512_v18, %v158_v47 }
  0xdc   :  { %v163_v53 = vsub.f32 %v525_v28, %v159_v50  ;;  %v167_v56 = vpack.c.bf16 %v165_v51, %v164_v54 }
  0xde   :  { %v166_v55 = vpack.c.bf16 %v163_v53, %v162_v52 }
  0xe0   :  { %417 = vmatprep.mubr.msk.bf16.mxu1 %vm59_vm0, %v166_v55 }
  0xe1   :  { %418 = vmatmul.mubr.msk.bf16.vlgmr.msra.gmra.mxu1 %vm59_vm0, %v167_v56 }
 0x1a1   :  { %v419_v60 = vpop.f32.mrf.mxu1 }
 0x1a2   :  { %v237_v3 = vmax.f32 %v419_v60, 0.0 }
 0x1a3   :  { %v220_v61 = vpop.f32.mrf.mxu1 }
 0x1a4   :  { %v235_v1 = vmax.f32 %v220_v61, 0.0 }
 0x1a5   :  { %v420_v62 = vpop.f32.mrf.mxu1 }
 0x1a6   :  { %v238_v63 = vmax.f32 %v420_v62, 0.0 }
 0x1a7   :  { %v223_v0 = vpop.f32.mrf.mxu1 }
 0x1a8   :  { %v236_v2 = vmax.f32 %v223_v0, 0.0  ;;  %v240_v5 = vpack.c.bf16 %v238_v63, %v237_v3 }
 0x1aa   :  { %v239_v4 = vpack.c.bf16 %v236_v2, %v235_v1 }
 0x1ac   :  { %429 = vmatprep.mubr.msk.bf16.mxu0 %vm265_vm3, %v239_v4 }
 0x1ad   :  { %430 = vmatmul.mubr.msk.bf16.vlgmr.msra.gmra.mxu0 %vm265_vm3, %v240_v5 }
 0x26d   :  { %v431_v6 = vpop.f32.mrf.mxu0 }
 0x26e   :  { %v323_v7 = vadd.f32 %v431_v6, %v506_v14 }
 0x26f   :  { %v306_v8 = vpop.f32.mrf.mxu0 }
 0x270   :  { %v332_v9 = vrot.slane %v323_v7, 7  ;;  %v321_v10 = vadd.f32 %v306_v8, %v512_v18  ;;  %v344_v17 = vrot.slane %v323_v7, 1 }
 0x271   :  { %v432_v11 = vpop.f32.mrf.mxu0 }
 0x272   :  { %v340_v12 = vsel %vm123_vm1, %v323_v7, %v332_v9  ;;  %v329_v13 = vrot.slane %v321_v10, 7  ;;  %v324_v15 = vadd.f32 %v432_v11, %v520_v23  ;;  %v341_v26 = vrot.slane %v321_v10, 1 }
 0x273   :  { %v309_v16 = vpop.f32.mrf.mxu0  ;;  %v355_v22 = vadd.f32 %v340_v12, %v323_v7 }
 0x274   :  { %v333_v19 = vrot.slane %v324_v15, 7  ;;  %v345_v20 = vrot.slane %v324_v15, 1  ;;  %v322_v21 = vadd.f32 %v309_v16, %v525_v28  ;;  %v339_v24 = vsel %vm123_vm1, %v321_v10, %v329_v13 }
 0x275   :  { %v353_v31 = vadd.f32 %v339_v24, %v321_v10 }
 0x276   :  { %v334_v14 = vsel %vm123_vm1, %v332_v9, %v333_v19  ;;  %v346_v25 = vsel %vm136_vm2, %v344_v17, %v345_v20  ;;  %v330_v18 = vrot.slane %v322_v21, 7  ;;  %v342_v30 = vrot.slane %v322_v21, 1 }
 0x277   :  { %v356_v27 = vadd.f32 %v334_v14, %v324_v15  ;;  %v359_v29 = vadd.f32 %v355_v22, %v346_v25  ;;  %v352_v23 = vsel %vm136_vm2, %v345_v20, %v324_v15 }
 0x278   :  { %v331_v32 = vsel %vm123_vm1, %v329_v13, %v330_v18  ;;  %v343_v28 = vsel %vm136_vm2, %v341_v26, %v342_v30  ;;  %v351_v39 = vsel %vm136_vm2, %v342_v30, %v322_v21 }
 0x279   :  { %v360_v33 = vadd.f32 %v356_v27, %v352_v23  ;;  %v363_v34 = vmul.f32 0.33333334, %v359_v29  ;;  %v354_v35 = vadd.f32 %v331_v32, %v322_v21  ;;  %v357_v36 = vadd.f32 %v353_v31, %v343_v28 }
 0x27b   :  { %v364_v37 = vmul.f32 0.33333334, %v360_v33  ;;  %v367_v38 = vsub.f32 %v323_v7, %v363_v34  ;;  %v358_v40 = vadd.f32 %v354_v35, %v351_v39  ;;  %v361_v41 = vmul.f32 0.33333334, %v357_v36 }
 0x27d   :  { %v368_v42 = vsub.f32 %v324_v15, %v364_v37  ;;  %371 = vst.msk [vmem:[%s592_s5 + $0x10] sm:$0xff] %vm59_vm0, %v367_v38  ;;  %v362_v43 = vmul.f32 0.33333334, %v358_v40  ;;  %v365_v44 = vsub.f32 %v321_v10, %v361_v41 }
 0x27f   :  { %372 = vst.msk [vmem:[%s592_s5 + $0x18] sm:$0xff] %vm59_vm0, %v368_v42  ;;  %v366_v45 = vsub.f32 %v322_v21, %v362_v43  ;;  %369 = vst.msk [vmem:[%s592_s5] sm:$0xff] %vm59_vm0, %v365_v44 }
 0x281   :  { %370 = vst.msk [vmem:[%s592_s5 + $0x8] sm:$0xff] %vm59_vm0, %v366_v45 }

// kernel: model_forward.14
= control target key start
LH: loop header
LB: loop body
LE: loop exit
PB: predicated region body
PF: predicated region fallthrough
CT: control target
= control target key end

     0   :  { %vm65_vm0 = vcmask 261120   ;;  %vm129_vm1 = vcmask 1040384   ;;  %vm142_vm2 = vcmask 1046528   ;;  %vm271_vm3 = vcmask 523264   ;;  %s731_s2 = inlined_call_operand.vmem [shape: bf16[32,32], index: 2, kind: input, shape index: {}]   ;;  %s732_s1 = inlined_call_operand.vmem [shape: f32[2,16,32], index: 1, kind: input, shape index: {}]   ;;  %s733_s3 = inlined_call_operand.vmem [shape: bf16[32,64], index: 3, kind: input, shape index: {}]   ;;  %s734_s4 = inlined_call_operand.vmem [shape: bf16[64,32], index: 4, kind: input, shape index: {}]   ;;  %s735_s0 = inlined_call_operand.vmem [shape: f32[2,16,32], index: 0, kind: input, shape index: {}]   ;;  %s736_s5 = inlined_call_operand.vmem [shape: f32[1,32], index: 5, kind: input, shape index: {}]   ;;  %s737_s6 = inlined_call_operand.vmem [shape: f32[1,32], index: 6, kind: input, shape index: {}]   ;;  %s738_s7 = inlined_call_operand.vmem [shape: f32[2,16,32], index: 7, kind: output, shape index: {}]  }
   0x1   :  { %v541_v0 = vld [vmem:[%s731_s2 + $0x8] sm:$0xff]   ;;  %v542_v1 = vld [vmem:[%s731_s2] sm:$0xff]   ;;  %v33_v5 = vld [vmem:[%s732_s1 + $0x10] sm:$0xff] }
   0x2   :  { %513 = vmatprep.subr.bf16.mxu1 %v541_v0  ;;  %v31_v2 = vld [vmem:[%s732_s1] sm:$0xff]  ;;  %v32_v3 = vld [vmem:[%s732_s1 + $0x8] sm:$0xff]  ;;  %v34_v6 = vld [vmem:[%s732_s1 + $0x18] sm:$0xff] }
   0x3   :  { %514 = vmatpush3.bf16.msra.mxu1 %v541_v0  ;;  %v51_v4 = vpack.c.bf16 %v32_v3, %v31_v2  ;;  %v52_v7 = vpack.c.bf16 %v34_v6, %v33_v5  ;;  %v543_v8 = vld [vmem:[%s733_s3 + $0x8] sm:$0xff]   ;;  %v544_v9 = vld [vmem:[%s733_s3] sm:$0xff]   ;;  %v545_v10 = vld [vmem:[%s734_s4 + $0x18] sm:$0xff]  }
   0x4   :  { %515 = vmatprep.subr.bf16.mxu1 %v542_v1  ;;  %529 = vmatprep.subr.bf16.mxu0 %v545_v10  ;;  %v29_v11 = vld [vmem:[%s735_s0 + $0x10] sm:$0xff]  ;;  %v27_v13 = vld [vmem:[%s735_s0] sm:$0xff]  ;;  %v30_v16 = vld [vmem:[%s735_s0 + $0x18] sm:$0xff] }
   0x5   :  { %517 = vmatprep.mubr.msk.bf16.mxu1 %vm65_vm0, %v51_v4  ;;  %530 = vmatpush3.bf16.msra.mxu0 %v545_v10  ;;  %v28_v20 = vld [vmem:[%s735_s0 + $0x8] sm:$0xff]  ;;  %v546_v57 = vld [vmem:[%s734_s4 + $0x10] sm:$0xff]   ;;  %v548_v59 = vld [vmem:[%s734_s4] sm:$0xff]  }
   0x6   :  { %531 = vmatprep.subr.bf16.mxu0 %v546_v57  ;;  %v547_v58 = vld [vmem:[%s734_s4 + $0x8] sm:$0xff]  }
   0x7   :  { %516 = vmatpush3.bf16.msra.mxu1 %v542_v1 }
   0x8   :  { %521 = vmatprep.subr.bf16.mxu1 %v543_v8 }
   0x9   :  { %532 = vmatpush3.bf16.msra.mxu0 %v546_v57 }
   0xa   :  { %518 = vmatmul.mubr.msk.bf16.vlgmr.msra.gmra.mxu1 %vm65_vm0, %v52_v7  ;;  %533 = vmatprep.subr.bf16.mxu0 %v547_v58 }
   0xb   :  { %522 = vmatpush3.bf16.msra.mxu1 %v543_v8 }
   0xc   :  { %523 = vmatprep.subr.bf16.mxu1 %v544_v9 }
   0xd   :  { %534 = vmatpush3.bf16.msra.mxu0 %v547_v58 }
   0xe   :  { %535 = vmatprep.subr.bf16.mxu0 %v548_v59 }
   0xf   :  { %524 = vmatpush3.bf16.msra.mxu1 %v544_v9 }
  0x11   :  { %536 = vmatpush3.bf16.msra.mxu0 %v548_v59 }
  0xca   :  { %v519_v12 = vpop.f32.mrf.mxu1 }
  0xcb   :  { %v632_v14 = vadd.f32 %v519_v12, %v29_v11 }
  0xcc   :  { %v106_v15 = vpop.f32.mrf.mxu1 }
  0xcd   :  { %v133_v17 = vrot.slane %v632_v14, 7  ;;  %v638_v18 = vadd.f32 %v106_v15, %v27_v13  ;;  %v146_v24 = vrot.slane %v632_v14, 1 }
  0xce   :  { %v520_v19 = vpop.f32.mrf.mxu1 }
  0xcf   :  { %v141_v21 = vsel %vm129_vm1, %v632_v14, %v133_v17  ;;  %v130_v22 = vrot.slane %v638_v18, 7  ;;  %v646_v23 = vadd.f32 %v520_v19, %v30_v16  ;;  %v143_v30 = vrot.slane %v638_v18, 1 }
  0xd0   :  { %v109_v25 = vpop.f32.mrf.mxu1  ;;  %v157_v31 = vadd.f32 %v141_v21, %v632_v14 }
  0xd1   :  { %v134_v26 = vrot.slane %v646_v23, 7  ;;  %v147_v27 = vrot.slane %v646_v23, 1  ;;  %v651_v28 = vadd.f32 %v109_v25, %v28_v20  ;;  %v140_v29 = vsel %vm129_vm1, %v638_v18, %v130_v22 }
  0xd2   :  { %v155_v36 = vadd.f32 %v140_v29, %v638_v18 }
  0xd3   :  { %v131_v32 = vrot.slane %v651_v28, 7  ;;  %v144_v33 = vrot.slane %v651_v28, 1  ;;  %v135_v34 = vsel %vm129_vm1, %v133_v17, %v134_v26  ;;  %v148_v35 = vsel %vm142_vm2, %v146_v24, %v147_v27 }
  0xd4   :  { %v158_v37 = vadd.f32 %v135_v34, %v646_v23  ;;  %v154_v40 = vsel %vm142_vm2, %v147_v27, %v646_v23  ;;  %v161_v41 = vadd.f32 %v157_v31, %v148_v35 }
  0xd5   :  { %v132_v38 = vsel %vm129_vm1, %v130_v22, %v131_v32  ;;  %v145_v39 = vsel %vm142_vm2, %v143_v30, %v144_v33  ;;  %v153_v45 = vsel %vm142_vm2, %v144_v33, %v651_v28 }
  0xd6   :  { %v156_v42 = vadd.f32 %v132_v38, %v651_v28  ;;  %v159_v43 = vadd.f32 %v155_v36, %v145_v39  ;;  %v162_v44 = vadd.f32 %v158_v37, %v154_v40  ;;  %v166_v49 = vmul.f32 0.33333334, %v161_v41 }
  0xd8   :  { %v160_v46 = vadd.f32 %v156_v42, %v153_v45  ;;  %v164_v47 = vmul.f32 0.33333334, %v159_v43  ;;  %v167_v48 = vmul.f32 0.33333334, %v162_v44  ;;  %v170_v54 = vsub.f32 %v632_v14, %v166_v49 }
  0xda   :  { %v165_v50 = vmul.f32 0.33333334, %v160_v46  ;;  %v171_v51 = vsub.f32 %v646_v23, %v167_v48  ;;  %v168_v52 = vsub.f32 %v638_v18, %v164_v47 }
  0xdc   :  { %v169_v53 = vsub.f32 %v651_v28, %v165_v50  ;;  %v173_v56 = vpack.c.bf16 %v171_v51, %v170_v54 }
  0xde   :  { %v172_v55 = vpack.c.bf16 %v169_v53, %v168_v52 }
  0xe0   :  { %525 = vmatprep.mubr.msk.bf16.mxu1 %vm65_vm0, %v172_v55 }
  0xe1   :  { %526 = vmatmul.mubr.msk.bf16.vlgmr.msra.gmra.mxu1 %vm65_vm0, %v173_v56 }
 0x1a1   :  { %v527_v60 = vpop.f32.mrf.mxu1 }
 0x1a2   :  { %v243_v3 = vmax.f32 %v527_v60, 0.0 }
 0x1a3   :  { %v226_v61 = vpop.f32.mrf.mxu1 }
 0x1a4   :  { %v241_v1 = vmax.f32 %v226_v61, 0.0 }
 0x1a5   :  { %v528_v62 = vpop.f32.mrf.mxu1 }
 0x1a6   :  { %v244_v63 = vmax.f32 %v528_v62, 0.0 }
 0x1a7   :  { %v229_v0 = vpop.f32.mrf.mxu1 }
 0x1a8   :  { %v242_v2 = vmax.f32 %v229_v0, 0.0  ;;  %v246_v5 = vpack.c.bf16 %v244_v63, %v243_v3 }
 0x1aa   :  { %v245_v4 = vpack.c.bf16 %v242_v2, %v241_v1 }
 0x1ac   :  { %537 = vmatprep.mubr.msk.bf16.mxu0 %vm271_vm3, %v245_v4 }
 0x1ad   :  { %538 = vmatmul.mubr.msk.bf16.vlgmr.msra.gmra.mxu0 %vm271_vm3, %v246_v5 }
 0x26d   :  { %v539_v6 = vpop.f32.mrf.mxu0 }
 0x26e   :  { %v329_v7 = vadd.f32 %v539_v6, %v632_v14 }
 0x26f   :  { %v312_v8 = vpop.f32.mrf.mxu0 }
 0x270   :  { %v327_v9 = vadd.f32 %v312_v8, %v638_v18  ;;  %v338_v10 = vrot.slane %v329_v7, 7  ;;  %v350_v17 = vrot.slane %v329_v7, 1 }
 0x271   :  { %v540_v11 = vpop.f32.mrf.mxu0 }
 0x272   :  { %v330_v12 = vadd.f32 %v540_v11, %v646_v23  ;;  %v346_v13 = vsel %vm129_vm1, %v329_v7, %v338_v10  ;;  %v335_v15 = vrot.slane %v327_v9, 7  ;;  %v347_v25 = vrot.slane %v327_v9, 1 }
 0x273   :  { %v315_v16 = vpop.f32.mrf.mxu0  ;;  %v361_v24 = vadd.f32 %v346_v13, %v329_v7 }
 0x274   :  { %v328_v19 = vadd.f32 %v315_v16, %v651_v28  ;;  %v351_v20 = vrot.slane %v330_v12, 1  ;;  %v345_v21 = vsel %vm129_vm1, %v327_v9, %v335_v15  ;;  %v339_v22 = vrot.slane %v330_v12, 7 }
 0x275   :  { %v359_v23 = vadd.f32 %v345_v21, %v327_v9  ;;  %v497_v21 = vld [vmem:[%s736_s5] ss:$0 sm:$0xff] }
 0x276   :  { %v352_v14 = vsel %vm142_vm2, %v350_v17, %v351_v20  ;;  %v348_v18 = vrot.slane %v328_v19, 1  ;;  %v340_v26 = vsel %vm129_vm1, %v338_v10, %v339_v22  ;;  %v336_v30 = vrot.slane %v328_v19, 7 }
 0x277   :  { %v365_v27 = vadd.f32 %v361_v24, %v352_v14  ;;  %v362_v29 = vadd.f32 %v340_v26, %v330_v12  ;;  %v358_v32 = vsel %vm142_vm2, %v351_v20, %v330_v12 }
 0x278   :  { %v349_v31 = vsel %vm142_vm2, %v347_v25, %v348_v18  ;;  %v337_v35 = vsel %vm129_vm1, %v335_v15, %v336_v30  ;;  %v357_v40 = vsel %vm142_vm2, %v348_v18, %v328_v19  ;;  %v498_v25 = vld [vmem:[%s737_s6] ss:$0 sm:$0xff] }
 0x279   :  { %v369_v28 = vmul.f32 0.33333334, %v365_v27  ;;  %v363_v33 = vadd.f32 %v359_v23, %v349_v31  ;;  %v366_v34 = vadd.f32 %v362_v29, %v358_v32  ;;  %v360_v36 = vadd.f32 %v337_v35, %v328_v19 }
 0x27b   :  { %v373_v37 = vsub.f32 %v329_v7, %v369_v28  ;;  %v367_v38 = vmul.f32 0.33333334, %v363_v33  ;;  %v370_v39 = vmul.f32 0.33333334, %v366_v34  ;;  %v364_v41 = vadd.f32 %v360_v36, %v357_v40 }
 0x27d   :  { %v383_v42 = vsel %vm65_vm0, %v373_v37, 0.0  ;;  %v371_v43 = vsub.f32 %v327_v9, %v367_v38  ;;  %v374_v44 = vsub.f32 %v330_v12, %v370_v39  ;;  %v368_v45 = vmul.f32 0.33333334, %v364_v41 }
 0x27e   :  { %384 = vadd.xlane.f32.xlu1 %v383_v42 }
 0x27f   :  { %v377_v46 = vsel %vm65_vm0, %v371_v43, 0.0  ;;  %v372_v47 = vsub.f32 %v328_v19, %v368_v45  ;;  %v386_v48 = vsel %vm65_vm0, %v374_v44, 0.0 }
 0x280   :  { %378 = vadd.xlane.f32.xlu0 %v377_v46 }
 0x281   :  { %v380_v49 = vsel %vm65_vm0, %v372_v47, 0.0 }
 0x282   :  { %387 = vadd.xlane.f32.xlu1 %v386_v48 }
 0x284   :  { %381 = vadd.xlane.f32.xlu0 %v380_v49 }
 0x307   :  { %v385_v50 = vpop.xlane.xlu1 %384 }
 0x308   :  { %v392_v51 = vmul.f32 0.03125, %v385_v50 }
 0x309   :  { %v379_v52 = vpop.xlane.xlu0 %378 }
 0x30a   :  { %v390_v53 = vmul.f32 0.03125, %v379_v52  ;;  %v396_v55 = vsub.f32 %v373_v37, %v392_v51 }
 0x30b   :  { %v388_v54 = vpop.xlane.xlu1 %387 }
 0x30c   :  { %v394_v56 = vsub.f32 %v371_v43, %v390_v53  ;;  %v393_v57 = vmul.f32 0.03125, %v388_v54  ;;  %v400_v0 = vmul.f32 %v396_v55, %v396_v55 }
 0x30d   :  { %v382_v58 = vpop.xlane.xlu0 %381 }
 0x30e   :  { %v391_v59 = vmul.f32 0.03125, %v382_v58  ;;  %v398_v60 = vmul.f32 %v394_v56, %v394_v56  ;;  %v397_v61 = vsub.f32 %v374_v44, %v393_v57  ;;  %v408_v2 = vsel %vm65_vm0, %v400_v0, 0.0 }
 0x310   :  { %v395_v62 = vsub.f32 %v372_v47, %v391_v59  ;;  %v402_v63 = vsel %vm65_vm0, %v398_v60, 0.0  ;;  %v401_v4 = vmul.f32 %v397_v61, %v397_v61 }
 0x311   :  { %403 = vadd.xlane.f32.xlu0 %v402_v63 }
 0x312   :  { %v399_v1 = vmul.f32 %v395_v62, %v395_v62  ;;  %v411_v5 = vsel %vm65_vm0, %v401_v4, 0.0 }
 0x314   :  { %v405_v3 = vsel %vm65_vm0, %v399_v1, 0.0 }
 0x315   :  { %409 = vadd.xlane.f32.xlu0 %v408_v2  ;;  %406 = vadd.xlane.f32.xlu1 %v405_v3 }
 0x319   :  { %412 = vadd.xlane.f32.xlu1 %v411_v5 }
 0x39a   :  { %v404_v6 = vpop.xlane.xlu0 %403 }
 0x39b   :  { %v414_v7 = vmul.f32 0.03125, %v404_v6 }
 0x39d   :  { %v418_v8 = vadd.f32 1e-05, %v414_v7 }
 0x39e   :  { %v407_v9 = vpop.xlane.xlu1 %406  ;;  %v410_v10 = vpop.xlane.xlu0 %409 }
 0x39f   :  { %549 = vrsqrt.f32 %v418_v8  ;;  %v415_v11 = vmul.f32 0.03125, %v407_v9  ;;  %v416_v12 = vmul.f32 0.03125, %v410_v10 }
 0x3a1   :  { %v419_v13 = vadd.f32 1e-05, %v415_v11  ;;  %v420_v15 = vadd.f32 1e-05, %v416_v12 }
 0x3a2   :  { %v413_v16 = vpop.xlane.xlu1 %412 }
 0x3a3   :  { %551 = vrsqrt.f32 %v419_v13  ;;  %v417_v17 = vmul.f32 0.03125, %v413_v16 }
 0x3a4   :  { %553 = vrsqrt.f32 %v420_v15 }
 0x3a5   :  { %v421_v19 = vadd.f32 1e-05, %v417_v17 }
 0x3a7   :  { %555 = vrsqrt.f32 %v421_v19 }
 0x3ac   :  { %v550_v20 = vpop.eup %549 }
 0x3ad   :  { %v426_v22 = vmul.f32 %v550_v20, %v394_v56 }
 0x3af   :  { %v436_v24 = vmul.f32 %v497_v21, %v426_v22 }
 0x3b0   :  { %v552_v14 = vpop.eup %551 }
 0x3b1   :  { %v554_v18 = vpop.eup %553  ;;  %v427_v26 = vmul.f32 %v552_v14, %v395_v62  ;;  %v446_v23 = vadd.f32 %v498_v25, %v436_v24 }
 0x3b2   :  { %v428_v27 = vmul.f32 %v554_v18, %v396_v55 }
 0x3b3   :  { %v437_v29 = vmul.f32 %v497_v21, %v427_v26  ;;  %v450_v33 = vsel %vm65_vm0, %v446_v23, 0.0 }
 0x3b4   :  { %v556_v30 = vpop.eup %555  ;;  %v438_v31 = vmul.f32 %v497_v21, %v428_v27 }
 0x3b5   :  { %v447_v32 = vadd.f32 %v498_v25, %v437_v29  ;;  %v429_v28 = vmul.f32 %v556_v30, %v397_v61 }
 0x3b6   :  { %v448_v35 = vadd.f32 %v498_v25, %v438_v31 }
 0x3b7   :  { %v451_v34 = vsel %vm65_vm0, %v447_v32, 0.0  ;;  %v439_v36 = vmul.f32 %v497_v21, %v429_v28 }
 0x3b8   :  { %v452_v37 = vadd.f32 %v451_v34, %v450_v33  ;;  %v459_v40 = vsel %vm65_vm0, %v448_v35, 0.0 }
 0x3b9   :  { %v449_v38 = vadd.f32 %v498_v25, %v439_v36 }
 0x3ba   :  { %v453_v39 = vrot.slane %v452_v37, 4 }
 0x3bb   :  { %v460_v41 = vsel %vm65_vm0, %v449_v38, 0.0 }
 0x3bc   :  { %v454_v42 = vadd.f32 %v453_v39, %v452_v37  ;;  %v461_v43 = vadd.f32 %v460_v41, %v459_v40 }
 0x3be   :  { %v455_v44 = vrot.slane %v454_v42, 2  ;;  %v462_v45 = vrot.slane %v461_v43, 4 }
 0x3c0   :  { %v456_v46 = vadd.f32 %v455_v44, %v454_v42  ;;  %v463_v47 = vadd.f32 %v462_v45, %v461_v43 }
 0x3c2   :  { %v457_v48 = vrot.slane %v456_v46, 1  ;;  %v464_v49 = vrot.slane %v463_v47, 2 }
 0x3c4   :  { %v458_v50 = vadd.f32 %v457_v48, %v456_v46  ;;  %v465_v51 = vadd.f32 %v464_v49, %v463_v47 }
 0x3c6   :  { %v469_v52 = vmul.f32 0.0625, %v458_v50  ;;  %v466_v53 = vrot.slane %v465_v51, 1 }
 0x3c8   :  { %v471_v54 = vsub.f32 %v446_v23, %v469_v52  ;;  %v472_v55 = vsub.f32 %v447_v32, %v469_v52  ;;  %v467_v56 = vadd.f32 %v466_v53, %v465_v51 }
 0x3ca   :  { %475 = vst.msk [vmem:[%s738_s7] sm:$0xff] %vm65_vm0, %v471_v54  ;;  %476 = vst.msk [vmem:[%s738_s7 + $0x8] sm:$0xff] %vm65_vm0, %v472_v55  ;;  %v470_v57 = vmul.f32 0.0625, %v467_v56 }
 0x3cc   :  { %v473_v58 = vsub.f32 %v448_v35, %v470_v57  ;;  %v474_v59 = vsub.f32 %v449_v38, %v470_v57 }
 0x3ce   :  { %477 = vst.msk [vmem:[%s738_s7 + $0x10] sm:$0xff] %vm65_vm0, %v473_v58  ;;  %478 = vst.msk [vmem:[%s738_s7 + $0x18] sm:$0xff] %vm65_vm0, %v474_v59 }

// kernel: model_forward.10
= control target key start
LH: loop header
LB: loop body
LE: loop exit
PB: predicated region body
PF: predicated region fallthrough
CT: control target
= control target key end

     0   :  { %v149_v0 = vmov 0.0   ;;  %vm150_vm0 = vmmov 0   ;;  %vm37_vm1 = vcmask 261120   ;;  %vm104_vm2 = vcmask 785408   ;;  %s217_s1 = inlined_call_operand.vmem [shape: bf16[32,96], index: 1, kind: input, shape index: {}]   ;;  %s218_s0 = inlined_call_operand.vmem [shape: f32[48,32], index: 0, kind: input, shape index: {}]   ;;  %s219_s2 = inlined_call_operand.vmem [shape: f32[48,96], index: 2, kind: output, shape index: {}]  }
   0x1   :  { %141 = vmatprep.subr.bf16.mxu1 %v149_v0  ;;  %v147_v1 = vld [vmem:[%s217_s1 + $0x8] sm:$0xff]   ;;  %125 = vmatprep.subr.bf16.mxu0 %v149_v0  ;;  %v148_v2 = vld [vmem:[%s217_s1] sm:$0xff]   ;;  %v14_v3 = vld [vmem:[%s218_s0 + $0x10] sm:$0xff] }
   0x2   :  { %133 = vmatprep.mubr.msk.bf16.mxu1 %vm150_vm0, %v149_v0  ;;  %129 = vmatprep.mubr.msk.bf16.mxu0 %vm150_vm0, %v149_v0  ;;  %v15_v4 = vld [vmem:[%s218_s0 + $0x18] sm:$0xff]  ;;  %v12_v5 = vld [vmem:[%s218_s0] sm:$0xff]  ;;  %v13_v6 = vld [vmem:[%s218_s0 + $0x8] sm:$0xff] }
   0x3   :  { %143 = vmatpush3.bf16.msra.mxu1 %v147_v1  ;;  %126 = vmatpush3.bf16.msra.mxu0 %v147_v1  ;;  %v19_v7 = vpack.c.bf16 %v15_v4, %v14_v3  ;;  %v18_v8 = vpack.c.bf16 %v13_v6, %v12_v5  ;;  %v16_v9 = vld [vmem:[%s218_s0 + $0x20] sm:$0xff]  ;;  %v17_v10 = vld [vmem:[%s218_s0 + $0x28] sm:$0xff] }
   0x4   :  { %142 = vmatprep.subr.bf16.mxu1 %v149_v0  ;;  %127 = vmatprep.subr.bf16.mxu0 %v149_v0  ;;  %v20_v11 = vpack.c.bf16 %v17_v10, %v16_v9 }
   0x7   :  { %144 = vmatpush3.bf16.msra.mxu1 %v148_v2  ;;  %128 = vmatpush3.bf16.msra.mxu0 %v148_v2 }
   0xa   :  { %134 = vmatmul.mubr.msk.bf16.vlgmr.msra.gmra.mxu1 %vm37_vm1, %v19_v7  ;;  %130 = vmatmul.mubr.msk.bf16.vlgmr.msra.gmra.mxu0 %vm37_vm1, %v18_v8 }
   0xb   :  { %137 = vmatprep.mubr.msk.bf16.mxu1 %vm150_vm0, %v149_v0 }
  0x12   :  { %138 = vmatmul.mubr.msk.bf16.gmra.mxu1 %vm37_vm1, %v20_v11 }
  0xca   :  { %v89_v12 = vpop.f32.mrf.mxu1  ;;  %v81_v13 = vpop.f32.mrf.mxu0 }
  0xcb   :  { %107 = vst.msk [vmem:[%s219_s2 + $0x10] sm:$0xff] %vm104_vm2, %v89_v12  ;;  %105 = vst.msk [vmem:[%s219_s2] sm:$0xff] %vm104_vm2, %v81_v13 }
  0xcc   :  { %v135_v14 = vpop.f32.mrf.mxu1  ;;  %v131_v15 = vpop.f32.mrf.mxu0 }
  0xce   :  { %v92_v16 = vpop.f32.mrf.mxu1  ;;  %v84_v17 = vpop.f32.mrf.mxu0 }
  0xcf   :  { %108 = vst.msk [vmem:[%s219_s2 + $0x18] sm:$0xff] %vm104_vm2, %v92_v16  ;;  %106 = vst.msk [vmem:[%s219_s2 + $0x8] sm:$0xff] %vm104_vm2, %v84_v17 }
  0xd0   :  { %v136_v18 = vpop.f32.mrf.mxu1  ;;  %v132_v19 = vpop.f32.mrf.mxu0 }
  0xd2   :  { %v97_v20 = vpop.f32.mrf.mxu1 }
  0xd3   :  { %109 = vst.msk [vmem:[%s219_s2 + $0x20] sm:$0xff] %vm104_vm2, %v97_v20 }
  0xd4   :  { %v139_v21 = vpop.f32.mrf.mxu1 }
  0xd6   :  { %v100_v22 = vpop.f32.mrf.mxu1 }
  0xd7   :  { %110 = vst.msk [vmem:[%s219_s2 + $0x28] sm:$0xff] %vm104_vm2, %v100_v22 }
  0xd8   :  { %v140_v23 = vpop.f32.mrf.mxu1 }

// kernel: reverse.9
= control target key start
LH: loop header
LB: loop body
LE: loop exit
PB: predicated region body
PF: predicated region fallthrough
CT: control target
= control target key end

     0   :  { %v2_v0 = vlaneseq  ;;  %s246_s0 = inlined_call_operand.vmem [shape: f32[2,2,16,11], index: 0, kind: input, shape index: {}]   ;;  %s247_s1 = inlined_call_operand.vmem [shape: f32[2,2,16,11], index: 1, kind: output, shape index: {}]  }
   0x1   :  { %v51_v2 = vld [vmem:[%s246_s0 + $0x10] sm:$0xff]  ;;  %v47_v3 = vld [vmem:[%s246_s0] sm:$0xff]  ;;  %v53_v4 = vld [vmem:[%s246_s0 + $0x18] sm:$0xff] }
   0x2   :  { %v3_v1 = vsub.s32 10, %v2_v0  ;;  %v49_v5 = vld [vmem:[%s246_s0 + $0x8] sm:$0xff]  ;;  %v55_v7 = vld [vmem:[%s246_s0 + $0x20] sm:$0xff]  ;;  %v61_v8 = vld [vmem:[%s246_s0 + $0x38] sm:$0xff] }
   0x3   :  { %v57_v6 = vld [vmem:[%s246_s0 + $0x28] sm:$0xff]  ;;  %v59_v9 = vld [vmem:[%s246_s0 + $0x30] sm:$0xff] }
   0x4   :  { %4 = vset.pattern.permute.xlu0 %v3_v1  ;;  %187 = vset.pattern.permute.xlu1 %v3_v1 }
   0x5   :  { %79 = vperm.xlu1 %187, %v51_v2   ;;  %67 = vperm.xlu0 %4, %v47_v3  }
   0x9   :  { %85 = vperm.xlu1 %187, %v53_v4   ;;  %73 = vperm.xlu0 %4, %v49_v5  }
   0xd   :  { %97 = vperm.xlu1 %187, %v57_v6   ;;  %91 = vperm.xlu0 %4, %v55_v7  }
  0x11   :  { %109 = vperm.xlu1 %187, %v61_v8   ;;  %103 = vperm.xlu0 %4, %v59_v9  }
  0x80   :  { %v80_v10 = vpop.permute.xlu1 %79  ;;  %v68_v11 = vpop.permute.xlu0 %67 }
  0x81   :  { %159 = vst [vmem:[%s247_s1 + $0x10] sm:$0xff] %v80_v10  ;;  %155 = vst [vmem:[%s247_s1] sm:$0xff] %v68_v11 }
  0x84   :  { %v86_v12 = vpop.permute.xlu1 %85  ;;  %v74_v13 = vpop.permute.xlu0 %73 }
  0x85   :  { %161 = vst [vmem:[%s247_s1 + $0x18] sm:$0xff] %v86_v12  ;;  %157 = vst [vmem:[%s247_s1 + $0x8] sm:$0xff] %v74_v13 }
  0x88   :  { %v98_v14 = vpop.permute.xlu1 %97  ;;  %v92_v15 = vpop.permute.xlu0 %91 }
  0x89   :  { %165 = vst [vmem:[%s247_s1 + $0x28] sm:$0xff] %v98_v14  ;;  %163 = vst [vmem:[%s247_s1 + $0x20] sm:$0xff] %v92_v15 }
  0x8c   :  { %v110_v16 = vpop.permute.xlu1 %109  ;;  %v104_v17 = vpop.permute.xlu0 %103 }
  0x8d   :  { %169 = vst [vmem:[%s247_s1 + $0x38] sm:$0xff] %v110_v16  ;;  %167 = vst [vmem:[%s247_s1 + $0x30] sm:$0xff] %v104_v17 }

// kernel: model_forward.15
= control target key start
LH: loop header
LB: loop body
LE: loop exit
PB: predicated region body
PF: predicated region fallthrough
CT: control target
= control target key end

     0   :  { %v478_v0 = vmov 0.0   ;;  %vm479_vm0 = vmmov 0   ;;  %vm59_vm1 = vcmask 261120   ;;  %vm138_vm2 = vcmask 1040384   ;;  %s716_s3 = inlined_call_operand.vmem [shape: bf16[32,32], index: 3, kind: input, shape index: {}]   ;;  %s717_s1 = inlined_call_operand.vmem [shape: f32[2,24,32], index: 1, kind: input, shape index: {}]   ;;  %s718_s4 = inlined_call_operand.vmem [shape: bf16[32,32], index: 4, kind: input, shape index: {}]   ;;  %s719_s5 = inlined_call_operand.vmem [shape: bf16[32,64], index: 5, kind: input, shape index: {}]   ;;  %s720_s2 = inlined_call_operand.vmem [shape: f32[2,16,32], index: 2, kind: input, shape index: {}]   ;;  %s721_s0 = inlined_call_operand.vmem [shape: f32[2,24,32], index: 0, kind: input, shape index: {}]   ;;  %s722_s7 = inlined_call_operand.vmem [shape: f32[2,24,32], index: 7, kind: output, shape index: {1}]   ;;  %s723_s6 = inlined_call_operand.vmem [shape: f32[2,24,32], index: 6, kind: output, shape index: {0}]   ;;  %s724_s9 = inlined_call_operand.vmem [shape: f32[2,16,64], index: 9, kind: output, shape index: {3}]   ;;  %s725_s8 = inlined_call_operand.vmem [shape: f32[2,24,32], index: 8, kind: output, shape index: {2}]  }
   0x1   :  { %430 = vmatprep.subr.bf16.mxu0 %v478_v0  ;;  %v472_v1 = vld [vmem:[%s716_s3 + $0x8] sm:$0xff]   ;;  %434 = vmatprep.mubr.msk.bf16.mxu0 %vm479_vm0, %v478_v0  ;;  %v473_v2 = vld [vmem:[%s716_s3] sm:$0xff]   ;;  %v36_v6 = vld [vmem:[%s717_s1 + $0x10] sm:$0xff]  ;;  %vm157_vm3 = vcmask 1046528   ;;  %vm381_vm4 = vcmask 523264  }
   0x2   :  { %446 = vmatprep.subr.bf16.mxu1 %v478_v0  ;;  %450 = vmatprep.mubr.msk.bf16.mxu1 %vm479_vm0, %v478_v0  ;;  %v34_v3 = vld [vmem:[%s717_s1] sm:$0xff]  ;;  %v35_v4 = vld [vmem:[%s717_s1 + $0x8] sm:$0xff]  ;;  %v37_v7 = vld [vmem:[%s717_s1 + $0x18] sm:$0xff] }
   0x3   :  { %431 = vmatpush3.bf16.msra.mxu0 %v472_v1  ;;  %v44_v5 = vpack.c.bf16 %v35_v4, %v34_v3  ;;  %v45_v8 = vpack.c.bf16 %v37_v7, %v36_v6  ;;  %v38_v9 = vld [vmem:[%s717_s1 + $0x20] sm:$0xff]  ;;  %v39_v10 = vld [vmem:[%s717_s1 + $0x28] sm:$0xff]  ;;  %v306_v18 = vld [vmem:[%s720_s2 + $0x10] sm:$0xff] }
   0x4   :  { %432 = vmatprep.subr.bf16.mxu0 %v478_v0  ;;  %v46_v11 = vpack.c.bf16 %v39_v10, %v38_v9  ;;  %v475_v12 = vld [vmem:[%s718_s4 + $0x8] sm:$0xff]   ;;  %v476_v13 = vld [vmem:[%s718_s4] sm:$0xff]   ;;  %v307_v19 = vld [vmem:[%s720_s2 + $0x18] sm:$0xff] }
   0x5   :  { %447 = vmatpush3.bf16.msra.mxu1 %v475_v12  ;;  %v474_v14 = vld [vmem:[%s719_s5 + $0x8] sm:$0xff]   ;;  %v477_v15 = vld [vmem:[%s719_s5] sm:$0xff]   ;;  %v313_v21 = vpack.c.bf16 %v307_v19, %v306_v18  ;;  %v30_v32 = vld [vmem:[%s721_s0 + $0x10] sm:$0xff] }
   0x6   :  { %448 = vmatprep.subr.bf16.mxu1 %v478_v0  ;;  %v304_v16 = vld [vmem:[%s720_s2] sm:$0xff]  ;;  %v305_v17 = vld [vmem:[%s720_s2 + $0x8] sm:$0xff]  ;;  %v31_v42 = vld [vmem:[%s721_s0 + $0x18] sm:$0xff] }
   0x7   :  { %433 = vmatpush3.bf16.msra.mxu0 %v473_v2  ;;  %v312_v20 = vpack.c.bf16 %v305_v17, %v304_v16  ;;  %v28_v22 = vld [vmem:[%s721_s0] sm:$0xff]  ;;  %v29_v26 = vld [vmem:[%s721_s0 + $0x8] sm:$0xff] }
   0x8   :  { %462 = vmatprep.subr.bf16.mxu0 %v474_v14  ;;  %v32_v54 = vld [vmem:[%s721_s0 + $0x20] sm:$0xff]  ;;  %v33_v2 = vld [vmem:[%s721_s0 + $0x28] sm:$0xff] }
   0x9   :  { %449 = vmatpush3.bf16.msra.mxu1 %v476_v13 }
   0xa   :  { %435 = vmatmul.mubr.msk.bf16.vlgmr.msra.gmra.mxu0 %vm59_vm1, %v44_v5 }
   0xb   :  { %438 = vmatprep.mubr.msk.bf16.mxu0 %vm479_vm0, %v478_v0  ;;  %463 = vmatpush3.bf16.msra.mxu0 %v474_v14 }
   0xc   :  { %464 = vmatprep.subr.bf16.mxu0 %v477_v15 }
   0xf   :  { %465 = vmatpush3.bf16.msra.mxu0 %v477_v15 }
  0x12   :  { %439 = vmatmul.mubr.msk.bf16.gmra.mxu0 %vm59_vm1, %v45_v8 }
  0x13   :  { %442 = vmatprep.mubr.msk.bf16.mxu0 %vm479_vm0, %v478_v0 }
  0x1a   :  { %443 = vmatmul.mubr.msk.bf16.gmra.mxu0 %vm59_vm1, %v46_v11 }
  0x1b   :  { %466 = vmatprep.mubr.msk.bf16.mxu0 %vm59_vm1, %v312_v20 }
  0x22   :  { %467 = vmatmul.mubr.msk.bf16.vlgmr.msra.gmra.mxu0 %vm59_vm1, %v313_v21 }
  0xca   :  { %v103_v23 = vpop.f32.mrf.mxu0 }
  0xcb   :  { %v126_v24 = vadd.f32 %v103_v23, %v28_v22 }
  0xcc   :  { %v436_v25 = vpop.f32.mrf.mxu0 }
  0xcd   :  { %v139_v27 = vrot.slane %v126_v24, 7  ;;  %v158_v33 = vrot.slane %v126_v24, 1 }
  0xce   :  { %v106_v28 = vpop.f32.mrf.mxu0 }
  0xcf   :  { %v155_v29 = vsel %vm138_vm2, %v126_v24, %v139_v27  ;;  %v127_v30 = vadd.f32 %v106_v28, %v29_v26 }
  0xd0   :  { %v437_v31 = vpop.f32.mrf.mxu0  ;;  %v176_v36 = vadd.f32 %v155_v29, %v126_v24 }
  0xd1   :  { %v140_v34 = vrot.slane %v127_v30, 7  ;;  %v159_v35 = vrot.slane %v127_v30, 1 }
  0xd2   :  { %v111_v37 = vpop.f32.mrf.mxu0 }
  0xd3   :  { %v141_v38 = vsel %vm138_vm2, %v139_v27, %v140_v34  ;;  %v128_v39 = vadd.f32 %v111_v37, %v30_v32  ;;  %v160_v40 = vsel %vm157_vm3, %v158_v33, %v159_v35 }
  0xd4   :  { %v440_v41 = vpop.f32.mrf.mxu0  ;;  %v182_v43 = vadd.f32 %v176_v36, %v160_v40  ;;  %v177_v46 = vadd.f32 %v141_v38, %v127_v30 }
  0xd5   :  { %v142_v44 = vrot.slane %v128_v39, 7  ;;  %v161_v45 = vrot.slane %v128_v39, 1 }
  0xd6   :  { %v114_v47 = vpop.f32.mrf.mxu0  ;;  %v189_v48 = vmul.f32 0.33333334, %v182_v43 }
  0xd7   :  { %v143_v49 = vsel %vm138_vm2, %v140_v34, %v142_v44  ;;  %v129_v50 = vadd.f32 %v114_v47, %v31_v42  ;;  %v162_v51 = vsel %vm157_vm3, %v159_v35, %v161_v45  ;;  %v174_v58 = vsel %vm157_vm3, %v161_v45, %v128_v39 }
  0xd8   :  { %v178_v52 = vadd.f32 %v143_v49, %v128_v39  ;;  %v441_v53 = vpop.f32.mrf.mxu0  ;;  %v183_v55 = vadd.f32 %v177_v46, %v162_v51  ;;  %v195_v56 = vsub.f32 %v126_v24, %v189_v48  ;;  %207 = vst.msk [vmem:[%s722_s7] sm:$0xff] %vm59_vm1, %v189_v48 }
  0xd9   :  { %v144_v57 = vrot.slane %v129_v50, 7  ;;  %v163_v5 = vrot.slane %v129_v50, 1 }
  0xda   :  { %v119_v59 = vpop.f32.mrf.mxu0  ;;  %v190_v60 = vmul.f32 0.33333334, %v183_v55  ;;  %201 = vst.msk [vmem:[%s723_s6] sm:$0xff] %vm59_vm1, %v195_v56  ;;  %v184_v61 = vadd.f32 %v178_v52, %v174_v58 }
  0xdb   :  { %v156_v62 = vsel %vm138_vm2, %v129_v50, %v144_v57  ;;  %v130_v63 = vadd.f32 %v119_v59, %v32_v54 }
  0xdc   :  { %v444_v1 = vpop.f32.mrf.mxu0  ;;  %v196_v3 = vsub.f32 %v127_v30, %v190_v60  ;;  %208 = vst.msk [vmem:[%s722_s7 + $0x8] sm:$0xff] %vm59_vm1, %v190_v60  ;;  %v191_v4 = vmul.f32 0.33333334, %v184_v61  ;;  %v179_v8 = vadd.f32 %v156_v62, %v129_v50 }
  0xdd   :  { %v145_v6 = vrot.slane %v130_v63, 7  ;;  %v164_v7 = vrot.slane %v130_v63, 1 }
  0xde   :  { %v122_v9 = vpop.f32.mrf.mxu0  ;;  %202 = vst.msk [vmem:[%s723_s6 + $0x8] sm:$0xff] %vm59_vm1, %v196_v3  ;;  %v217_v10 = vpack.c.bf16 %v196_v3, %v195_v56  ;;  %v197_v11 = vsub.f32 %v128_v39, %v191_v4  ;;  %209 = vst.msk [vmem:[%s722_s7 + $0x10] sm:$0xff] %vm59_vm1, %v191_v4 }
  0xdf   :  { %v146_v12 = vsel %vm138_vm2, %v144_v57, %v145_v6  ;;  %v131_v13 = vadd.f32 %v122_v9, %v33_v2  ;;  %v165_v14 = vsel %vm157_vm3, %v163_v5, %v164_v7 }
  0xe0   :  { %v445_v15 = vpop.f32.mrf.mxu0  ;;  %451 = vmatmul.mubr.msk.bf16.vlgmr.msra.gmra.mxu1 %vm59_vm1, %v217_v10  ;;  %v185_v16 = vadd.f32 %v179_v8, %v165_v14  ;;  %203 = vst.msk [vmem:[%s723_s6 + $0x10] sm:$0xff] %vm59_vm1, %v197_v11  ;;  %v180_v19 = vadd.f32 %v146_v12, %v130_v63 }
  0xe1   :  { %v147_v17 = vrot.slane %v131_v13, 7  ;;  %v166_v18 = vrot.slane %v131_v13, 1  ;;  %454 = vmatprep.mubr.msk.bf16.mxu1 %vm479_vm0, %v478_v0 }
  0xe2   :  { %v192_v20 = vmul.f32 0.33333334, %v185_v16 }
  0xe3   :  { %v148_v21 = vsel %vm138_vm2, %v145_v6, %v147_v17  ;;  %v167_v22 = vsel %vm157_vm3, %v164_v7, %v166_v18  ;;  %v175_v26 = vsel %vm157_vm3, %v166_v18, %v131_v13 }
  0xe4   :  { %v181_v23 = vadd.f32 %v148_v21, %v131_v13  ;;  %v198_v24 = vsub.f32 %v129_v50, %v192_v20  ;;  %210 = vst.msk [vmem:[%s722_s7 + $0x18] sm:$0xff] %vm59_vm1, %v192_v20  ;;  %v186_v25 = vadd.f32 %v180_v19, %v167_v22 }
  0xe6   :  { %204 = vst.msk [vmem:[%s723_s6 + $0x18] sm:$0xff] %vm59_vm1, %v198_v24  ;;  %v218_v27 = vpack.c.bf16 %v198_v24, %v197_v11  ;;  %v187_v28 = vadd.f32 %v181_v23, %v175_v26  ;;  %v193_v29 = vmul.f32 0.33333334, %v186_v25 }
  0xe8   :  { %455 = vmatmul.mubr.msk.bf16.gmra.mxu1 %vm59_vm1, %v218_v27  ;;  %v194_v30 = vmul.f32 0.33333334, %v187_v28  ;;  %v199_v31 = vsub.f32 %v130_v63, %v193_v29  ;;  %211 = vst.msk [vmem:[%s722_s7 + $0x20] sm:$0xff] %vm59_vm1, %v193_v29 }
  0xe9   :  { %458 = vmatprep.mubr.msk.bf16.mxu1 %vm479_vm0, %v478_v0  ;;  %v468_v0 = vpop.f32.mrf.mxu0 }
  0xea   :  { %v200_v32 = vsub.f32 %v131_v13, %v194_v30  ;;  %205 = vst.msk [vmem:[%s723_s6 + $0x20] sm:$0xff] %vm59_vm1, %v199_v31  ;;  %212 = vst.msk [vmem:[%s722_s7 + $0x28] sm:$0xff] %vm59_vm1, %v194_v30 }
  0xeb   :  { %384 = vst.msk [vmem:[%s724_s9 + $0x10] sm:$0xff] %vm381_vm4, %v468_v0  ;;  %v366_v34 = vpop.f32.mrf.mxu0 }
  0xec   :  { %206 = vst.msk [vmem:[%s723_s6 + $0x28] sm:$0xff] %vm59_vm1, %v200_v32  ;;  %v219_v33 = vpack.c.bf16 %v200_v32, %v199_v31 }
  0xed   :  { %382 = vst.msk [vmem:[%s724_s9] sm:$0xff] %vm381_vm4, %v366_v34  ;;  %v469_v35 = vpop.f32.mrf.mxu0 }
  0xee   :  { %385 = vst.msk [vmem:[%s724_s9 + $0x18] sm:$0xff] %vm381_vm4, %v469_v35 }
  0xef   :  { %v369_v36 = vpop.f32.mrf.mxu0 }
  0xf0   :  { %459 = vmatmul.mubr.msk.bf16.gmra.mxu1 %vm59_vm1, %v219_v33  ;;  %383 = vst.msk [vmem:[%s724_s9 + $0x8] sm:$0xff] %vm381_vm4, %v369_v36 }
 0x1a0   :  { %v275_v37 = vpop.f32.mrf.mxu1 }
 0x1a1   :  { %298 = vst.msk [vmem:[%s725_s8] sm:$0xff] %vm59_vm1, %v275_v37 }
 0x1a2   :  { %v452_v38 = vpop.f32.mrf.mxu1 }
 0x1a4   :  { %v278_v39 = vpop.f32.mrf.mxu1 }
 0x1a5   :  { %299 = vst.msk [vmem:[%s725_s8 + $0x8] sm:$0xff] %vm59_vm1, %v278_v39 }
 0x1a6   :  { %v453_v40 = vpop.f32.mrf.mxu1 }
 0x1a8   :  { %v283_v41 = vpop.f32.mrf.mxu1 }
 0x1a9   :  { %300 = vst.msk [vmem:[%s725_s8 + $0x10] sm:$0xff] %vm59_vm1, %v283_v41 }
 0x1aa   :  { %v456_v42 = vpop.f32.mrf.mxu1 }
 0x1ac   :  { %v286_v43 = vpop.f32.mrf.mxu1 }
 0x1ad   :  { %301 = vst.msk [vmem:[%s725_s8 + $0x18] sm:$0xff] %vm59_vm1, %v286_v43 }
 0x1ae   :  { %v457_v44 = vpop.f32.mrf.mxu1 }
 0x1b0   :  { %v291_v45 = vpop.f32.mrf.mxu1 }
 0x1b1   :  { %302 = vst.msk [vmem:[%s725_s8 + $0x20] sm:$0xff] %vm59_vm1, %v291_v45 }
 0x1b2   :  { %v460_v46 = vpop.f32.mrf.mxu1 }
 0x1b4   :  { %v294_v47 = vpop.f32.mrf.mxu1 }
 0x1b5   :  { %303 = vst.msk [vmem:[%s725_s8 + $0x28] sm:$0xff] %vm59_vm1, %v294_v47 }
 0x1b6   :  { %v461_v48 = vpop.f32.mrf.mxu1 }

// kernel: model_forward.16
= control target key start
LH: loop header
LB: loop body
LE: loop exit
PB: predicated region body
PF: predicated region fallthrough
CT: control target
= control target key end

     0   :  { %v758_v0 = vmov 0.0   ;;  %vm759_vm0 = vmmov 0   ;;  %vm60_vm1 = vcmask 261120   ;;  %vm139_vm2 = vcmask 1040384   ;;  %s760_s20 = smov 96   ;;  %s761_s21 = smov 64   ;;  %s1126_s3 = inlined_call_operand.vmem [shape: bf16[32,32], index: 3, kind: input, shape index: {}]   ;;  %s1127_s2 = inlined_call_operand.vmem [shape: f32[2,24,32], index: 2, kind: input, shape index: {}]   ;;  %s1128_s4 = inlined_call_operand.vmem [shape: bf16[32,64], index: 4, kind: input, shape index: {}]   ;;  %s1129_s5 = inlined_call_operand.vmem [shape: bf16[64,32], index: 5, kind: input, shape index: {}]   ;;  %s1130_s0 = inlined_call_operand.vmem [shape: f32[2,24,32], index: 0, kind: input, shape index: {}]   ;;  %s1131_s6 = inlined_call_operand.vmem [shape: f32[1,96], index: 6, kind: input, shape index: {}]   ;;  %s1132_s1 = inlined_call_operand.vmem [shape: f32[2,24,32], index: 1, kind: input, shape index: {}]   ;;  %s1133_s7 = inlined_call_operand.vmem [shape: f32[2,24,32], index: 7, kind: output, shape index: {0}]   ;;  %s1134_s8 = inlined_call_operand.vmem [shape: f32[2,24,1], index: 8, kind: output, shape index: {1}]  }
   0x1   :  { %690 = vmatprep.subr.bf16.mxu0 %v758_v0  ;;  %v750_v1 = vld [vmem:[%s1126_s3 + $0x8] sm:$0xff]   ;;  %742 = vmatprep.subr.bf16.mxu1 %v758_v0  ;;  %v751_v2 = vld [vmem:[%s1126_s3] sm:$0xff]   ;;  %v37_v9 = vld [vmem:[%s1127_s2 + $0x10] sm:$0xff]  ;;  %vm158_vm3 = vcmask 1046528   ;;  %vm328_vm4 = vcmask 523264   ;;  %vm640_vm5 = vcmask 7168  }
   0x2   :  { %694 = vmatprep.mubr.msk.bf16.mxu0 %vm759_vm0, %v758_v0  ;;  %702 = vmatprep.mubr.msk.bf16.mxu1 %vm759_vm0, %v758_v0  ;;  %v35_v3 = vld [vmem:[%s1127_s2] sm:$0xff]  ;;  %v36_v4 = vld [vmem:[%s1127_s2 + $0x8] sm:$0xff]  ;;  %v38_v10 = vld [vmem:[%s1127_s2 + $0x18] sm:$0xff] }
   0x3   :  { %691 = vmatpush3.bf16.msra.mxu0 %v750_v1  ;;  %744 = vmatpush3.bf16.msra.mxu1 %v750_v1  ;;  %v39_v5 = vld [vmem:[%s1127_s2 + $0x20] sm:$0xff]  ;;  %v40_v6 = vld [vmem:[%s1127_s2 + $0x28] sm:$0xff]  ;;  %v45_v7 = vpack.c.bf16 %v36_v4, %v35_v3  ;;  %v46_v11 = vpack.c.bf16 %v38_v10, %v37_v9  ;;  %v754_v14 = vld [vmem:[%s1129_s5 + $0x18] sm:$0xff]  }
   0x4   :  { %692 = vmatprep.subr.bf16.mxu0 %v758_v0  ;;  %743 = vmatprep.subr.bf16.mxu1 %v758_v0  ;;  %v47_v8 = vpack.c.bf16 %v40_v6, %v39_v5  ;;  %v752_v12 = vld [vmem:[%s1128_s4 + $0x8] sm:$0xff]   ;;  %v753_v13 = vld [vmem:[%s1128_s4] sm:$0xff]   ;;  %v755_v15 = vld [vmem:[%s1129_s5 + $0x10] sm:$0xff]  }
   0x5   :  { %v29_v16 = vld [vmem:[%s1130_s0] sm:$0xff]  ;;  %v30_v21 = vld [vmem:[%s1130_s0 + $0x8] sm:$0xff]  ;;  %v31_v29 = vld [vmem:[%s1130_s0 + $0x10] sm:$0xff] }
   0x6   :  { %v33_v32 = vld [vmem:[%s1130_s0 + $0x20] sm:$0xff]  ;;  %v34_v36 = vld [vmem:[%s1130_s0 + $0x28] sm:$0xff]  ;;  %v32_v44 = vld [vmem:[%s1130_s0 + $0x18] sm:$0xff] }
   0x7   :  { %693 = vmatpush3.bf16.msra.mxu0 %v751_v2  ;;  %745 = vmatpush3.bf16.msra.mxu1 %v751_v2 }
   0x8   :  { %706 = vmatprep.subr.bf16.mxu1 %v758_v0  ;;  %722 = vmatprep.subr.bf16.mxu0 %v758_v0 }
   0xa   :  { %695 = vmatmul.mubr.msk.bf16.vlgmr.msra.gmra.mxu0 %vm60_vm1, %v45_v7  ;;  %703 = vmatmul.mubr.msk.bf16.vlgmr.msra.gmra.mxu1 %vm60_vm1, %v47_v8 }
   0xb   :  { %698 = vmatprep.mubr.msk.bf16.mxu0 %vm759_vm0, %v758_v0  ;;  %710 = vmatprep.mubr.msk.bf16.mxu1 %vm759_vm0, %v758_v0 }
   0xc   :  { %707 = vmatpush3.bf16.msra.mxu1 %v752_v12  ;;  %723 = vmatpush3.bf16.msra.mxu0 %v754_v14 }
   0xd   :  { %708 = vmatprep.subr.bf16.mxu1 %v758_v0  ;;  %724 = vmatprep.subr.bf16.mxu0 %v758_v0 }
  0x10   :  { %709 = vmatpush3.bf16.msra.mxu1 %v753_v13  ;;  %725 = vmatpush3.bf16.msra.mxu0 %v755_v15 }
  0x11   :  { %726 = vmatprep.subr.bf16.mxu0 %v758_v0 }
  0x12   :  { %699 = vmatmul.mubr.msk.bf16.gmra.mxu0 %vm60_vm1, %v46_v11 }
  0x13   :  { %730 = vmatprep.mubr.msk.bf16.mxu0 %vm759_vm0, %v758_v0 }
  0xca   :  { %v104_v17 = vpop.f32.mrf.mxu0  ;;  %v120_v18 = vpop.f32.mrf.mxu1 }
  0xcb   :  { %v127_v19 = vadd.f32 %v104_v17, %v29_v16  ;;  %v131_v41 = vadd.f32 %v120_v18, %v33_v32 }
  0xcc   :  { %v696_v20 = vpop.f32.mrf.mxu0  ;;  %v704_v22 = vpop.f32.mrf.mxu1 }
  0xcd   :  { %v140_v23 = vrot.slane %v127_v19, 7  ;;  %v159_v31 = vrot.slane %v127_v19, 1  ;;  %v146_v53 = vrot.slane %v131_v41, 7  ;;  %v165_v58 = vrot.slane %v131_v41, 1 }
  0xce   :  { %v107_v24 = vpop.f32.mrf.mxu0  ;;  %v123_v25 = vpop.f32.mrf.mxu1 }
  0xcf   :  { %v156_v26 = vsel %vm139_vm2, %v127_v19, %v140_v23  ;;  %v128_v27 = vadd.f32 %v107_v24, %v30_v21  ;;  %v132_v45 = vadd.f32 %v123_v25, %v34_v36 }
  0xd0   :  { %v697_v28 = vpop.f32.mrf.mxu0  ;;  %v705_v30 = vpop.f32.mrf.mxu1  ;;  %v177_v35 = vadd.f32 %v156_v26, %v127_v19 }
  0xd1   :  { %v141_v33 = vrot.slane %v128_v27, 7  ;;  %v160_v34 = vrot.slane %v128_v27, 1  ;;  %v148_v59 = vrot.slane %v132_v45, 7  ;;  %v167_v8 = vrot.slane %v132_v45, 1  ;;  %v756_v28 = vld [vmem:[%s1129_s5 + $0x8] sm:$0xff]  }
  0xd2   :  { %v112_v37 = vpop.f32.mrf.mxu0  ;;  %727 = vmatpush3.bf16.msra.mxu0 %v756_v28  ;;  %v948_v30 = vld [vmem:[%s1131_s6] ss:$0 sm:$0xff] }
  0xd3   :  { %v142_v38 = vsel %vm139_vm2, %v140_v23, %v141_v33  ;;  %v161_v39 = vsel %vm158_vm3, %v159_v31, %v160_v34  ;;  %v129_v40 = vadd.f32 %v112_v37, %v31_v29  ;;  %v149_v7 = vsel %vm139_vm2, %v146_v53, %v148_v59  ;;  %728 = vmatprep.subr.bf16.mxu0 %v758_v0  ;;  %v757_v29 = vld [vmem:[%s1129_s5] sm:$0xff]  }
  0xd4   :  { %v183_v42 = vadd.f32 %v177_v35, %v161_v39  ;;  %v700_v43 = vpop.f32.mrf.mxu0  ;;  %v178_v48 = vadd.f32 %v142_v38, %v128_v27  ;;  %v168_v13 = vsel %vm158_vm3, %v165_v58, %v167_v8  ;;  %v182_v14 = vadd.f32 %v149_v7, %v132_v45  ;;  %574 = vrot.lane.b32.xlu0 %v948_v30, %s760_s20  ;;  %v473_v7 = vld [vmem:[%s1132_s1] sm:$0xff] }
  0xd5   :  { %v143_v46 = vrot.slane %v129_v40, 7  ;;  %v162_v47 = vrot.slane %v129_v40, 1  ;;  %v176_v17 = vsel %vm158_vm3, %v167_v8, %v132_v45 }
  0xd6   :  { %v115_v49 = vpop.f32.mrf.mxu0  ;;  %v888_v54 = vmul.f32 0.33333334, %v183_v42  ;;  %v188_v21 = vadd.f32 %v182_v14, %v176_v17  ;;  %729 = vmatpush3.bf16.msra.mxu0 %v757_v29 }
  0xd7   :  { %v144_v50 = vsel %vm139_vm2, %v141_v33, %v143_v46  ;;  %v130_v51 = vadd.f32 %v115_v49, %v32_v44  ;;  %v163_v52 = vsel %vm158_vm3, %v160_v34, %v162_v47  ;;  %v175_v1 = vsel %vm158_vm3, %v162_v47, %v129_v40 }
  0xd8   :  { %v179_v55 = vadd.f32 %v144_v50, %v129_v40  ;;  %v701_v56 = vpop.f32.mrf.mxu0  ;;  %v184_v57 = vadd.f32 %v178_v48, %v163_v52  ;;  %v896_v4 = vsub.f32 %v127_v19, %v888_v54  ;;  %v925_v24 = vmul.f32 0.33333334, %v188_v21  ;;  %607 = vrot.lane.b32.xlu0 %v948_v30, %s761_s21  ;;  %v474_v21 = vld [vmem:[%s1132_s1 + $0x8] sm:$0xff] }
  0xd9   :  { %v145_v60 = vrot.slane %v130_v51, 7  ;;  %v164_v61 = vrot.slane %v130_v51, 1  ;;  %v479_v14 = vadd.f32 %v473_v7, %v888_v54 }
  0xda   :  { %v890_v62 = vmul.f32 0.33333334, %v184_v57  ;;  %v185_v6 = vadd.f32 %v179_v55, %v175_v1  ;;  %v933_v26 = vsub.f32 %v132_v45, %v925_v24 }
  0xdb   :  { %v157_v63 = vsel %vm139_vm2, %v130_v51, %v145_v60  ;;  %v147_v2 = vsel %vm139_vm2, %v145_v60, %v146_v53  ;;  %v166_v9 = vsel %vm158_vm3, %v164_v61, %v165_v58 }
  0xdc   :  { %v180_v3 = vadd.f32 %v157_v63, %v130_v51  ;;  %v899_v5 = vsub.f32 %v128_v27, %v890_v62  ;;  %v181_v12 = vadd.f32 %v147_v2, %v131_v41  ;;  %v907_v15 = vmul.f32 0.33333334, %v185_v6 }
  0xde   :  { %v206_v10 = vpack.c.bf16 %v899_v5, %v896_v4  ;;  %v186_v11 = vadd.f32 %v180_v3, %v166_v9  ;;  %v187_v19 = vadd.f32 %v181_v12, %v168_v13  ;;  %v918_v20 = vsub.f32 %v129_v40, %v907_v15 }
  0xe0   :  { %711 = vmatmul.mubr.msk.bf16.vlgmr.msra.gmra.mxu1 %vm60_vm1, %v206_v10  ;;  %v909_v16 = vmul.f32 0.33333334, %v186_v11  ;;  %v922_v23 = vmul.f32 0.33333334, %v187_v19 }
  0xe1   :  { %714 = vmatprep.mubr.msk.bf16.mxu1 %vm759_vm0, %v758_v0 }
  0xe2   :  { %v915_v18 = vsub.f32 %v130_v51, %v909_v16  ;;  %v930_v25 = vsub.f32 %v131_v41, %v922_v23 }
  0xe4   :  { %v207_v22 = vpack.c.bf16 %v915_v18, %v918_v20  ;;  %v208_v27 = vpack.c.bf16 %v933_v26, %v930_v25 }
  0xe8   :  { %715 = vmatmul.mubr.msk.bf16.gmra.mxu1 %vm60_vm1, %v207_v22 }
  0xe9   :  { %718 = vmatprep.mubr.msk.bf16.mxu1 %vm759_vm0, %v758_v0 }
  0xf0   :  { %719 = vmatmul.mubr.msk.bf16.gmra.mxu1 %vm60_vm1, %v208_v27 }
 0x146   :  { %v976_v19 = vpop.permute.xlu0 %574 }
 0x1a0   :  { %v264_v31 = vpop.f32.mrf.mxu1 }
 0x1a1   :  { %v287_v34 = vmax.f32 %v264_v31, 0.0 }
 0x1a2   :  { %v712_v32 = vpop.f32.mrf.mxu1 }
 0x1a4   :  { %v267_v33 = vpop.f32.mrf.mxu1 }
 0x1a5   :  { %v288_v35 = vmax.f32 %v267_v33, 0.0 }
 0x1a6   :  { %v713_v36 = vpop.f32.mrf.mxu1 }
 0x1a7   :  { %v301_v37 = vpack.c.bf16 %v288_v35, %v287_v34 }
 0x1a8   :  { %v272_v38 = vpop.f32.mrf.mxu1 }
 0x1a9   :  { %731 = vmatmul.mubr.msk.bf16.vlgmr.msra.gmra.mxu0 %vm328_vm4, %v301_v37  ;;  %v289_v41 = vmax.f32 %v272_v38, 0.0  ;;  %v480_v37 = vadd.f32 %v474_v21, %v890_v62 }
 0x1aa   :  { %v716_v39 = vpop.f32.mrf.mxu1  ;;  %734 = vmatprep.mubr.msk.bf16.mxu0 %vm759_vm0, %v758_v0 }
 0x1ac   :  { %v275_v40 = vpop.f32.mrf.mxu1 }
 0x1ad   :  { %v290_v42 = vmax.f32 %v275_v40, 0.0 }
 0x1ae   :  { %v717_v43 = vpop.f32.mrf.mxu1 }
 0x1af   :  { %v302_v44 = vpack.c.bf16 %v290_v42, %v289_v41 }
 0x1b0   :  { %v280_v45 = vpop.f32.mrf.mxu1 }
 0x1b1   :  { %735 = vmatmul.mubr.msk.bf16.gmra.mxu0 %vm328_vm4, %v302_v44  ;;  %v291_v48 = vmax.f32 %v280_v45, 0.0 }
 0x1b2   :  { %v720_v46 = vpop.f32.mrf.mxu1  ;;  %738 = vmatprep.mubr.msk.bf16.mxu0 %vm759_vm0, %v758_v0 }
 0x1b4   :  { %v283_v47 = vpop.f32.mrf.mxu1 }
 0x1b5   :  { %v292_v49 = vmax.f32 %v283_v47, 0.0 }
 0x1b6   :  { %v721_v50 = vpop.f32.mrf.mxu1 }
 0x1b7   :  { %v303_v51 = vpack.c.bf16 %v292_v49, %v291_v48 }
 0x1b9   :  { %739 = vmatmul.mubr.msk.bf16.gmra.mxu0 %vm328_vm4, %v303_v51 }
 0x269   :  { %v372_v52 = vpop.f32.mrf.mxu0 }
 0x26a   :  { %v395_v53 = vadd.f32 %v372_v52, %v896_v4 }
 0x26b   :  { %v732_v55 = vpop.f32.mrf.mxu0 }
 0x26c   :  { %v407_v56 = vrot.slane %v395_v53, 7  ;;  %v425_v61 = vrot.slane %v395_v53, 1 }
 0x26d   :  { %v375_v57 = vpop.f32.mrf.mxu0 }
 0x26e   :  { %v396_v58 = vadd.f32 %v375_v57, %v899_v5  ;;  %v423_v59 = vsel %vm139_vm2, %v395_v53, %v407_v56 }
 0x26f   :  { %v733_v60 = vpop.f32.mrf.mxu0  ;;  %v443_v2 = vadd.f32 %v423_v59, %v395_v53 }
 0x270   :  { %v408_v0 = vrot.slane %v396_v58, 7  ;;  %v426_v63 = vrot.slane %v396_v58, 1 }
 0x271   :  { %v380_v1 = vpop.f32.mrf.mxu0 }
 0x272   :  { %v409_v3 = vsel %vm139_vm2, %v407_v56, %v408_v0  ;;  %v964_v6 = vadd.f32 %v380_v1, %v918_v20  ;;  %v427_v4 = vsel %vm158_vm3, %v425_v61, %v426_v63 }
 0x273   :  { %v736_v5 = vpop.f32.mrf.mxu0  ;;  %v449_v8 = vadd.f32 %v443_v2, %v427_v4  ;;  %v444_v11 = vadd.f32 %v409_v3, %v396_v58 }
 0x274   :  { %v410_v9 = vrot.slane %v964_v6, 7  ;;  %v428_v10 = vrot.slane %v964_v6, 1 }
 0x275   :  { %v383_v12 = vpop.f32.mrf.mxu0  ;;  %v455_v13 = vmul.f32 0.33333334, %v449_v8 }
 0x276   :  { %v974_v17 = vadd.f32 %v383_v12, %v915_v18  ;;  %v429_v20 = vsel %vm158_vm3, %v426_v63, %v428_v10  ;;  %v411_v22 = vsel %vm139_vm2, %v408_v0, %v410_v9  ;;  %v475_v18 = vld [vmem:[%s1132_s1 + $0x10] sm:$0xff]  ;;  %v441_v33 = vsel %vm158_vm3, %v428_v10, %v964_v6  ;;  %v476_v9 = vld [vmem:[%s1132_s1 + $0x18] sm:$0xff]  ;;  %v1034_v10 = vpop.permute.xlu0 %607 }
 0x277   :  { %v737_v27 = vpop.f32.mrf.mxu0  ;;  %v983_v28 = vadd.f32 %v479_v14, %v455_v13  ;;  %v461_v29 = vsub.f32 %v395_v53, %v455_v13  ;;  %v450_v31 = vadd.f32 %v444_v11, %v429_v20  ;;  %v445_v54 = vadd.f32 %v411_v22, %v964_v6 }
 0x278   :  { %v412_v32 = vrot.slane %v974_v17, 7  ;;  %v481_v41 = vadd.f32 %v475_v18, %v907_v15  ;;  %v430_v42 = vrot.slane %v974_v17, 1 }
 0x279   :  { %v388_v34 = vpop.f32.mrf.mxu0  ;;  %v577_v35 = vmul.f32 %v976_v19, %v983_v28  ;;  %467 = vst.msk [vmem:[%s1133_s7] sm:$0xff] %vm60_vm1, %v461_v29  ;;  %v456_v36 = vmul.f32 0.33333334, %v450_v31  ;;  %v451_v38 = vadd.f32 %v445_v54, %v441_v33  ;;  %v502_v49 = vrot.slane %v983_v28, 7  ;;  %v477_v29 = vld [vmem:[%s1132_s1 + $0x20] sm:$0xff] }
 0x27a   :  { %v424_v39 = vsel %vm139_vm2, %v974_v17, %v412_v32  ;;  %v1002_v40 = vadd.f32 %v388_v34, %v930_v25  ;;  %v518_v57 = vrot.slane %v983_v28, 1  ;;  %v478_v28 = vld [vmem:[%s1132_s1 + $0x28] sm:$0xff]  ;;  %v482_v33 = vadd.f32 %v476_v9, %v909_v16 }
 0x27b   :  { %v740_v43 = vpop.f32.mrf.mxu0  ;;  %v583_v44 = vsel %vm60_vm1, %v577_v35, 0.0  ;;  %v486_v45 = vadd.f32 %v480_v37, %v456_v36  ;;  %v462_v46 = vsub.f32 %v396_v58, %v456_v36  ;;  %v457_v48 = vmul.f32 0.33333334, %v451_v38 }
 0x27c   :  { %v413_v47 = vrot.slane %v1002_v40, 7  ;;  %v431_v62 = vrot.slane %v1002_v40, 1  ;;  %584 = vadd.xlane.f32.xlu1 %v583_v44  ;;  %v446_v25 = vadd.f32 %v424_v39, %v974_v17  ;;  %v484_v38 = vadd.f32 %v478_v28, %v925_v24 }
 0x27d   :  { %v391_v50 = vpop.f32.mrf.mxu0  ;;  %v578_v15 = vmul.f32 %v976_v19, %v486_v45  ;;  %468 = vst.msk [vmem:[%s1133_s7 + $0x8] sm:$0xff] %vm60_vm1, %v462_v46  ;;  %v503_v51 = vrot.slane %v486_v45, 7  ;;  %v519_v52 = vrot.slane %v486_v45, 1  ;;  %v487_v56 = vadd.f32 %v481_v41, %v457_v48 }
 0x27e   :  { %v432_v53 = vsel %vm158_vm3, %v430_v42, %v431_v62  ;;  %v400_v55 = vadd.f32 %v391_v50, %v933_v26  ;;  %v414_v58 = vsel %vm139_vm2, %v412_v32, %v413_v47  ;;  %v463_v0 = vsub.f32 %v964_v6, %v457_v48 }
 0x27f   :  { %v452_v59 = vadd.f32 %v446_v25, %v432_v53  ;;  %v741_v60 = vpop.f32.mrf.mxu0  ;;  %v586_v61 = vsel %vm60_vm1, %v578_v15, 0.0  ;;  %v579_v2 = vmul.f32 %v976_v19, %v487_v56  ;;  %v494_v3 = vrot.slane %v487_v56, 7 }
 0x280   :  { %v415_v63 = vrot.slane %v400_v55, 7  ;;  %v433_v1 = vrot.slane %v400_v55, 1  ;;  %587 = vadd.xlane.f32.xlu1 %v586_v61  ;;  %469 = vst.msk [vmem:[%s1133_s7 + $0x10] sm:$0xff] %vm60_vm1, %v463_v0  ;;  %v504_v26 = vsel %vm139_vm2, %v502_v49, %v503_v51  ;;  %v521_v4 = vrot.slane %v487_v56, 1 }
 0x281   :  { %v520_v7 = vsel %vm158_vm3, %v518_v57, %v519_v52  ;;  %v458_v5 = vmul.f32 0.33333334, %v452_v59  ;;  %v589_v8 = vsel %vm60_vm1, %v579_v2, 0.0  ;;  %v505_v6 = vsel %vm139_vm2, %v503_v51, %v494_v3 }
 0x282   :  { %v546_v11 = vmul.f32 %v948_v30, %v505_v6  ;;  %v545_v12 = vmul.f32 %v948_v30, %v504_v26  ;;  %v522_v13 = vsel %vm158_vm3, %v519_v52, %v521_v4  ;;  %v416_v14 = vsel %vm139_vm2, %v413_v47, %v415_v63 }
 0x283   :  { %v447_v20 = vadd.f32 %v414_v58, %v1002_v40  ;;  %v611_v21 = vmul.f32 %v1034_v10, %v522_v13  ;;  %v442_v22 = vsel %vm158_vm3, %v433_v1, %v400_v55  ;;  %v448_v27 = vadd.f32 %v416_v14, %v400_v55 }
 0x284   :  { %590 = vadd.xlane.f32.xlu1 %v589_v8  ;;  %v556_v31 = vsel %vm60_vm1, %v546_v11, 0.0  ;;  %v516_v54 = vsel %vm139_vm2, %v494_v3, %v502_v49  ;;  %v434_v18 = vsel %vm158_vm3, %v431_v62, %v433_v1  ;;  %v464_v32 = vsub.f32 %v974_v17, %v458_v5 }
 0x285   :  { %557 = vadd.xlane.f32.xlu0 %v556_v31  ;;  %v454_v34 = vadd.f32 %v448_v27, %v442_v22  ;;  %v453_v35 = vadd.f32 %v447_v20, %v434_v18  ;;  %v553_v36 = vsel %vm60_vm1, %v545_v12, 0.0  ;;  %v610_v37 = vmul.f32 %v1034_v10, %v520_v7 }
 0x286   :  { %470 = vst.msk [vmem:[%s1133_s7 + $0x18] sm:$0xff] %vm60_vm1, %v464_v32  ;;  %v536_v39 = vsel %vm158_vm3, %v521_v4, %v518_v57  ;;  %v483_v17 = vadd.f32 %v477_v29, %v922_v23  ;;  %v488_v42 = vadd.f32 %v482_v33, %v458_v5  ;;  %v619_v43 = vsel %vm60_vm1, %v611_v21, 0.0 }
 0x287   :  { %v460_v16 = vmul.f32 0.33333334, %v454_v34  ;;  %v459_v41 = vmul.f32 0.33333334, %v453_v35  ;;  %v544_v44 = vmul.f32 %v948_v30, %v516_v54  ;;  %v616_v62 = vsel %vm60_vm1, %v610_v37, 0.0 }
 0x288   :  { %554 = vadd.xlane.f32.xlu1 %v553_v36  ;;  %v523_v23 = vrot.slane %v488_v42, 1  ;;  %v612_v57 = vmul.f32 %v1034_v10, %v536_v39  ;;  %v580_v2 = vmul.f32 %v976_v19, %v488_v42 }
 0x289   :  { %620 = vadd.xlane.f32.xlu0 %v619_v43  ;;  %v490_v45 = vadd.f32 %v484_v38, %v460_v16  ;;  %v466_v24 = vsub.f32 %v400_v55, %v460_v16  ;;  %v465_v46 = vsub.f32 %v1002_v40, %v459_v41  ;;  %v489_v47 = vadd.f32 %v483_v17, %v459_v41 }
 0x28a   :  { %v506_v40 = vrot.slane %v488_v42, 7  ;;  %v550_v52 = vsel %vm60_vm1, %v544_v44, 0.0  ;;  %v622_v1 = vsel %vm60_vm1, %v612_v57, 0.0  ;;  %v592_v26 = vsel %vm60_vm1, %v580_v2, 0.0 }
 0x28b   :  { %v582_v48 = vmul.f32 %v976_v19, %v490_v45  ;;  %472 = vst.msk [vmem:[%s1133_s7 + $0x28] sm:$0xff] %vm60_vm1, %v466_v24  ;;  %471 = vst.msk [vmem:[%s1133_s7 + $0x20] sm:$0xff] %vm60_vm1, %v465_v46  ;;  %v524_v49 = vrot.slane %v489_v47, 1  ;;  %v526_v25 = vrot.slane %v490_v45, 1  ;;  %v507_v50 = vrot.slane %v489_v47, 7 }
 0x28c   :  { %617 = vadd.xlane.f32.xlu1 %v616_v62  ;;  %v495_v15 = vrot.slane %v490_v45, 7  ;;  %v581_v4 = vmul.f32 %v976_v19, %v489_v47 }
 0x28d   :  { %v598_v51 = vsel %vm60_vm1, %v582_v48, 0.0  ;;  %v525_v53 = vsel %vm158_vm3, %v523_v23, %v524_v49  ;;  %v537_v55 = vsel %vm158_vm3, %v526_v25, %v523_v23  ;;  %v508_v58 = vsel %vm139_vm2, %v506_v40, %v507_v50 }
 0x28e   :  { %599 = vadd.xlane.f32.xlu0 %v598_v51  ;;  %v613_v56 = vmul.f32 %v1034_v10, %v525_v53  ;;  %v517_v59 = vsel %vm139_vm2, %v495_v15, %v506_v40  ;;  %v509_v60 = vsel %vm139_vm2, %v507_v50, %v495_v15  ;;  %v527_v61 = vsel %vm158_vm3, %v524_v49, %v526_v25 }
 0x28f   :  { %v615_v63 = vmul.f32 %v1034_v10, %v537_v55  ;;  %v595_v7 = vsel %vm60_vm1, %v581_v4, 0.0  ;;  %v548_v5 = vmul.f32 %v948_v30, %v508_v58  ;;  %v547_v6 = vmul.f32 %v948_v30, %v517_v59 }
 0x290   :  { %551 = vadd.xlane.f32.xlu1 %v550_v52  ;;  %v625_v0 = vsel %vm60_vm1, %v613_v56, 0.0  ;;  %v549_v11 = vmul.f32 %v948_v30, %v509_v60  ;;  %v614_v19 = vmul.f32 %v1034_v10, %v527_v61 }
 0x291   :  { %v631_v3 = vsel %vm60_vm1, %v615_v63, 0.0  ;;  %v562_v8 = vsel %vm60_vm1, %v548_v5, 0.0  ;;  %v559_v9 = vsel %vm60_vm1, %v547_v6, 0.0 }
 0x292   :  { %626 = vadd.xlane.f32.xlu0 %v625_v0  ;;  %v565_v12 = vsel %vm60_vm1, %v549_v11, 0.0  ;;  %v628_v13 = vsel %vm60_vm1, %v614_v19, 0.0 }
 0x294   :  { %623 = vadd.xlane.f32.xlu1 %v622_v1 }
 0x296   :  { %632 = vadd.xlane.f32.xlu0 %v631_v3 }
 0x298   :  { %593 = vadd.xlane.f32.xlu1 %v592_v26 }
 0x29c   :  { %596 = vadd.xlane.f32.xlu1 %v595_v7 }
 0x2a0   :  { %563 = vadd.xlane.f32.xlu1 %v562_v8 }
 0x2a4   :  { %560 = vadd.xlane.f32.xlu1 %v559_v9 }
 0x2a8   :  { %566 = vadd.xlane.f32.xlu1 %v565_v12 }
 0x2ac   :  { %629 = vadd.xlane.f32.xlu1 %v628_v13 }
 0x305   :  { %v585_v14 = vpop.xlane.xlu1 %584 }
 0x309   :  { %v588_v20 = vpop.xlane.xlu1 %587 }
 0x30d   :  { %v591_v21 = vpop.xlane.xlu1 %590 }
 0x30e   :  { %v558_v22 = vpop.xlane.xlu0 %557 }
 0x30f   :  { %v603_v18 = vadd.f32 %v591_v21, %v558_v22 }
 0x311   :  { %v555_v27 = vpop.xlane.xlu1 %554 }
 0x312   :  { %v602_v28 = vadd.f32 %v588_v20, %v555_v27  ;;  %v621_v29 = vpop.xlane.xlu0 %620 }
 0x314   :  { %v635_v31 = vadd.f32 %v621_v29, %v602_v28 }
 0x315   :  { %v618_v54 = vpop.xlane.xlu1 %617 }
 0x316   :  { %642 = vst.msk [vmem:[%s1134_s8 + $0x8] sm:$0xff] %vm640_vm5, %v635_v31 }
 0x317   :  { %v600_v37 = vpop.xlane.xlu0 %599 }
 0x319   :  { %v552_v30 = vpop.xlane.xlu1 %551 }
 0x31a   :  { %v601_v10 = vadd.f32 %v585_v14, %v552_v30 }
 0x31b   :  { %v627_v39 = vpop.xlane.xlu0 %626 }
 0x31c   :  { %v634_v32 = vadd.f32 %v618_v54, %v601_v10 }
 0x31d   :  { %v624_v33 = vpop.xlane.xlu1 %623 }
 0x31e   :  { %641 = vst.msk [vmem:[%s1134_s8] sm:$0xff] %vm640_vm5, %v634_v32  ;;  %v636_v34 = vadd.f32 %v624_v33, %v603_v18 }
 0x31f   :  { %v633_v44 = vpop.xlane.xlu0 %632 }
 0x320   :  { %643 = vst.msk [vmem:[%s1134_s8 + $0x10] sm:$0xff] %vm640_vm5, %v636_v34 }
 0x321   :  { %v594_v35 = vpop.xlane.xlu1 %593 }
 0x325   :  { %v597_v36 = vpop.xlane.xlu1 %596 }
 0x329   :  { %v564_v38 = vpop.xlane.xlu1 %563 }
 0x32a   :  { %v605_v45 = vadd.f32 %v597_v36, %v564_v38 }
 0x32d   :  { %v561_v17 = vpop.xlane.xlu1 %560 }
 0x32e   :  { %v604_v16 = vadd.f32 %v594_v35, %v561_v17 }
 0x330   :  { %v637_v41 = vadd.f32 %v627_v39, %v604_v16 }
 0x331   :  { %v567_v42 = vpop.xlane.xlu1 %566 }
 0x332   :  { %644 = vst.msk [vmem:[%s1134_s8 + $0x18] sm:$0xff] %vm640_vm5, %v637_v41  ;;  %v606_v43 = vadd.f32 %v600_v37, %v567_v42 }
 0x334   :  { %v639_v24 = vadd.f32 %v633_v44, %v606_v43 }
 0x335   :  { %v630_v46 = vpop.xlane.xlu1 %629 }
 0x336   :  { %646 = vst.msk [vmem:[%s1134_s8 + $0x28] sm:$0xff] %vm640_vm5, %v639_v24  ;;  %v638_v47 = vadd.f32 %v630_v46, %v605_v45 }
 0x338   :  { %645 = vst.msk [vmem:[%s1134_s8 + $0x20] sm:$0xff] %vm640_vm5, %v638_v47 }

// kernel: model_forward.17
= control target key start
LH: loop header
LB: loop body
LE: loop exit
PB: predicated region body
PF: predicated region fallthrough
CT: control target
= control target key end

     0   :  { %vm33_vm0 = vcmask 261120   ;;  %vm224_vm1 = vcmask 7168   ;;  %s392_s0 = inlined_call_operand.vmem [shape: f32[2,24,32], index: 0, kind: input, shape index: {}]   ;;  %s393_s4 = inlined_call_operand.<no memory space> [shape: f32[1,1], index: 4, kind: input, shape index: {}]   ;;  %s394_s1 = inlined_call_operand.vmem [shape: f32[1,32], index: 1, kind: input, shape index: {}]   ;;  %s395_s2 = inlined_call_operand.vmem [shape: f32[1,32], index: 2, kind: input, shape index: {}]   ;;  %s396_s3 = inlined_call_operand.vmem [shape: f32[1,32], index: 3, kind: input, shape index: {}]   ;;  %s397_s5 = inlined_call_operand.vmem [shape: f32[2,24,1], index: 5, kind: input, shape index: {}]   ;;  %s398_s6 = inlined_call_operand.vmem [shape: f32[2,24,1], index: 6, kind: output, shape index: {}]  }
   0x1   :  { %v25_v0 = vld [vmem:[%s392_s0] sm:$0xff]  ;;  %v28_v1 = vld [vmem:[%s392_s0 + $0x18] sm:$0xff]  ;;  %v26_v2 = vld [vmem:[%s392_s0 + $0x8] sm:$0xff]  ;;  %v11_v42 = vstv %s393_s4 }
   0x2   :  { %v34_v3 = vsel %vm33_vm0, %v25_v0, 0.0  ;;  %v43_v4 = vsel %vm33_vm0, %v28_v1, 0.0  ;;  %v29_v5 = vld [vmem:[%s392_s0 + $0x20] sm:$0xff]  ;;  %v37_v6 = vsel %vm33_vm0, %v26_v2, 0.0  ;;  %v27_v8 = vld [vmem:[%s392_s0 + $0x10] sm:$0xff]  ;;  %v30_v9 = vld [vmem:[%s392_s0 + $0x28] sm:$0xff] }
   0x3   :  { %35 = vadd.xlane.f32.xlu0 %v34_v3  ;;  %44 = vadd.xlane.f32.xlu1 %v43_v4  ;;  %v46_v7 = vsel %vm33_vm0, %v29_v5, 0.0  ;;  %v40_v10 = vsel %vm33_vm0, %v27_v8, 0.0  ;;  %v49_v11 = vsel %vm33_vm0, %v30_v9, 0.0  ;;  %12 = vst [vmem:[#allocation2] sm:$0x1] %v11_v42 }
   0x4   :  { %v235_v63 = vld [vmem:[%s394_s1] ss:$0 sm:$0xff] }
   0x7   :  { %38 = vadd.xlane.f32.xlu0 %v37_v6  ;;  %47 = vadd.xlane.f32.xlu1 %v46_v7 }
   0xb   :  { %41 = vadd.xlane.f32.xlu0 %v40_v10  ;;  %50 = vadd.xlane.f32.xlu1 %v49_v11 }
  0x8c   :  { %v36_v12 = vpop.xlane.xlu0 %35  ;;  %v45_v13 = vpop.xlane.xlu1 %44 }
  0x8d   :  { %v53_v14 = vmul.f32 0.03125, %v36_v12  ;;  %v56_v15 = vmul.f32 0.03125, %v45_v13 }
  0x8f   :  { %v59_v16 = vsub.f32 %v25_v0, %v53_v14  ;;  %v310_v17 = vsub.f32 %v28_v1, %v56_v15 }
  0x90   :  { %v39_v18 = vpop.xlane.xlu0 %38  ;;  %v48_v19 = vpop.xlane.xlu1 %47 }
  0x91   :  { %v54_v20 = vmul.f32 0.03125, %v39_v18  ;;  %v57_v21 = vmul.f32 0.03125, %v48_v19  ;;  %v65_v22 = vmul.f32 %v59_v16, %v59_v16  ;;  %v68_v23 = vmul.f32 %v310_v17, %v310_v17 }
  0x93   :  { %v60_v24 = vsub.f32 %v26_v2, %v54_v20  ;;  %v314_v25 = vsub.f32 %v29_v5, %v57_v21  ;;  %v71_v26 = vsel %vm33_vm0, %v65_v22, 0.0  ;;  %v80_v29 = vsel %vm33_vm0, %v68_v23, 0.0  ;;  %v236_v5 = vld [vmem:[%s395_s2] ss:$0 sm:$0xff] }
  0x94   :  { %72 = vadd.xlane.f32.xlu0 %v71_v26  ;;  %v42_v27 = vpop.xlane.xlu0 %41  ;;  %v51_v28 = vpop.xlane.xlu1 %50 }
  0x95   :  { %v55_v30 = vmul.f32 0.03125, %v42_v27  ;;  %v58_v31 = vmul.f32 0.03125, %v51_v28  ;;  %v66_v32 = vmul.f32 %v60_v24, %v60_v24  ;;  %v69_v33 = vmul.f32 %v314_v25, %v314_v25 }
  0x97   :  { %v61_v34 = vsub.f32 %v27_v8, %v55_v30  ;;  %v64_v35 = vsub.f32 %v30_v9, %v58_v31  ;;  %v74_v36 = vsel %vm33_vm0, %v66_v32, 0.0  ;;  %v83_v37 = vsel %vm33_vm0, %v69_v33, 0.0 }
  0x98   :  { %81 = vadd.xlane.f32.xlu0 %v80_v29  ;;  %75 = vadd.xlane.f32.xlu1 %v74_v36 }
  0x99   :  { %v67_v38 = vmul.f32 %v61_v34, %v61_v34  ;;  %v70_v39 = vmul.f32 %v64_v35, %v64_v35 }
  0x9b   :  { %v77_v40 = vsel %vm33_vm0, %v67_v38, 0.0  ;;  %v86_v41 = vsel %vm33_vm0, %v70_v39, 0.0 }
  0x9c   :  { %84 = vadd.xlane.f32.xlu1 %v83_v37  ;;  %78 = vadd.xlane.f32.xlu0 %v77_v40 }
  0xa0   :  { %87 = vadd.xlane.f32.xlu1 %v86_v41 }
 0x11d   :  { %v73_v43 = vpop.xlane.xlu0 %72 }
 0x11e   :  { %v89_v44 = vmul.f32 0.03125, %v73_v43 }
 0x120   :  { %v95_v45 = vadd.f32 1e-05, %v89_v44 }
 0x121   :  { %v76_v46 = vpop.xlane.xlu1 %75  ;;  %v82_v47 = vpop.xlane.xlu0 %81 }
 0x122   :  { %239 = vrsqrt.f32 %v95_v45  ;;  %v90_v48 = vmul.f32 0.03125, %v76_v46  ;;  %v92_v49 = vmul.f32 0.03125, %v82_v47  ;;  %v237_v45 = vld [vmem:[%s396_s3] ss:$0 sm:$0xff] }
 0x124   :  { %v96_v50 = vadd.f32 1e-05, %v90_v48  ;;  %v98_v51 = vadd.f32 1e-05, %v92_v49 }
 0x125   :  { %v85_v52 = vpop.xlane.xlu1 %84  ;;  %v79_v53 = vpop.xlane.xlu0 %78 }
 0x126   :  { %241 = vrsqrt.f32 %v96_v50  ;;  %v93_v54 = vmul.f32 0.03125, %v85_v52  ;;  %v91_v55 = vmul.f32 0.03125, %v79_v53 }
 0x127   :  { %243 = vrsqrt.f32 %v98_v51 }
 0x128   :  { %v99_v56 = vadd.f32 1e-05, %v93_v54  ;;  %v97_v57 = vadd.f32 1e-05, %v91_v55 }
 0x129   :  { %v88_v58 = vpop.xlane.xlu1 %87 }
 0x12a   :  { %245 = vrsqrt.f32 %v99_v56  ;;  %v94_v59 = vmul.f32 0.03125, %v88_v58 }
 0x12b   :  { %247 = vrsqrt.f32 %v97_v57 }
 0x12c   :  { %v100_v60 = vadd.f32 1e-05, %v94_v59 }
 0x12e   :  { %249 = vrsqrt.f32 %v100_v60 }
 0x12f   :  { %v240_v61 = vpop.eup %239 }
 0x130   :  { %v107_v62 = vmul.f32 %v240_v61, %v59_v16 }
 0x132   :  { %v119_v3 = vmul.f32 %v235_v63, %v107_v62 }
 0x133   :  { %v242_v0 = vpop.eup %241 }
 0x134   :  { %v244_v1 = vpop.eup %243  ;;  %v108_v2 = vmul.f32 %v242_v0, %v60_v24  ;;  %v131_v13 = vadd.f32 %v236_v5, %v119_v3  ;;  %v213_v3 = vld [vmem:[%s397_s5 + $0x8] sm:$0xff] }
 0x135   :  { %v110_v4 = vmul.f32 %v244_v1, %v310_v17 }
 0x136   :  { %v120_v6 = vmul.f32 %v235_v63, %v108_v2  ;;  %v137_v22 = vsel %vm33_vm0, %v131_v13, 0.0  ;;  %v238_v2 = vld [vmem:[#allocation2] ss:$0 sm:$0xff] }
 0x137   :  { %v246_v7 = vpop.eup %245  ;;  %v122_v11 = vmul.f32 %v235_v63, %v110_v4 }
 0x138   :  { %v248_v8 = vpop.eup %247  ;;  %v111_v9 = vmul.f32 %v246_v7, %v314_v25  ;;  %v132_v10 = vadd.f32 %v236_v5, %v120_v6 }
 0x139   :  { %v109_v12 = vmul.f32 %v248_v8, %v61_v34  ;;  %v134_v17 = vadd.f32 %v236_v5, %v122_v11  ;;  %v215_v11 = vld [vmem:[%s397_s5 + $0x18] sm:$0xff] }
 0x13a   :  { %v123_v14 = vmul.f32 %v235_v63, %v111_v9  ;;  %v138_v18 = vsel %vm33_vm0, %v132_v10, 0.0 }
 0x13b   :  { %v250_v15 = vpop.eup %249  ;;  %v121_v16 = vmul.f32 %v235_v63, %v109_v12  ;;  %v139_v23 = vadd.f32 %v138_v18, %v137_v22  ;;  %v148_v29 = vsel %vm33_vm0, %v134_v17, 0.0 }
 0x13c   :  { %v112_v19 = vmul.f32 %v250_v15, %v64_v35  ;;  %v135_v20 = vadd.f32 %v236_v5, %v123_v14 }
 0x13d   :  { %v133_v21 = vadd.f32 %v236_v5, %v121_v16 }
 0x13e   :  { %v124_v24 = vmul.f32 %v235_v63, %v112_v19  ;;  %v149_v26 = vsel %vm33_vm0, %v135_v20, 0.0 }
 0x13f   :  { %v140_v25 = vsel %vm33_vm0, %v133_v21, 0.0  ;;  %v150_v30 = vadd.f32 %v149_v26, %v148_v29 }
 0x140   :  { %v141_v27 = vadd.f32 %v140_v25, %v139_v23  ;;  %v136_v28 = vadd.f32 %v236_v5, %v124_v24  ;;  %v212_v5 = vld [vmem:[%s397_s5] sm:$0xff] }
 0x142   :  { %v142_v31 = vrot.slane %v141_v27, 4  ;;  %v151_v32 = vsel %vm33_vm0, %v136_v28, 0.0 }
 0x143   :  { %v152_v33 = vadd.f32 %v151_v32, %v150_v30 }
 0x144   :  { %v143_v34 = vadd.f32 %v142_v31, %v141_v27 }
 0x145   :  { %v153_v35 = vrot.slane %v152_v33, 4 }
 0x146   :  { %v144_v36 = vrot.slane %v143_v34, 2 }
 0x147   :  { %v154_v37 = vadd.f32 %v153_v35, %v152_v33 }
 0x148   :  { %v145_v38 = vadd.f32 %v144_v36, %v143_v34 }
 0x149   :  { %v155_v39 = vrot.slane %v154_v37, 2 }
 0x14a   :  { %v146_v40 = vrot.slane %v145_v38, 1 }
 0x14b   :  { %v156_v41 = vadd.f32 %v155_v39, %v154_v37 }
 0x14c   :  { %v147_v42 = vadd.f32 %v146_v40, %v145_v38 }
 0x14d   :  { %v157_v43 = vrot.slane %v156_v41, 1 }
 0x14e   :  { %v160_v44 = vmul.f32 0.041666668, %v147_v42 }
 0x14f   :  { %v158_v46 = vadd.f32 %v157_v43, %v156_v41 }
 0x150   :  { %v163_v47 = vsub.f32 %v132_v10, %v160_v44  ;;  %v162_v48 = vsub.f32 %v131_v13, %v160_v44  ;;  %v164_v49 = vsub.f32 %v133_v21, %v160_v44  ;;  %v214_v13 = vld [vmem:[%s397_s5 + $0x10] sm:$0xff]  ;;  %v216_v21 = vld [vmem:[%s397_s5 + $0x20] sm:$0xff] }
 0x151   :  { %v161_v50 = vmul.f32 0.041666668, %v158_v46 }
 0x152   :  { %v176_v51 = vmul.f32 %v237_v45, %v163_v47  ;;  %v175_v52 = vmul.f32 %v237_v45, %v162_v48  ;;  %v177_v54 = vmul.f32 %v237_v45, %v164_v49 }
 0x153   :  { %v165_v53 = vsub.f32 %v134_v17, %v161_v50  ;;  %v167_v57 = vsub.f32 %v136_v28, %v161_v50  ;;  %v166_v58 = vsub.f32 %v135_v20, %v161_v50  ;;  %v217_v17 = vld [vmem:[%s397_s5 + $0x28] sm:$0xff] }
 0x154   :  { %v184_v55 = vsel %vm33_vm0, %v176_v51, 0.0  ;;  %v181_v56 = vsel %vm33_vm0, %v175_v52, 0.0  ;;  %v187_v61 = vsel %vm33_vm0, %v177_v54, 0.0 }
 0x155   :  { %185 = vadd.xlane.f32.xlu1 %v184_v55  ;;  %182 = vadd.xlane.f32.xlu0 %v181_v56  ;;  %v178_v59 = vmul.f32 %v237_v45, %v165_v53  ;;  %v180_v62 = vmul.f32 %v237_v45, %v167_v57  ;;  %v179_v63 = vmul.f32 %v237_v45, %v166_v58 }
 0x157   :  { %v190_v60 = vsel %vm33_vm0, %v178_v59, 0.0  ;;  %v196_v0 = vsel %vm33_vm0, %v180_v62, 0.0  ;;  %v193_v1 = vsel %vm33_vm0, %v179_v63, 0.0 }
 0x159   :  { %191 = vadd.xlane.f32.xlu1 %v190_v60  ;;  %188 = vadd.xlane.f32.xlu0 %v187_v61 }
 0x15d   :  { %197 = vadd.xlane.f32.xlu1 %v196_v0  ;;  %194 = vadd.xlane.f32.xlu0 %v193_v1 }
 0x1de   :  { %v186_v4 = vpop.xlane.xlu1 %185  ;;  %v183_v6 = vpop.xlane.xlu0 %182 }
 0x1df   :  { %v207_v7 = vadd.f32 %v238_v2, %v186_v4  ;;  %v206_v8 = vadd.f32 %v238_v2, %v183_v6 }
 0x1e1   :  { %v219_v9 = vadd.f32 %v213_v3, %v207_v7  ;;  %v218_v10 = vadd.f32 %v212_v5, %v206_v8 }
 0x1e2   :  { %v192_v12 = vpop.xlane.xlu1 %191  ;;  %v189_v14 = vpop.xlane.xlu0 %188 }
 0x1e3   :  { %226 = vst.msk [vmem:[%s398_s6 + $0x8] sm:$0xff] %vm224_vm1, %v219_v9  ;;  %225 = vst.msk [vmem:[%s398_s6] sm:$0xff] %vm224_vm1, %v218_v10  ;;  %v209_v15 = vadd.f32 %v238_v2, %v192_v12  ;;  %v208_v16 = vadd.f32 %v238_v2, %v189_v14 }
 0x1e5   :  { %v221_v18 = vadd.f32 %v215_v11, %v209_v15  ;;  %v220_v19 = vadd.f32 %v214_v13, %v208_v16 }
 0x1e6   :  { %v198_v20 = vpop.xlane.xlu1 %197  ;;  %v195_v22 = vpop.xlane.xlu0 %194 }
 0x1e7   :  { %228 = vst.msk [vmem:[%s398_s6 + $0x18] sm:$0xff] %vm224_vm1, %v221_v18  ;;  %227 = vst.msk [vmem:[%s398_s6 + $0x10] sm:$0xff] %vm224_vm1, %v220_v19  ;;  %v211_v23 = vadd.f32 %v238_v2, %v198_v20  ;;  %v210_v24 = vadd.f32 %v238_v2, %v195_v22 }
 0x1e9   :  { %v223_v26 = vadd.f32 %v217_v17, %v211_v23  ;;  %v222_v25 = vadd.f32 %v216_v21, %v210_v24 }
 0x1eb   :  { %230 = vst.msk [vmem:[%s398_s6 + $0x28] sm:$0xff] %vm224_vm1, %v223_v26  ;;  %229 = vst.msk [vmem:[%s398_s6 + $0x20] sm:$0xff] %vm224_vm1, %v222_v25 }

</bundles_post_ra>
